<compile_context>
chip_gen: v7x
topology: tpu7x:2x2x1
jax: 0.10.0
libtpu: 0.0.40
codegen_flags: <defaults>
</compile_context>

<pallas_src>
import jax
import jax.numpy as jnp
from jax.experimental import pallas as pl
from jax.experimental.pallas import tpu as pltpu


_VMEM = pl.BlockSpec(memory_space=pltpu.MemorySpace.VMEM)
_LANE = 128


# ---------------------------------------------------------------------------
# Fused Pallas kernel: 3 dual-GCN stages + stacked gather + decoder1 + decoder2
# ---------------------------------------------------------------------------

def _skipgnn_kernel(x_ref, oadj_ref, sadj_ref, idx_ref,
                    w1cat_ref, w_o1s_ref, w_s1_ref, w_o2_ref, w_s2o_ref,
                    b1_ref, b2_ref, b3_ref,
                    d1t_ref, d1b_ref, d1bias_ref, d2_ref, d2bias_ref,
                    out_ref):
    f32 = jnp.float32
    bf16 = jnp.bfloat16

    n = oadj_ref.shape[0]
    nhid = w_s1_ref.shape[1]
    e2 = idx_ref.shape[0]          # 2E (idx0 stacked over idx1)
    e = e2 // 2

    def aggregate(top_bf16, bot_bf16, bias, relu):
        # Read the adjacency refs at each use (streamed into the MXU, short live
        # ranges) instead of hoisting an (N, 2N) value that blows the vreg file.
        y = (jnp.dot(oadj_ref[...], top_bf16, preferred_element_type=f32)
             + jnp.dot(sadj_ref[...], bot_bf16, preferred_element_type=f32)
             + bias)
        return jnp.maximum(y, 0.0) if relu else y

    # --- stage 1: o_x = relu(o_adj @ (x @ W_o1) + s_adj @ (x @ W_s1o) + b1) -----
    # Both supports come from x -> one fused (nfeat, 2*nhid) dot (256-wide MXU fill).
    s1 = jnp.dot(x_ref[...], w1cat_ref[...], preferred_element_type=f32)   # (N, 2*nhid)
    t1 = s1[:, :nhid].astype(bf16)            # x @ W_o1   (lane-aligned split at 128)
    u1 = s1[:, nhid:].astype(bf16)            # x @ W_s1o
    o_x = aggregate(t1, u1, b1_ref[...], relu=True)
    o_xb = o_x.astype(bf16)

    # --- stage 2: s_x = relu(o_adj @ (o_x @ W_o1s) + s_adj @ (x @ W_s1) + b2) ---
    t2 = jnp.dot(o_xb, w_o1s_ref[...], preferred_element_type=f32).astype(bf16)
    u2 = jnp.dot(x_ref[...], w_s1_ref[...], preferred_element_type=f32).astype(bf16)
    s_x = aggregate(t2, u2, b2_ref[...], relu=True)
    s_xb = s_x.astype(bf16)

    # --- stage 3 (no relu): h = o_adj @ (o_x @ W_o2) + s_adj @ (s_x @ W_s2o) + b3
    t3 = jnp.dot(o_xb, w_o2_ref[...], preferred_element_type=f32).astype(bf16)
    u3 = jnp.dot(s_xb, w_s2o_ref[...], preferred_element_type=f32).astype(bf16)
    h = aggregate(t3, u3, b3_ref[...], relu=False)        # (N, nhid) f32, kept in f32

    # --- stacked one-hot endpoint gather: one (2E, N) @ (N, nhid) MXU dot -------
    cols = jax.lax.broadcasted_iota(jnp.int32, (e2, n), 1)
    g = (cols == idx_ref[...]).astype(f32)                 # (2E, N) one-hot, exact
    fcat = jnp.dot(g, h, preferred_element_type=f32)       # rows of h, exact f32
    f0 = fcat[:e]                                          # h[idx[0]]  (E, nhid)
    f1 = fcat[e:]                                          # h[idx[1]]

    # --- decoder1 via split weights: concat(f0,f1) @ W1 == f0 @ W1_top + f1 @ W1_bot
    o1 = (jnp.dot(f0, d1t_ref[...], preferred_element_type=f32)
          + jnp.dot(f1, d1b_ref[...], preferred_element_type=f32)
          + d1bias_ref[...])

    # --- decoder2 with lane-dense (padded-to-128) output -> unmasked stores -----
    out = jnp.dot(o1, d2_ref[...], preferred_element_type=f32) + d2bias_ref[...]
    out_ref[...] = out.astype(out_ref.dtype)


# ---------------------------------------------------------------------------
# One-time preparation (constant across forward calls): weight packing & casts
# ---------------------------------------------------------------------------

def prepare_skipgnn(params, o_adj, s_adj):
    f32 = jnp.float32
    bf16 = jnp.bfloat16
    nhid = params["o_gc1_w"].shape[1]
    rell = params["dec2_w"].shape[1]
    rp = max(_LANE, ((rell + _LANE - 1) // _LANE) * _LANE)

    return {
        # adjacency: constant across calls -> cast to bf16 exactly once here
        "o_adj": o_adj.astype(bf16),
        "s_adj": s_adj.astype(bf16),
        # stage-1 fused weight [W_o1 | W_s1o] -> (nfeat, 2*nhid)
        "w1cat": jnp.concatenate(
            [params["o_gc1_w"], params["s_gc1_o_w"]], axis=1).astype(bf16),
        "w_o1s": params["o_gc1_s_w"].astype(bf16),
        "w_s1": params["s_gc1_w"].astype(bf16),
        "w_o2": params["o_gc2_w"].astype(bf16),
        "w_s2o": params["s_gc2_o_w"].astype(bf16),
        # per-stage biases pre-summed (f32 epilogue)
        "b1": (params["o_gc1_b"] + params["s_gc1_o_b"]).astype(f32),
        "b2": (params["o_gc1_s_b"] + params["s_gc1_b"]).astype(f32),
        "b3": (params["o_gc2_b"] + params["s_gc2_o_b"]).astype(f32),
        # decoder1 split into top/bottom halves (gather-first, no concat); f32 for accuracy
        "d1t": params["dec1_w"][:nhid].astype(f32),
        "d1b": params["dec1_w"][nhid:].astype(f32),
        "d1bias": params["dec1_b"].astype(f32),
        # decoder2 padded to lane-dense width rp; f32 for accuracy
        "d2": jnp.zeros((nhid, rp), f32).at[:, :rell].set(params["dec2_w"]),
        "d2bias": jnp.zeros((1, rp), f32).at[:, :rell].set(params["dec2_b"]),
        "nhid": nhid,
        "rell": rell,
        "rp": rp,
    }


def _vmem_limit_bytes():
    # 7/8 of physical VMEM: ~112 MiB on v5e/v6e (128 MiB), ~56 MiB on v7x (64 MiB/TC).
    try:
        cap = int(pltpu.get_tpu_info().vmem_capacity_bytes)
    except Exception:
        cap = 64 * 1024 * 1024
    return (cap // 8) * 7


# ---------------------------------------------------------------------------
# Forward: single fused pallas_call (no per-call constant rebuilding)
# ---------------------------------------------------------------------------

def skipgnn_forward(prepped, x, idx):
    f32 = jnp.float32
    n, nfeat = x.shape
    nhid, rell, rp = prepped["nhid"], prepped["rell"], prepped["rp"]
    e = idx.shape[1]

    x_b = x.astype(jnp.bfloat16)
    # stacked endpoint indices for the single (2E, N) one-hot gather
    idx_cat = jnp.concatenate([idx[0], idx[1]]).reshape(2 * e, 1).astype(jnp.int32)

    ins = (x_b, prepped["o_adj"], prepped["s_adj"], idx_cat,
           prepped["w1cat"], prepped["w_o1s"], prepped["w_s1"],
           prepped["w_o2"], prepped["w_s2o"],
           prepped["b1"], prepped["b2"], prepped["b3"],
           prepped["d1t"], prepped["d1b"], prepped["d1bias"],
           prepped["d2"], prepped["d2bias"])

    flops = (2 * n * nfeat * (2 * nhid)          # stage-1 fused supports
             + 2 * n * nhid * nhid               # stage-2 support from o_x
             + 2 * n * nfeat * nhid              # stage-2 support from x
             + 2 * (2 * n * nhid * nhid)         # stage-3 supports
             + 3 * 2 * (2 * n * n * nhid)        # 3 stages x 2 adjacency aggregations
             + 2 * (2 * e) * n * nhid            # stacked one-hot gather
             + 2 * 2 * e * nhid * nhid           # decoder1 (split)
             + 2 * e * nhid * rp)                # decoder2 (padded)
    bytes_accessed = (sum(int(a.size) * a.dtype.itemsize for a in ins)
                      + e * rp * 4)

    out = pl.pallas_call(
        _skipgnn_kernel,
        out_shape=jax.ShapeDtypeStruct((e, rp), f32),
        in_specs=[_VMEM] * len(ins),
        out_specs=_VMEM,
        compiler_params=pltpu.CompilerParams(
            vmem_limit_bytes=_vmem_limit_bytes()),
        cost_estimate=pl.CostEstimate(flops=flops, transcendentals=0,
                                      bytes_accessed=bytes_accessed),
    )(*ins)
    return out[:, :rell]


# ---------------------------------------------------------------------------
# Pure-JAX f32 reference (mirrors the PyTorch forward in eval mode)
# ---------------------------------------------------------------------------

def skipgnn_ref(params, x, o_adj, s_adj, idx):
    def gc(inp, adj, w, b):
        return adj @ (inp @ w) + b
    o_x = jax.nn.relu(gc(x, o_adj, params["o_gc1_w"], params["o_gc1_b"])
                      + gc(x, s_adj, params["s_gc1_o_w"], params["s_gc1_o_b"]))
    s_x = jax.nn.relu(gc(x, s_adj, params["s_gc1_w"], params["s_gc1_b"])
                      + gc(o_x, o_adj, params["o_gc1_s_w"], params["o_gc1_s_b"]))
    h = (gc(o_x, o_adj, params["o_gc2_w"], params["o_gc2_b"])
         + gc(s_x, s_adj, params["s_gc2_o_w"], params["s_gc2_o_b"]))
    feat = jnp.concatenate((h[idx[0]], h[idx[1]]), axis=1)
    o = feat @ params["dec1_w"] + params["dec1_b"]
    return o @ params["dec2_w"] + params["dec2_b"]


# ---------------------------------------------------------------------------
# Deterministic parameter construction (shapes per SkipGNN.__init__)
# ---------------------------------------------------------------------------

def make_params(key, nfeat, nhid, rell):
    names_shapes = [
        ("o_gc1_w",   (nfeat, nhid)), ("o_gc1_b",   (1, nhid)),
        ("o_gc2_w",   (nhid,  nhid)), ("o_gc2_b",   (1, nhid)),
        ("o_gc1_s_w", (nhid,  nhid)), ("o_gc1_s_b", (1, nhid)),
        ("s_gc1_w",   (nfeat, nhid)), ("s_gc1_b",   (1, nhid)),
        ("s_gc1_o_w", (nfeat, nhid)), ("s_gc1_o_b", (1, nhid)),
        ("s_gc2_o_w", (nhid,  nhid)), ("s_gc2_o_b", (1, nhid)),
        ("dec1_w", (2 * nhid, nhid)), ("dec1_b", (1, nhid)),
        ("dec2_w", (nhid, rell)),     ("dec2_b", (1, rell)),
    ]
    params = {}
    keys = jax.random.split(key, len(names_shapes))
    for (name, shape), k in zip(names_shapes, keys):
        stdv = 1.0 / jnp.sqrt(jnp.float32(shape[-1]))
        params[name] = jax.random.uniform(
            k, shape, dtype=jnp.float32, minval=-stdv, maxval=stdv)
    return params


# ---------------------------------------------------------------------------
# Main
# ---------------------------------------------------------------------------

if __name__ == "__main__":
    nfeat, nhid, rell = 128, 128, 8
    n_nodes, n_edges = 256, 64          # n_edges kept a multiple of 8 (sublane tiling)

    key = jax.random.PRNGKey(0)
    k_params, k_x, k_oadj, k_sadj, k_idx = jax.random.split(key, 5)

    params = make_params(k_params, nfeat, nhid, rell)
    x = jax.random.normal(k_x, (n_nodes, nfeat), dtype=jnp.float32)

    # symmetric, row-normalized dense adjacencies
    def rand_adj(k):
        a = jax.random.uniform(k, (n_nodes, n_nodes), dtype=jnp.float32)
        a = (a > 0.9).astype(jnp.float32)
        a = a + a.T + jnp.eye(n_nodes, dtype=jnp.float32)
        a = jnp.minimum(a, 1.0)
        return a / jnp.sum(a, axis=1, keepdims=True)

    o_adj = rand_adj(k_oadj)
    s_adj = rand_adj(k_sadj)
    idx = jax.random.randint(k_idx, (2, n_edges), 0, n_nodes, dtype=jnp.int32)

    # one-time prep (constant across forward calls): weight packing, bf16 adjacency cast
    prepped = prepare_skipgnn(params, o_adj, s_adj)
    prepped = jax.tree_util.tree_map(
        lambda v: jax.block_until_ready(v) if isinstance(v, jax.Array) else v, prepped)

    out = skipgnn_forward(prepped, x, idx)
    out = jax.block_until_ready(out)

    ref = skipgnn_ref(params, x, o_adj, s_adj, idx)
    assert out.shape == (n_edges, rell), out.shape
    max_err = float(jnp.max(jnp.abs(out - ref)))
    # bf16 MXU inputs for the GCN stages with f32 accumulation (gather/decoders in f32)
    # -> loosened tolerance vs. the f32 reference
    assert jnp.allclose(out, ref, atol=5e-2, rtol=5e-2), \
        f"mismatch vs reference (max abs err {max_err})"

    print("KERNEL_OK")
</pallas_src>

<mosaic_0001>
module attributes {stable_mosaic.version = 11 : i64} {
  func.func @_skipgnn_kernel(%arg0: memref<256x128xbf16, #tpu.memory_space<vmem>>, %arg1: memref<256x256xbf16, #tpu.memory_space<vmem>>, %arg2: memref<256x256xbf16, #tpu.memory_space<vmem>>, %arg3: memref<128x1xi32, #tpu.memory_space<vmem>>, %arg4: memref<128x256xbf16, #tpu.memory_space<vmem>>, %arg5: memref<128x128xbf16, #tpu.memory_space<vmem>>, %arg6: memref<128x128xbf16, #tpu.memory_space<vmem>>, %arg7: memref<128x128xbf16, #tpu.memory_space<vmem>>, %arg8: memref<128x128xbf16, #tpu.memory_space<vmem>>, %arg9: memref<1x128xf32, #tpu.memory_space<vmem>>, %arg10: memref<1x128xf32, #tpu.memory_space<vmem>>, %arg11: memref<1x128xf32, #tpu.memory_space<vmem>>, %arg12: memref<128x128xf32, #tpu.memory_space<vmem>>, %arg13: memref<128x128xf32, #tpu.memory_space<vmem>>, %arg14: memref<1x128xf32, #tpu.memory_space<vmem>>, %arg15: memref<128x128xf32, #tpu.memory_space<vmem>>, %arg16: memref<1x128xf32, #tpu.memory_space<vmem>>, %arg17: memref<64x128xf32, #tpu.memory_space<vmem>>) attributes {dimension_semantics = [], scalar_prefetch = 0 : i64, scratch_operands = 0 : i64, tpu.core_type = #tpu.core_type<tc>} {
    %c0 = arith.constant 0 : index
    %c0_0 = arith.constant 0 : index
    %0 = vector.load %arg0[%c0, %c0_0] : memref<256x128xbf16, #tpu.memory_space<vmem>>, vector<256x128xbf16>
    %c0_1 = arith.constant 0 : index
    %c0_2 = arith.constant 0 : index
    %1 = vector.load %arg4[%c0_1, %c0_2] : memref<128x256xbf16, #tpu.memory_space<vmem>>, vector<128x256xbf16>
    %cst = arith.constant dense<0.000000e+00> : vector<256x256xf32>
    %2 = tpu.matmul %0, %1, %cst {dimension_numbers = #tpu.dot_dimension_numbers<[1], [0], [0], [1], [0, 0, 1, 1], [], []>} : vector<256x128xbf16>, vector<128x256xbf16>, vector<256x256xf32> -> vector<256x256xf32>
    %3 = vector.extract_strided_slice %2 {offsets = [0, 0], sizes = [256, 128], strides = [1, 1]} : vector<256x256xf32> to vector<256x128xf32>
    %4 = arith.truncf %3 : vector<256x128xf32> to vector<256x128xbf16>
    %5 = vector.extract_strided_slice %2 {offsets = [0, 128], sizes = [256, 128], strides = [1, 1]} : vector<256x256xf32> to vector<256x128xf32>
    %6 = arith.truncf %5 : vector<256x128xf32> to vector<256x128xbf16>
    %c0_3 = arith.constant 0 : index
    %c0_4 = arith.constant 0 : index
    %7 = vector.load %arg9[%c0_3, %c0_4] : memref<1x128xf32, #tpu.memory_space<vmem>>, vector<1x128xf32>
    %c0_5 = arith.constant 0 : index
    %c0_6 = arith.constant 0 : index
    %8 = vector.load %arg1[%c0_5, %c0_6] : memref<256x256xbf16, #tpu.memory_space<vmem>>, vector<256x256xbf16>
    %cst_7 = arith.constant dense<0.000000e+00> : vector<256x128xf32>
    %9 = tpu.matmul %8, %4, %cst_7 {dimension_numbers = #tpu.dot_dimension_numbers<[1], [0], [0], [1], [0, 0, 1, 1], [], []>} : vector<256x256xbf16>, vector<256x128xbf16>, vector<256x128xf32> -> vector<256x128xf32>
    %c0_8 = arith.constant 0 : index
    %c0_9 = arith.constant 0 : index
    %10 = vector.load %arg2[%c0_8, %c0_9] : memref<256x256xbf16, #tpu.memory_space<vmem>>, vector<256x256xbf16>
    %cst_10 = arith.constant dense<0.000000e+00> : vector<256x128xf32>
    %11 = tpu.matmul %10, %6, %cst_10 {dimension_numbers = #tpu.dot_dimension_numbers<[1], [0], [0], [1], [0, 0, 1, 1], [], []>} : vector<256x256xbf16>, vector<256x128xbf16>, vector<256x128xf32> -> vector<256x128xf32>
    %12 = arith.addf %9, %11 : vector<256x128xf32>
    %13 = vector.broadcast %7 : vector<1x128xf32> to vector<256x128xf32>
    %14 = arith.addf %12, %13 : vector<256x128xf32>
    %cst_11 = arith.constant 0.000000e+00 : f32
    %15 = vector.broadcast %cst_11 : f32 to vector<256x128xf32>
    %16 = arith.maximumf %14, %15 : vector<256x128xf32>
    %17 = arith.truncf %16 : vector<256x128xf32> to vector<256x128xbf16>
    %c0_12 = arith.constant 0 : index
    %c0_13 = arith.constant 0 : index
    %18 = vector.load %arg5[%c0_12, %c0_13] : memref<128x128xbf16, #tpu.memory_space<vmem>>, vector<128x128xbf16>
    %cst_14 = arith.constant dense<0.000000e+00> : vector<256x128xf32>
    %19 = tpu.matmul %17, %18, %cst_14 {dimension_numbers = #tpu.dot_dimension_numbers<[1], [0], [0], [1], [0, 0, 1, 1], [], []>} : vector<256x128xbf16>, vector<128x128xbf16>, vector<256x128xf32> -> vector<256x128xf32>
    %20 = arith.truncf %19 : vector<256x128xf32> to vector<256x128xbf16>
    %c0_15 = arith.constant 0 : index
    %c0_16 = arith.constant 0 : index
    %21 = vector.load %arg0[%c0_15, %c0_16] : memref<256x128xbf16, #tpu.memory_space<vmem>>, vector<256x128xbf16>
    %c0_17 = arith.constant 0 : index
    %c0_18 = arith.constant 0 : index
    %22 = vector.load %arg6[%c0_17, %c0_18] : memref<128x128xbf16, #tpu.memory_space<vmem>>, vector<128x128xbf16>
    %cst_19 = arith.constant dense<0.000000e+00> : vector<256x128xf32>
    %23 = tpu.matmul %21, %22, %cst_19 {dimension_numbers = #tpu.dot_dimension_numbers<[1], [0], [0], [1], [0, 0, 1, 1], [], []>} : vector<256x128xbf16>, vector<128x128xbf16>, vector<256x128xf32> -> vector<256x128xf32>
    %24 = arith.truncf %23 : vector<256x128xf32> to vector<256x128xbf16>
    %c0_20 = arith.constant 0 : index
    %c0_21 = arith.constant 0 : index
    %25 = vector.load %arg10[%c0_20, %c0_21] : memref<1x128xf32, #tpu.memory_space<vmem>>, vector<1x128xf32>
    %c0_22 = arith.constant 0 : index
    %c0_23 = arith.constant 0 : index
    %26 = vector.load %arg1[%c0_22, %c0_23] : memref<256x256xbf16, #tpu.memory_space<vmem>>, vector<256x256xbf16>
    %cst_24 = arith.constant dense<0.000000e+00> : vector<256x128xf32>
    %27 = tpu.matmul %26, %20, %cst_24 {dimension_numbers = #tpu.dot_dimension_numbers<[1], [0], [0], [1], [0, 0, 1, 1], [], []>} : vector<256x256xbf16>, vector<256x128xbf16>, vector<256x128xf32> -> vector<256x128xf32>
    %c0_25 = arith.constant 0 : index
    %c0_26 = arith.constant 0 : index
    %28 = vector.load %arg2[%c0_25, %c0_26] : memref<256x256xbf16, #tpu.memory_space<vmem>>, vector<256x256xbf16>
    %cst_27 = arith.constant dense<0.000000e+00> : vector<256x128xf32>
    %29 = tpu.matmul %28, %24, %cst_27 {dimension_numbers = #tpu.dot_dimension_numbers<[1], [0], [0], [1], [0, 0, 1, 1], [], []>} : vector<256x256xbf16>, vector<256x128xbf16>, vector<256x128xf32> -> vector<256x128xf32>
    %30 = arith.addf %27, %29 : vector<256x128xf32>
    %31 = vector.broadcast %25 : vector<1x128xf32> to vector<256x128xf32>
    %32 = arith.addf %30, %31 : vector<256x128xf32>
    %cst_28 = arith.constant 0.000000e+00 : f32
    %33 = vector.broadcast %cst_28 : f32 to vector<256x128xf32>
    %34 = arith.maximumf %32, %33 : vector<256x128xf32>
    %35 = arith.truncf %34 : vector<256x128xf32> to vector<256x128xbf16>
    %c0_29 = arith.constant 0 : index
    %c0_30 = arith.constant 0 : index
    %36 = vector.load %arg7[%c0_29, %c0_30] : memref<128x128xbf16, #tpu.memory_space<vmem>>, vector<128x128xbf16>
    %cst_31 = arith.constant dense<0.000000e+00> : vector<256x128xf32>
    %37 = tpu.matmul %17, %36, %cst_31 {dimension_numbers = #tpu.dot_dimension_numbers<[1], [0], [0], [1], [0, 0, 1, 1], [], []>} : vector<256x128xbf16>, vector<128x128xbf16>, vector<256x128xf32> -> vector<256x128xf32>
    %38 = arith.truncf %37 : vector<256x128xf32> to vector<256x128xbf16>
    %c0_32 = arith.constant 0 : index
    %c0_33 = arith.constant 0 : index
    %39 = vector.load %arg8[%c0_32, %c0_33] : memref<128x128xbf16, #tpu.memory_space<vmem>>, vector<128x128xbf16>
    %cst_34 = arith.constant dense<0.000000e+00> : vector<256x128xf32>
    %40 = tpu.matmul %35, %39, %cst_34 {dimension_numbers = #tpu.dot_dimension_numbers<[1], [0], [0], [1], [0, 0, 1, 1], [], []>} : vector<256x128xbf16>, vector<128x128xbf16>, vector<256x128xf32> -> vector<256x128xf32>
    %41 = arith.truncf %40 : vector<256x128xf32> to vector<256x128xbf16>
    %c0_35 = arith.constant 0 : index
    %c0_36 = arith.constant 0 : index
    %42 = vector.load %arg11[%c0_35, %c0_36] : memref<1x128xf32, #tpu.memory_space<vmem>>, vector<1x128xf32>
    %c0_37 = arith.constant 0 : index
    %c0_38 = arith.constant 0 : index
    %43 = vector.load %arg1[%c0_37, %c0_38] : memref<256x256xbf16, #tpu.memory_space<vmem>>, vector<256x256xbf16>
    %cst_39 = arith.constant dense<0.000000e+00> : vector<256x128xf32>
    %44 = tpu.matmul %43, %38, %cst_39 {dimension_numbers = #tpu.dot_dimension_numbers<[1], [0], [0], [1], [0, 0, 1, 1], [], []>} : vector<256x256xbf16>, vector<256x128xbf16>, vector<256x128xf32> -> vector<256x128xf32>
    %c0_40 = arith.constant 0 : index
    %c0_41 = arith.constant 0 : index
    %45 = vector.load %arg2[%c0_40, %c0_41] : memref<256x256xbf16, #tpu.memory_space<vmem>>, vector<256x256xbf16>
    %cst_42 = arith.constant dense<0.000000e+00> : vector<256x128xf32>
    %46 = tpu.matmul %45, %41, %cst_42 {dimension_numbers = #tpu.dot_dimension_numbers<[1], [0], [0], [1], [0, 0, 1, 1], [], []>} : vector<256x256xbf16>, vector<256x128xbf16>, vector<256x128xf32> -> vector<256x128xf32>
    %47 = arith.addf %44, %46 : vector<256x128xf32>
    %48 = vector.broadcast %42 : vector<1x128xf32> to vector<256x128xf32>
    %49 = arith.addf %47, %48 : vector<256x128xf32>
    %50 = tpu.iota {dimensions = array<i32: 1>} : vector<128x256xi32>
    %c0_43 = arith.constant 0 : index
    %c0_44 = arith.constant 0 : index
    %51 = vector.load %arg3[%c0_43, %c0_44] : memref<128x1xi32, #tpu.memory_space<vmem>>, vector<128x1xi32>
    %52 = vector.broadcast %51 : vector<128x1xi32> to vector<128x256xi32>
    %53 = arith.cmpi eq, %50, %52 : vector<128x256xi32>
    %54 = arith.extui %53 : vector<128x256xi1> to vector<128x256xi32>
    %55 = arith.sitofp %54 : vector<128x256xi32> to vector<128x256xf32>
    %cst_45 = arith.constant dense<0.000000e+00> : vector<128x128xf32>
    %56 = tpu.matmul %55, %49, %cst_45 {dimension_numbers = #tpu.dot_dimension_numbers<[1], [0], [0], [1], [0, 0, 1, 1], [], []>} : vector<128x256xf32>, vector<256x128xf32>, vector<128x128xf32> -> vector<128x128xf32>
    %57 = vector.extract_strided_slice %56 {offsets = [0, 0], sizes = [64, 128], strides = [1, 1]} : vector<128x128xf32> to vector<64x128xf32>
    %58 = vector.extract_strided_slice %56 {offsets = [64, 0], sizes = [64, 128], strides = [1, 1]} : vector<128x128xf32> to vector<64x128xf32>
    %c0_46 = arith.constant 0 : index
    %c0_47 = arith.constant 0 : index
    %59 = vector.load %arg12[%c0_46, %c0_47] : memref<128x128xf32, #tpu.memory_space<vmem>>, vector<128x128xf32>
    %cst_48 = arith.constant dense<0.000000e+00> : vector<64x128xf32>
    %60 = tpu.matmul %57, %59, %cst_48 {dimension_numbers = #tpu.dot_dimension_numbers<[1], [0], [0], [1], [0, 0, 1, 1], [], []>} : vector<64x128xf32>, vector<128x128xf32>, vector<64x128xf32> -> vector<64x128xf32>
    %c0_49 = arith.constant 0 : index
    %c0_50 = arith.constant 0 : index
    %61 = vector.load %arg13[%c0_49, %c0_50] : memref<128x128xf32, #tpu.memory_space<vmem>>, vector<128x128xf32>
    %cst_51 = arith.constant dense<0.000000e+00> : vector<64x128xf32>
    %62 = tpu.matmul %58, %61, %cst_51 {dimension_numbers = #tpu.dot_dimension_numbers<[1], [0], [0], [1], [0, 0, 1, 1], [], []>} : vector<64x128xf32>, vector<128x128xf32>, vector<64x128xf32> -> vector<64x128xf32>
    %63 = arith.addf %60, %62 : vector<64x128xf32>
    %c0_52 = arith.constant 0 : index
    %c0_53 = arith.constant 0 : index
    %64 = vector.load %arg14[%c0_52, %c0_53] : memref<1x128xf32, #tpu.memory_space<vmem>>, vector<1x128xf32>
    %65 = vector.broadcast %64 : vector<1x128xf32> to vector<64x128xf32>
    %66 = arith.addf %63, %65 : vector<64x128xf32>
    %c0_54 = arith.constant 0 : index
    %c0_55 = arith.constant 0 : index
    %67 = vector.load %arg15[%c0_54, %c0_55] : memref<128x128xf32, #tpu.memory_space<vmem>>, vector<128x128xf32>
    %cst_56 = arith.constant dense<0.000000e+00> : vector<64x128xf32>
    %68 = tpu.matmul %66, %67, %cst_56 {dimension_numbers = #tpu.dot_dimension_numbers<[1], [0], [0], [1], [0, 0, 1, 1], [], []>} : vector<64x128xf32>, vector<128x128xf32>, vector<64x128xf32> -> vector<64x128xf32>
    %c0_57 = arith.constant 0 : index
    %c0_58 = arith.constant 0 : index
    %69 = vector.load %arg16[%c0_57, %c0_58] : memref<1x128xf32, #tpu.memory_space<vmem>>, vector<1x128xf32>
    %70 = vector.broadcast %69 : vector<1x128xf32> to vector<64x128xf32>
    %71 = arith.addf %68, %70 : vector<64x128xf32>
    %c0_59 = arith.constant 0 : index
    %c0_60 = arith.constant 0 : index
    %72 = vector.load %arg17[%c0_59, %c0_60] : memref<64x128xf32, #tpu.memory_space<vmem>>, vector<64x128xf32>
    tpu.vector_store %arg17[%c0_59, %c0_60], %71 {strides = array<i32>} : memref<64x128xf32, #tpu.memory_space<vmem>>, vector<64x128xf32>,
    return
  }
}

</mosaic_0001>

<bundles_post_ra>
// kernel: tpu_custom_call.1
= control target key start
LH: loop header
LB: loop body
LE: loop exit
PB: predicated region body
PF: predicated region fallthrough
CT: control target
= control target key end

     0   :  { %s7274_s0 = inlined_call_operand.vmem [shape: bf16[256,128], index: 0, kind: input, shape index: {}]   ;;  %s7275_s1 = inlined_call_operand.hbm [shape: bf16[256,256], index: 1, kind: input, shape index: {}]   ;;  %s7276_s2 = inlined_call_operand.hbm [shape: bf16[256,256], index: 2, kind: input, shape index: {}]   ;;  %s7277_s3 = inlined_call_operand.vmem [shape: s32[128,1], index: 3, kind: input, shape index: {}]   ;;  %s7278_s4 = inlined_call_operand.hbm [shape: bf16[128,256], index: 4, kind: input, shape index: {}]   ;;  %s7279_s5 = inlined_call_operand.hbm [shape: bf16[128,128], index: 5, kind: input, shape index: {}]   ;;  %s7280_s6 = inlined_call_operand.hbm [shape: bf16[128,128], index: 6, kind: input, shape index: {}]   ;;  %s7281_s7 = inlined_call_operand.hbm [shape: bf16[128,128], index: 7, kind: input, shape index: {}]   ;;  %s7282_s8 = inlined_call_operand.hbm [shape: bf16[128,128], index: 8, kind: input, shape index: {}]   ;;  %s7283_s9 = inlined_call_operand.vmem [shape: f32[1,128], index: 9, kind: input, shape index: {}]   ;;  %s7284_s10 = inlined_call_operand.vmem [shape: f32[1,128], index: 10, kind: input, shape index: {}]   ;;  %s7285_s11 = inlined_call_operand.vmem [shape: f32[1,128], index: 11, kind: input, shape index: {}]   ;;  %s7286_s12 = inlined_call_operand.hbm [shape: f32[128,128], index: 12, kind: input, shape index: {}]   ;;  %s7287_s13 = inlined_call_operand.hbm [shape: f32[128,128], index: 13, kind: input, shape index: {}]   ;;  %s7288_s14 = inlined_call_operand.vmem [shape: f32[1,128], index: 14, kind: input, shape index: {}]   ;;  %s7289_s15 = inlined_call_operand.hbm [shape: f32[128,128], index: 15, kind: input, shape index: {}]   ;;  %s7290_s16 = inlined_call_operand.vmem [shape: f32[1,128], index: 16, kind: input, shape index: {}]   ;;  %s7291_s17 = inlined_call_operand.hbm [shape: f32[64,128], index: 17, kind: output, shape index: {}]  }
   0x1   :  { %7300 = sst [smem:[#allocation27_spill]] %s7274_s0 }
   0x2   :  { %7301 = sst [smem:[#allocation28_spill]] %s7275_s1 }
   0x3   :  { %22 = vsyncpa [#allocation3], 0 }
   0x4   :  { %23 = vsyncpa [#allocation6], 0 }
   0x5   :  { %24 = vsyncpa [#allocation9], 0 }
   0x6   :  { %25 = vsyncpa [#allocation12], 0 }
   0x7   :  { %26 = vsyncpa [#allocation15], 0 }
   0x8   :  { %27 = vsyncpa [#allocation18], 0 }
   0x9   :  { %28 = vsyncpa [#allocation4], 0  ;;  %s6062_s24 = smov [#allocation5]   ;;  %s6063_s26 = smov [#allocation8]  }
   0xa   :  { %s48_s25 = sshll.u32 %s6062_s24, 4  ;;  %s74_s27 = sshll.u32 %s6063_s26, 4  ;;  %s49_s25 = int_to_ptr.vmem [resolvable:$true] %s48_s25  ;;  %s6169_s27 = int_to_ptr.vmem [resolvable:$true] %s74_s27 }
   0xb   :  { %s5806_s0 = scalar_lea.hbm %s7276_s2, 4096 }
   0xc   :  { %p5807_p0 = scmp.ne.s32.totalorder %s7276_s2, %s5806_s0  ;;  %p5810_p1 = scmp.lt.u32.totalorder %s5806_s0, %s7276_s2 }
   0xe   :  { %p5812_p2 = pnand %p5810_p1, %p5807_p0 }
  0x10   :  { %5815 = shalt.err (!%p5812_p2)
}
  0x11   :  { %s5816_s20 = scalar_lea.vmem %s49_s25, 4096  ;;  %p5821_p4 = scmp.lt.s32.totalorder %s49_s25, %s49_s25 }
  0x12   :  { %p5817_p3 = scmp.ne.s32.totalorder %s49_s25, %s5816_s20  ;;  %p5822_p5 = scmp.lt.s32.totalorder %s5816_s20, %s5816_s20 }
  0x14   :  { %p5823_p6 = por %p5822_p5, %p5821_p4 }
  0x16   :  { %p5824_p7 = pnand %p5823_p6, %p5817_p3 }
  0x18   :  { %5827 = shalt.err (!%p5824_p7)
}
  0x19   :  { %s7294_s21 = smov 128   ;;  %s7296_s22 = smov 8  }
  0x1a   :  { %54 = dma.hbm_to_vmem [thread:$0]  %s7276_s2, 4096, %s49_s25, [#allocation6], %s7294_s21, %s7294_s21, %s7296_s22  }
  0x1b   :  { %s5828_s29 = scalar_lea.hbm %s7279_s5, 1024 }
  0x1c   :  { %p5829_p8 = scmp.ne.s32.totalorder %s7279_s5, %s5828_s29  ;;  %p5832_p9 = scmp.lt.u32.totalorder %s5828_s29, %s7279_s5 }
  0x1e   :  { %p5834_p10 = pnand %p5832_p9, %p5829_p8 }
  0x20   :  { %5837 = shalt.err (!%p5834_p10)
}
  0x21   :  { %s5838_s1 = scalar_lea.vmem %s6169_s27, 1024  ;;  %p5843_p12 = scmp.lt.s32.totalorder %s6169_s27, %s6169_s27 }
  0x22   :  { %p5839_p11 = scmp.ne.s32.totalorder %s6169_s27, %s5838_s1  ;;  %p5844_p13 = scmp.lt.s32.totalorder %s5838_s1, %s5838_s1 }
  0x24   :  { %p5845_p0 = por %p5844_p13, %p5843_p12 }
  0x26   :  { %p5846_p1 = pnand %p5845_p0, %p5839_p11 }
  0x28   :  { %5849 = shalt.err (!%p5846_p1)
}
  0x29   :  { %s7298_s2 = smov 64   ;;  %s6067_s25 = smov 4  }
  0x2a   :  { %80 = dma.hbm_to_vmem [thread:$0]  %s7279_s5, 1024, %s6169_s27, [#allocation9], %s7298_s2, %s7298_s2, %s6067_s25  }
  0x2b   :  { %s6068_s24 = smov [#allocation11]   ;;  %s6069_s28 = smov [#allocation14]  }
  0x2c   :  { %s98_s26 = sshll.u32 %s6068_s24, 4  ;;  %s128_s29 = sshll.u32 %s6069_s28, 4  ;;  %s99_s26 = int_to_ptr.vmem [resolvable:$true] %s98_s26  ;;  %s6206_s29 = int_to_ptr.vmem [resolvable:$true] %s128_s29 }
  0x2d   :  { %s5850_s18 = scalar_lea.hbm %s7281_s7, 1024 }
  0x2e   :  { %p5851_p2 = scmp.ne.s32.totalorder %s7281_s7, %s5850_s18  ;;  %p5854_p3 = scmp.lt.u32.totalorder %s5850_s18, %s7281_s7 }
  0x30   :  { %p5856_p4 = pnand %p5854_p3, %p5851_p2 }
  0x32   :  { %5859 = shalt.err (!%p5856_p4)
}
  0x33   :  { %s5860_s5 = scalar_lea.vmem %s99_s26, 1024  ;;  %p5865_p6 = scmp.lt.s32.totalorder %s99_s26, %s99_s26 }
  0x34   :  { %p5861_p5 = scmp.ne.s32.totalorder %s99_s26, %s5860_s5  ;;  %p5866_p7 = scmp.lt.s32.totalorder %s5860_s5, %s5860_s5 }
  0x36   :  { %p5867_p8 = por %p5866_p7, %p5865_p6 }
  0x38   :  { %p5868_p9 = pnand %p5867_p8, %p5861_p5 }
  0x3a   :  { %5871 = shalt.err (!%p5868_p9)
}
  0x3b   :  { %104 = dma.hbm_to_vmem [thread:$0]  %s7281_s7, 1024, %s99_s26, [#allocation12], %s7298_s2, %s7298_s2, %s6067_s25  }
  0x3c   :  { %s5872_s21 = scalar_lea.hbm %s7286_s12, 2048 }
  0x3d   :  { %p5873_p10 = scmp.ne.s32.totalorder %s7286_s12, %s5872_s21  ;;  %p5876_p11 = scmp.lt.u32.totalorder %s5872_s21, %s7286_s12 }
  0x3f   :  { %p5878_p12 = pnand %p5876_p11, %p5873_p10 }
  0x41   :  { %5881 = shalt.err (!%p5878_p12)
}
  0x42   :  { %s5882_s18 = scalar_lea.vmem %s6206_s29, 2048  ;;  %p5887_p0 = scmp.lt.s32.totalorder %s6206_s29, %s6206_s29 }
  0x43   :  { %p5883_p13 = scmp.ne.s32.totalorder %s6206_s29, %s5882_s18  ;;  %p5888_p1 = scmp.lt.s32.totalorder %s5882_s18, %s5882_s18 }
  0x45   :  { %p5889_p2 = por %p5888_p1, %p5887_p0 }
  0x47   :  { %p5890_p3 = pnand %p5889_p2, %p5883_p13 }
  0x49   :  { %5893 = shalt.err (!%p5890_p3)
}
  0x4a   :  { %s7302_s7 = smov 8   ;;  %s7303_s26 = smov 128  }
  0x4b   :  { %134 = dma.hbm_to_vmem [thread:$0]  %s7286_s12, 2048, %s6206_s29, [#allocation15], %s7303_s26, %s7303_s26, %s7302_s7  }
  0x4c   :  { %s6070_s5 = smov [#allocation2]   ;;  %s6071_s20 = smov [#allocation7]  }
  0x4d   :  { %s36_s27 = sshll.u32 %s6070_s5, 4  ;;  %s62_s23 = sshll.u32 %s6071_s20, 4  ;;  %s37_s27 = int_to_ptr.vmem [resolvable:$true] %s36_s27  ;;  %s6243_s23 = int_to_ptr.vmem [resolvable:$true] %s62_s23 }
  0x4e   :  { %s7304_s22 = sld [smem:[#allocation28_spill]] }
  0x54   :  { %s5894_s28 = scalar_lea.hbm %s7304_s22, 4096 }
  0x55   :  { %p5895_p4 = scmp.ne.s32.totalorder %s7304_s22, %s5894_s28  ;;  %p5898_p5 = scmp.lt.u32.totalorder %s5894_s28, %s7304_s22 }
  0x57   :  { %p5900_p6 = pnand %p5898_p5, %p5895_p4 }
  0x59   :  { %5903 = shalt.err (!%p5900_p6)
}
  0x5a   :  { %s5904_s12 = scalar_lea.vmem %s37_s27, 4096  ;;  %p5909_p8 = scmp.lt.s32.totalorder %s37_s27, %s37_s27 }
  0x5b   :  { %p5905_p7 = scmp.ne.s32.totalorder %s37_s27, %s5904_s12  ;;  %p5910_p9 = scmp.lt.s32.totalorder %s5904_s12, %s5904_s12 }
  0x5d   :  { %p5911_p10 = por %p5910_p9, %p5909_p8 }
  0x5f   :  { %p5912_p11 = pnand %p5911_p10, %p5905_p7 }
  0x61   :  { %5915 = shalt.err (!%p5912_p11)
}
  0x62   :  { %42 = dma.hbm_to_vmem [thread:$0]  %s7304_s22, 4096, %s37_s27, [#allocation3], %s7303_s26, %s7303_s26, %s7302_s7  }
  0x63   :  { %s5916_s2 = scalar_lea.hbm %s7278_s4, 2048 }
  0x64   :  { %p5917_p12 = scmp.ne.s32.totalorder %s7278_s4, %s5916_s2  ;;  %p5920_p13 = scmp.lt.u32.totalorder %s5916_s2, %s7278_s4 }
  0x66   :  { %p5922_p0 = pnand %p5920_p13, %p5917_p12 }
  0x68   :  { %5925 = shalt.err (!%p5922_p0)
}
  0x69   :  { %s5926_s0 = scalar_lea.vmem %s6243_s23, 2048  ;;  %p5931_p2 = scmp.lt.s32.totalorder %s6243_s23, %s6243_s23 }
  0x6a   :  { %p5927_p1 = scmp.ne.s32.totalorder %s6243_s23, %s5926_s0  ;;  %p5932_p3 = scmp.lt.s32.totalorder %s5926_s0, %s5926_s0 }
  0x6c   :  { %p5933_p4 = por %p5932_p3, %p5931_p2 }
  0x6e   :  { %p5934_p5 = pnand %p5933_p4, %p5927_p1 }
  0x70   :  { %5937 = shalt.err (!%p5934_p5)
}
  0x71   :  { %68 = dma.hbm_to_vmem [thread:$0]  %s7278_s4, 2048, %s6243_s23, [#allocation6], %s7303_s26, %s7303_s26, %s7302_s7  }
  0x72   :  { %s6072_s30 = smov [#allocation10]   ;;  %s6073_s12 = smov [#allocation13]  }
  0x73   :  { %s86_s18 = sshll.u32 %s6072_s30, 4  ;;  %s110_s29 = sshll.u32 %s6073_s12, 4  ;;  %s87_s18 = int_to_ptr.vmem [resolvable:$true] %s86_s18  ;;  %s6280_s29 = int_to_ptr.vmem [resolvable:$true] %s110_s29 }
  0x74   :  { %s5938_s5 = scalar_lea.hbm %s7280_s6, 1024 }
  0x75   :  { %p5939_p6 = scmp.ne.s32.totalorder %s7280_s6, %s5938_s5  ;;  %p5942_p7 = scmp.lt.u32.totalorder %s5938_s5, %s7280_s6 }
  0x77   :  { %p5944_p8 = pnand %p5942_p7, %p5939_p6 }
  0x79   :  { %5947 = shalt.err (!%p5944_p8)
}
  0x7a   :  { %s5948_s4 = scalar_lea.vmem %s87_s18, 1024  ;;  %p5953_p10 = scmp.lt.s32.totalorder %s87_s18, %s87_s18 }
  0x7b   :  { %p5949_p9 = scmp.ne.s32.totalorder %s87_s18, %s5948_s4  ;;  %p5954_p11 = scmp.lt.s32.totalorder %s5948_s4, %s5948_s4 }
  0x7d   :  { %p5955_p12 = por %p5954_p11, %p5953_p10 }
  0x7f   :  { %p5956_p13 = pnand %p5955_p12, %p5949_p9 }
  0x81   :  { %5959 = shalt.err (!%p5956_p13)
}
  0x82   :  { %s7305_s23 = smov 64   ;;  %s5960_s30 = scalar_lea.hbm %s7282_s8, 1024 }
  0x83   :  { %92 = dma.hbm_to_vmem [thread:$0]  %s7280_s6, 1024, %s87_s18, [#allocation9], %s7305_s23, %s7305_s23, %s6067_s25  }
  0x84   :  { %p5961_p0 = scmp.ne.s32.totalorder %s7282_s8, %s5960_s30  ;;  %p5964_p1 = scmp.lt.u32.totalorder %s5960_s30, %s7282_s8 }
  0x86   :  { %p5966_p2 = pnand %p5964_p1, %p5961_p0 }
  0x88   :  { %5969 = shalt.err (!%p5966_p2)
}
  0x89   :  { %s5970_s2 = scalar_lea.vmem %s6280_s29, 1024  ;;  %p5975_p4 = scmp.lt.s32.totalorder %s6280_s29, %s6280_s29 }
  0x8a   :  { %p5971_p3 = scmp.ne.s32.totalorder %s6280_s29, %s5970_s2  ;;  %p5976_p5 = scmp.lt.s32.totalorder %s5970_s2, %s5970_s2 }
  0x8c   :  { %p5977_p6 = por %p5976_p5, %p5975_p4 }
  0x8e   :  { %p5978_p7 = pnand %p5977_p6, %p5971_p3 }
  0x90   :  { %5981 = shalt.err (!%p5978_p7)
}
  0x91   :  { %116 = dma.hbm_to_vmem [thread:$0]  %s7282_s8, 1024, %s6280_s29, [#allocation12], %s7305_s23, %s7305_s23, %s6067_s25  }
  0x92   :  { %s6074_s20 = smov [#allocation16]   ;;  %s6075_s21 = smov [#allocation17]  }
  0x93   :  { %s140_s24 = sshll.u32 %s6074_s20, 4  ;;  %s154_s4 = sshll.u32 %s6075_s21, 4  ;;  %s141_s24 = int_to_ptr.vmem [resolvable:$true] %s140_s24  ;;  %s6317_s4 = int_to_ptr.vmem [resolvable:$true] %s154_s4 }
  0x94   :  { %s5982_s27 = scalar_lea.hbm %s7287_s13, 2048 }
  0x95   :  { %p5983_p8 = scmp.ne.s32.totalorder %s7287_s13, %s5982_s27  ;;  %p5986_p9 = scmp.lt.u32.totalorder %s5982_s27, %s7287_s13 }
  0x97   :  { %p5988_p10 = pnand %p5986_p9, %p5983_p8 }
  0x99   :  { %5991 = shalt.err (!%p5988_p10)
}
  0x9a   :  { %s5992_s8 = scalar_lea.vmem %s141_s24, 2048  ;;  %p5997_p12 = scmp.lt.s32.totalorder %s141_s24, %s141_s24 }
  0x9b   :  { %p5993_p11 = scmp.ne.s32.totalorder %s141_s24, %s5992_s8  ;;  %p5998_p13 = scmp.lt.s32.totalorder %s5992_s8, %s5992_s8 }
  0x9d   :  { %p5999_p0 = por %p5998_p13, %p5997_p12 }
  0x9f   :  { %p6000_p1 = pnand %p5999_p0, %p5993_p11 }
  0xa1   :  { %6003 = shalt.err (!%p6000_p1)
}
  0xa2   :  { %146 = dma.hbm_to_vmem [thread:$0]  %s7287_s13, 2048, %s141_s24, [#allocation15], %s7303_s26, %s7303_s26, %s7302_s7  }
  0xa3   :  { %s6004_s5 = scalar_lea.hbm %s7289_s15, 2048 }
  0xa4   :  { %p6005_p2 = scmp.ne.s32.totalorder %s7289_s15, %s6004_s5  ;;  %p6008_p3 = scmp.lt.u32.totalorder %s6004_s5, %s7289_s15 }
  0xa6   :  { %p6010_p4 = pnand %p6008_p3, %p6005_p2 }
  0xa8   :  { %6013 = shalt.err (!%p6010_p4)
}
  0xa9   :  { %s6014_s21 = scalar_lea.vmem %s6317_s4, 2048  ;;  %p6019_p6 = scmp.lt.s32.totalorder %s6317_s4, %s6317_s4 }
  0xaa   :  { %p6015_p5 = scmp.ne.s32.totalorder %s6317_s4, %s6014_s21  ;;  %p6020_p7 = scmp.lt.s32.totalorder %s6014_s21, %s6014_s21 }
  0xac   :  { %p6021_p8 = por %p6020_p7, %p6019_p6 }
  0xae   :  { %p6022_p9 = pnand %p6021_p8, %p6015_p5 }
  0xb0   :  { %6025 = shalt.err (!%p6022_p9)
}
  0xb1   :  { %160 = dma.hbm_to_vmem [thread:$0]  %s7289_s15, 2048, %s6317_s4, [#allocation18], %s7303_s26, %s7303_s26, %s7302_s7  }
  0xb2   :  { %6048 = dma.done.wait [#allocation3], 4096  }
  0xb3   :  { %6049 = vsyncadd [#allocation3], 4294963200 }
  0xb4   :  { %6050 = dma.done.wait [#allocation6], 6144  }
  0xb5   :  { %6051 = vsyncadd [#allocation6], 4294961152 }
  0xb6   :  { %6052 = dma.done.wait [#allocation9], 2048  }
  0xb7   :  { %6053 = vsyncadd [#allocation9], 4294965248 }
  0xb8   :  { %6054 = dma.done.wait [#allocation12], 2048  }
  0xb9   :  { %6055 = vsyncadd [#allocation12], 4294965248 }
  0xba   :  { %6056 = dma.done.wait [#allocation15], 4096  }
  0xbb   :  { %6057 = vsyncadd [#allocation15], 4294963200 }
  0xbc   :  { %6058 = dma.done.wait [#allocation18], 2048  }
  0xbd   :  { %6059 = vsyncadd [#allocation18], 4294965248  ;;  %v6076_v0 = vmov 0   ;;  %v5505_v1 = vld [vmem:[#allocation7 + $0x4] ss:$8 sps:$4 sm:$0xff]   ;;  %s7306_s28 = sld [smem:[#allocation27_spill]] }
  0xbe   :  { %450 = vmatprep.mubr.bf16.mxu0 %v6076_v0  ;;  %5503 = vset.pattern.permute.xlu0 %v6076_v0  ;;  %v5507_v2 = vld [vmem:[#allocation7] ss:$8 sps:$4 sm:$0xff]   ;;  %v5508_v3 = vld [vmem:[#allocation7 + $0x14] ss:$8 sps:$4 sm:$0xff]   ;;  %v5510_v4 = vld [vmem:[#allocation7 + $0x10] ss:$8 sps:$4 sm:$0xff]  }
  0xbf   :  { %5504 = vset.pattern.permute.xlu1 %v6076_v0  ;;  %418 = vmatprep.subr.bf16.mxu0 %v5505_v1  ;;  %v5511_v5 = vld [vmem:[#allocation7 + $0x24] ss:$8 sps:$4 sm:$0xff]   ;;  %v5513_v6 = vld [vmem:[#allocation7 + $0x20] ss:$8 sps:$4 sm:$0xff]   ;;  %v5514_v7 = vld [vmem:[#allocation7 + $0x34] ss:$8 sps:$4 sm:$0xff]  }
  0xc0   :  { %419 = vmatpush1.bf16.msra.mxu0 %v5507_v2  ;;  %v5516_v8 = vld [vmem:[#allocation7 + $0x30] ss:$8 sps:$4 sm:$0xff]   ;;  %v5517_v9 = vld [vmem:[#allocation7 + $0x44] ss:$8 sps:$4 sm:$0xff]   ;;  %v5519_v10 = vld [vmem:[#allocation7 + $0x40] ss:$8 sps:$4 sm:$0xff]  }
  0xc1   :  { %420 = vmatprep.subr.bf16.mxu0 %v5508_v3  ;;  %v5520_v11 = vld [vmem:[#allocation7 + $0x54] ss:$8 sps:$4 sm:$0xff]   ;;  %v5522_v12 = vld [vmem:[#allocation7 + $0x50] ss:$8 sps:$4 sm:$0xff]   ;;  %v5523_v13 = vld [vmem:[#allocation7 + $0x64] ss:$8 sps:$4 sm:$0xff]  }
  0xc2   :  { %v5525_v14 = vld [vmem:[#allocation7 + $0x60] ss:$8 sps:$4 sm:$0xff]   ;;  %v5526_v15 = vld [vmem:[#allocation7 + $0x74] ss:$8 sps:$4 sm:$0xff]   ;;  %v5528_v16 = vld [vmem:[#allocation7 + $0x70] ss:$8 sps:$4 sm:$0xff]  }
  0xc3   :  { %v5529_v17 = vld [vmem:[%s7306_s28] sm:$0xff]   ;;  %v5530_v18 = vld [vmem:[%s7306_s28 + $0x8] sm:$0xff]   ;;  %v5531_v19 = vld [vmem:[%s7306_s28 + $0x10] sm:$0xff]   ;;  %s6078_s1 = smov [#allocation19]  }
  0xc4   :  { %421 = vmatpush1.bf16.msra.mxu0 %v5510_v4  ;;  %v5532_v20 = vld [vmem:[%s7306_s28 + $0x18] sm:$0xff]   ;;  %v5533_v21 = vld [vmem:[%s7306_s28 + $0x20] sm:$0xff]   ;;  %v5534_v22 = vld [vmem:[%s7306_s28 + $0x28] sm:$0xff]  }
  0xc5   :  { %422 = vmatprep.subr.bf16.mxu0 %v5511_v5  ;;  %v5535_v23 = vld [vmem:[%s7306_s28 + $0x30] sm:$0xff]   ;;  %v5536_v24 = vld [vmem:[%s7306_s28 + $0x38] sm:$0xff]   ;;  %v5537_v25 = vld [vmem:[%s7306_s28 + $0x40] sm:$0xff]  }
  0xc6   :  { %v5538_v26 = vld [vmem:[%s7306_s28 + $0x48] sm:$0xff]   ;;  %v5539_v27 = vld [vmem:[%s7306_s28 + $0x50] sm:$0xff]   ;;  %v5540_v28 = vld [vmem:[%s7306_s28 + $0x58] sm:$0xff]  }
  0xc7   :  { %v5541_v29 = vld [vmem:[%s7306_s28 + $0x60] sm:$0xff]   ;;  %v5542_v30 = vld [vmem:[%s7306_s28 + $0x68] sm:$0xff]   ;;  %v5543_v31 = vld [vmem:[%s7306_s28 + $0x70] sm:$0xff]  }
  0xc8   :  { %423 = vmatpush1.bf16.msra.mxu0 %v5513_v6  ;;  %v5544_v32 = vld [vmem:[%s7306_s28 + $0x78] sm:$0xff]   ;;  %v5547_v33 = vld [vmem:[#allocation2 + $0x4] ss:$8 sps:$4 sm:$0xff]  }
  0xc9   :  { %424 = vmatprep.subr.bf16.mxu0 %v5514_v7  ;;  %v6420_v34 = vld [vmem:[#allocation5 + $0x4] ss:$8 sps:$4 sm:$0xff]  }
  0xca   :  { %900 = vmatprep.mubr.bf16.mxu1 %v6420_v34 }
  0xcc   :  { %425 = vmatpush1.bf16.msra.mxu0 %v5516_v8 }
  0xcd   :  { %426 = vmatprep.subr.bf16.mxu0 %v5517_v9 }
  0xd0   :  { %427 = vmatpush1.bf16.msra.mxu0 %v5519_v10 }
  0xd1   :  { %428 = vmatprep.subr.bf16.mxu0 %v5520_v11 }
  0xd4   :  { %429 = vmatpush1.bf16.msra.mxu0 %v5522_v12 }
  0xd5   :  { %430 = vmatprep.subr.bf16.mxu0 %v5523_v13 }
  0xd8   :  { %431 = vmatpush1.bf16.msra.mxu0 %v5525_v14 }
  0xd9   :  { %432 = vmatprep.subr.bf16.mxu0 %v5526_v15 }
  0xdc   :  { %433 = vmatpush1.bf16.msra.mxu0 %v5528_v16 }
  0xdf   :  { %451 = vmatmul.mubr.bf16.vlgmr.msra.gmra.mrb[0].mxu0 %v5529_v17 }
  0xe0   :  { %460 = vmatprep.mubr.bf16.mxu0 %v6076_v0 }
  0xe7   :  { %461 = vmatmul.mubr.bf16.gmra.mrb[4].mxu0 %v5530_v18 }
  0xe8   :  { %470 = vmatprep.mubr.bf16.mxu0 %v6076_v0 }
  0xef   :  { %471 = vmatmul.mubr.bf16.gmra.mrb[8].mxu0 %v5531_v19 }
  0xf0   :  { %480 = vmatprep.mubr.bf16.mxu0 %v6076_v0 }
  0xf7   :  { %481 = vmatmul.mubr.bf16.gmra.mrb[12].mxu0 %v5532_v20 }
  0xf8   :  { %490 = vmatprep.mubr.bf16.mxu0 %v6076_v0 }
  0xff   :  { %491 = vmatmul.mubr.bf16.gmra.mrb[16].mxu0 %v5533_v21 }
 0x100   :  { %500 = vmatprep.mubr.bf16.mxu0 %v6076_v0 }
 0x107   :  { %501 = vmatmul.mubr.bf16.gmra.mrb[20].mxu0 %v5534_v22 }
 0x108   :  { %510 = vmatprep.mubr.bf16.mxu0 %v6076_v0 }
 0x10f   :  { %511 = vmatmul.mubr.bf16.gmra.mrb[24].mxu0 %v5535_v23 }
 0x110   :  { %520 = vmatprep.mubr.bf16.mxu0 %v6076_v0 }
 0x117   :  { %521 = vmatmul.mubr.bf16.gmra.mrb[28].mxu0 %v5536_v24 }
 0x118   :  { %530 = vmatprep.mubr.bf16.mxu0 %v6076_v0 }
 0x11f   :  { %531 = vmatmul.mubr.bf16.gmra.mrb[32].mxu0 %v5537_v25 }
 0x120   :  { %540 = vmatprep.mubr.bf16.mxu0 %v6076_v0 }
 0x127   :  { %541 = vmatmul.mubr.bf16.gmra.mrb[36].mxu0 %v5538_v26 }
 0x128   :  { %550 = vmatprep.mubr.bf16.mxu0 %v6076_v0 }
 0x12f   :  { %551 = vmatmul.mubr.bf16.gmra.mrb[40].mxu0 %v5539_v27 }
 0x130   :  { %560 = vmatprep.mubr.bf16.mxu0 %v6076_v0 }
 0x137   :  { %561 = vmatmul.mubr.bf16.gmra.mrb[44].mxu0 %v5540_v28 }
 0x138   :  { %570 = vmatprep.mubr.bf16.mxu0 %v6076_v0 }
 0x13f   :  { %571 = vmatmul.mubr.bf16.gmra.mrb[48].mxu0 %v5541_v29 }
 0x140   :  { %580 = vmatprep.mubr.bf16.mxu0 %v6076_v0 }
 0x147   :  { %581 = vmatmul.mubr.bf16.gmra.mrb[52].mxu0 %v5542_v30 }
 0x148   :  { %590 = vmatprep.mubr.bf16.mxu0 %v6076_v0 }
 0x14f   :  { %591 = vmatmul.mubr.bf16.gmra.mrb[56].mxu0 %v5543_v31 }
 0x150   :  { %600 = vmatprep.mubr.bf16.mxu0 %v6076_v0 }
 0x157   :  { %601 = vmatmul.mubr.bf16.gmra.mrb[60].mxu0 %v5544_v32 }
 0x158   :  { %1221 = vmatprep.mubr.bf16.mxu0 %v5547_v33 }
 0x1b2   :  { %v452_v35 = vpop.f32.mrb[0].mxu0 }
 0x1b3   :  { %v454_v36 = vpop.f32.mrb[1].mxu0 }
 0x1b4   :  { %v456_v37 = vpop.f32.mrb[2].mxu0 }
 0x1b5   :  { %v611_v38 = vpack.c.bf16 %v456_v37, %v452_v35  ;;  %v458_v39 = vpop.f32.mrb[3].mxu0 }
 0x1b6   :  { %v627_v40 = vpack.c.bf16 %v458_v39, %v454_v36 }
 0x1ba   :  { %v462_v41 = vpop.f32.mrb[4].mxu0 }
 0x1bb   :  { %v464_v42 = vpop.f32.mrb[5].mxu0 }
 0x1bc   :  { %v466_v43 = vpop.f32.mrb[6].mxu0 }
 0x1bd   :  { %v612_v44 = vpack.c.bf16 %v466_v43, %v462_v41  ;;  %v468_v45 = vpop.f32.mrb[7].mxu0 }
 0x1be   :  { %v628_v46 = vpack.c.bf16 %v468_v45, %v464_v42 }
 0x1c2   :  { %v6423_v47 = vpop.f32.mrb[8].mxu0 }
 0x1c3   :  { %v6425_v48 = vpop.f32.mrb[9].mxu0 }
 0x1c4   :  { %v476_v49 = vpop.f32.mrb[10].mxu0 }
 0x1c5   :  { %v613_v50 = vpack.c.bf16 %v476_v49, %v6423_v47  ;;  %v478_v51 = vpop.f32.mrb[11].mxu0 }
 0x1c6   :  { %v629_v52 = vpack.c.bf16 %v478_v51, %v6425_v48 }
 0x1ca   :  { %v6429_v53 = vpop.f32.mrb[12].mxu0 }
 0x1cb   :  { %v6431_v54 = vpop.f32.mrb[13].mxu0 }
 0x1cc   :  { %v6433_v55 = vpop.f32.mrb[14].mxu0 }
 0x1cd   :  { %v614_v56 = vpack.c.bf16 %v6433_v55, %v6429_v53  ;;  %v6437_v57 = vpop.f32.mrb[15].mxu0 }
 0x1ce   :  { %v630_v58 = vpack.c.bf16 %v6437_v57, %v6431_v54 }
 0x1d2   :  { %v6441_v59 = vpop.f32.mrb[16].mxu0 }
 0x1d3   :  { %v6443_v60 = vpop.f32.mrb[17].mxu0 }
 0x1d4   :  { %v6445_v61 = vpop.f32.mrb[18].mxu0 }
 0x1d5   :  { %v615_v62 = vpack.c.bf16 %v6445_v61, %v6441_v59  ;;  %v6449_v63 = vpop.f32.mrb[19].mxu0 }
 0x1d6   :  { %v631_v0 = vpack.c.bf16 %v6449_v63, %v6443_v60 }
 0x1da   :  { %v6453_v1 = vpop.f32.mrb[20].mxu0 }
 0x1db   :  { %v6455_v2 = vpop.f32.mrb[21].mxu0 }
 0x1dc   :  { %v6457_v3 = vpop.f32.mrb[22].mxu0 }
 0x1dd   :  { %v616_v4 = vpack.c.bf16 %v6457_v3, %v6453_v1  ;;  %v6461_v5 = vpop.f32.mrb[23].mxu0 }
 0x1de   :  { %v632_v6 = vpack.c.bf16 %v6461_v5, %v6455_v2  ;;  %v5545_v5 = vld [vmem:[#allocation2] ss:$8 sps:$4 sm:$0xff]  }
 0x1e2   :  { %v6465_v7 = vpop.f32.mrb[24].mxu0 }
 0x1e3   :  { %v6467_v8 = vpop.f32.mrb[25].mxu0 }
 0x1e4   :  { %v6469_v9 = vpop.f32.mrb[26].mxu0 }
 0x1e5   :  { %v617_v10 = vpack.c.bf16 %v6469_v9, %v6465_v7  ;;  %v6473_v11 = vpop.f32.mrb[27].mxu0  ;;  %v5551_v7 = vld [vmem:[#allocation2 + $0x14] ss:$8 sps:$4 sm:$0xff]   ;;  %v5642_v9 = vld [vmem:[#allocation8 + $0x8] sm:$0xff]  }
 0x1e6   :  { %v633_v12 = vpack.c.bf16 %v6473_v11, %v6467_v8  ;;  %v5553_v8 = vld [vmem:[#allocation5 + $0x14] ss:$8 sps:$4 sm:$0xff]   ;;  %v5555_v11 = vld [vmem:[#allocation2 + $0x10] ss:$8 sps:$4 sm:$0xff]  }
 0x1ea   :  { %v6477_v13 = vpop.f32.mrb[28].mxu0 }
 0x1eb   :  { %v6479_v14 = vpop.f32.mrb[29].mxu0 }
 0x1ec   :  { %v6481_v15 = vpop.f32.mrb[30].mxu0 }
 0x1ed   :  { %v618_v16 = vpack.c.bf16 %v6481_v15, %v6477_v13  ;;  %v6485_v17 = vpop.f32.mrb[31].mxu0  ;;  %v5557_v13 = vld [vmem:[#allocation2 + $0x24] ss:$8 sps:$4 sm:$0xff]  }
 0x1ee   :  { %v634_v18 = vpack.c.bf16 %v6485_v17, %v6479_v14  ;;  %v5559_v15 = vld [vmem:[#allocation5 + $0x24] ss:$8 sps:$4 sm:$0xff]   ;;  %v5561_v14 = vld [vmem:[#allocation2 + $0x20] ss:$8 sps:$4 sm:$0xff]   ;;  %v5563_v17 = vld [vmem:[#allocation2 + $0x34] ss:$8 sps:$4 sm:$0xff]  }
 0x1f2   :  { %v532_v19 = vpop.f32.mrb[32].mxu0 }
 0x1f3   :  { %v534_v20 = vpop.f32.mrb[33].mxu0 }
 0x1f4   :  { %v536_v21 = vpop.f32.mrb[34].mxu0 }
 0x1f5   :  { %v619_v22 = vpack.c.bf16 %v536_v21, %v532_v19  ;;  %v538_v23 = vpop.f32.mrb[35].mxu0  ;;  %v5567_v19 = vld [vmem:[#allocation2 + $0x30] ss:$8 sps:$4 sm:$0xff]   ;;  %v5569_v21 = vld [vmem:[#allocation2 + $0x44] ss:$8 sps:$4 sm:$0xff]  }
 0x1f6   :  { %v635_v24 = vpack.c.bf16 %v538_v23, %v534_v20  ;;  %v5568_v20 = vld [vmem:[#allocation5 + $0x30] ss:$8 sps:$4 sm:$0xff]   ;;  %v5573_v23 = vld [vmem:[#allocation2 + $0x40] ss:$8 sps:$4 sm:$0xff]  }
 0x1f7   :  { %4202 = vmatprep.subr.bf16.mxu0 %v619_v22  ;;  %v5571_v22 = vld [vmem:[#allocation5 + $0x44] ss:$8 sps:$4 sm:$0xff]  }
 0x1f8   :  { %4090 = vmatprep.subr.bf16.mxu1 %v635_v24  ;;  %4203 = vmatpush3.bf16.msra.mxu0 %v611_v38  ;;  %v5574_v24 = vld [vmem:[#allocation5 + $0x40] ss:$8 sps:$4 sm:$0xff]  }
 0x1f9   :  { %4091 = vmatpush3.bf16.msra.mxu1 %v627_v40 }
 0x1fa   :  { %v542_v25 = vpop.f32.mrb[36].mxu0 }
 0x1fb   :  { %v544_v26 = vpop.f32.mrb[37].mxu0 }
 0x1fc   :  { %v546_v27 = vpop.f32.mrb[38].mxu0 }
 0x1fd   :  { %v620_v28 = vpack.c.bf16 %v546_v27, %v542_v25  ;;  %v548_v29 = vpop.f32.mrb[39].mxu0  ;;  %v5575_v25 = vld [vmem:[#allocation2 + $0x54] ss:$8 sps:$4 sm:$0xff]   ;;  %v5579_v27 = vld [vmem:[#allocation2 + $0x50] ss:$8 sps:$4 sm:$0xff]  }
 0x1fe   :  { %v636_v30 = vpack.c.bf16 %v548_v29, %v544_v26  ;;  %v5577_v26 = vld [vmem:[#allocation5 + $0x54] ss:$8 sps:$4 sm:$0xff]   ;;  %v5581_v29 = vld [vmem:[#allocation2 + $0x64] ss:$8 sps:$4 sm:$0xff]  }
 0x1ff   :  { %4204 = vmatprep.subr.bf16.mxu0 %v620_v28  ;;  %v5580_v28 = vld [vmem:[#allocation5 + $0x50] ss:$8 sps:$4 sm:$0xff]  }
 0x200   :  { %4092 = vmatprep.subr.bf16.mxu1 %v636_v30  ;;  %4205 = vmatpush3.bf16.msra.mxu0 %v612_v44  ;;  %v5583_v30 = vld [vmem:[#allocation5 + $0x64] ss:$8 sps:$4 sm:$0xff]  }
 0x201   :  { %4093 = vmatpush3.bf16.msra.mxu1 %v628_v46 }
 0x202   :  { %v552_v31 = vpop.f32.mrb[40].mxu0 }
 0x203   :  { %v554_v32 = vpop.f32.mrb[41].mxu0 }
 0x204   :  { %v556_v33 = vpop.f32.mrb[42].mxu0 }
 0x205   :  { %v621_v35 = vpack.c.bf16 %v556_v33, %v552_v31  ;;  %v558_v36 = vpop.f32.mrb[43].mxu0  ;;  %v5585_v31 = vld [vmem:[#allocation2 + $0x60] ss:$8 sps:$4 sm:$0xff]   ;;  %v5587_v33 = vld [vmem:[#allocation2 + $0x74] ss:$8 sps:$4 sm:$0xff]  }
 0x206   :  { %v637_v37 = vpack.c.bf16 %v558_v36, %v554_v32  ;;  %v5586_v32 = vld [vmem:[#allocation5 + $0x60] ss:$8 sps:$4 sm:$0xff]   ;;  %v5591_v36 = vld [vmem:[#allocation2 + $0x70] ss:$8 sps:$4 sm:$0xff]  }
 0x207   :  { %4206 = vmatprep.subr.bf16.mxu0 %v621_v35  ;;  %v5589_v35 = vld [vmem:[#allocation5 + $0x74] ss:$8 sps:$4 sm:$0xff]  }
 0x208   :  { %4094 = vmatprep.subr.bf16.mxu1 %v637_v37  ;;  %4207 = vmatpush3.bf16.msra.mxu0 %v613_v50  ;;  %v5592_v37 = vld [vmem:[#allocation5 + $0x70] ss:$8 sps:$4 sm:$0xff]  }
 0x209   :  { %4095 = vmatpush3.bf16.msra.mxu1 %v629_v52 }
 0x20a   :  { %v562_v38 = vpop.f32.mrb[44].mxu0 }
 0x20b   :  { %v564_v39 = vpop.f32.mrb[45].mxu0 }
 0x20c   :  { %v566_v40 = vpop.f32.mrb[46].mxu0 }
 0x20d   :  { %v622_v41 = vpack.c.bf16 %v566_v40, %v562_v38  ;;  %v568_v42 = vpop.f32.mrb[47].mxu0  ;;  %v5593_v38 = vld [vmem:[#allocation2 + $0x84] ss:$8 sps:$4 sm:$0xff]   ;;  %v5597_v40 = vld [vmem:[#allocation2 + $0x80] ss:$8 sps:$4 sm:$0xff]  }
 0x20e   :  { %v638_v43 = vpack.c.bf16 %v568_v42, %v564_v39  ;;  %v5595_v39 = vld [vmem:[#allocation5 + $0x84] ss:$8 sps:$4 sm:$0xff]   ;;  %v5599_v42 = vld [vmem:[#allocation2 + $0x94] ss:$8 sps:$4 sm:$0xff]  }
 0x20f   :  { %4208 = vmatprep.subr.bf16.mxu0 %v622_v41  ;;  %v5598_v41 = vld [vmem:[#allocation5 + $0x80] ss:$8 sps:$4 sm:$0xff]  }
 0x210   :  { %4096 = vmatprep.subr.bf16.mxu1 %v638_v43  ;;  %4209 = vmatpush3.bf16.msra.mxu0 %v614_v56  ;;  %v5601_v43 = vld [vmem:[#allocation5 + $0x94] ss:$8 sps:$4 sm:$0xff]  }
 0x211   :  { %4097 = vmatpush3.bf16.msra.mxu1 %v630_v58 }
 0x212   :  { %v572_v44 = vpop.f32.mrb[48].mxu0 }
 0x213   :  { %v574_v45 = vpop.f32.mrb[49].mxu0 }
 0x214   :  { %v576_v46 = vpop.f32.mrb[50].mxu0 }
 0x215   :  { %v623_v47 = vpack.c.bf16 %v576_v46, %v572_v44  ;;  %v578_v48 = vpop.f32.mrb[51].mxu0  ;;  %v5603_v44 = vld [vmem:[#allocation2 + $0x90] ss:$8 sps:$4 sm:$0xff]   ;;  %v5605_v46 = vld [vmem:[#allocation2 + $0xa4] ss:$8 sps:$4 sm:$0xff]  }
 0x216   :  { %v639_v49 = vpack.c.bf16 %v578_v48, %v574_v45  ;;  %v5604_v45 = vld [vmem:[#allocation5 + $0x90] ss:$8 sps:$4 sm:$0xff]   ;;  %v5609_v48 = vld [vmem:[#allocation2 + $0xa0] ss:$8 sps:$4 sm:$0xff]  }
 0x217   :  { %4210 = vmatprep.subr.bf16.mxu0 %v623_v47  ;;  %v5607_v47 = vld [vmem:[#allocation5 + $0xa4] ss:$8 sps:$4 sm:$0xff]  }
 0x218   :  { %4098 = vmatprep.subr.bf16.mxu1 %v639_v49  ;;  %4211 = vmatpush3.bf16.msra.mxu0 %v615_v62  ;;  %v5610_v49 = vld [vmem:[#allocation5 + $0xa0] ss:$8 sps:$4 sm:$0xff]  }
 0x219   :  { %4099 = vmatpush3.bf16.msra.mxu1 %v631_v0 }
 0x21a   :  { %v582_v50 = vpop.f32.mrb[52].mxu0 }
 0x21b   :  { %v584_v51 = vpop.f32.mrb[53].mxu0 }
 0x21c   :  { %v586_v52 = vpop.f32.mrb[54].mxu0 }
 0x21d   :  { %v624_v53 = vpack.c.bf16 %v586_v52, %v582_v50  ;;  %v588_v54 = vpop.f32.mrb[55].mxu0  ;;  %v5611_v50 = vld [vmem:[#allocation2 + $0xb4] ss:$8 sps:$4 sm:$0xff]   ;;  %v5615_v52 = vld [vmem:[#allocation2 + $0xb0] ss:$8 sps:$4 sm:$0xff]  }
 0x21e   :  { %v640_v55 = vpack.c.bf16 %v588_v54, %v584_v51  ;;  %v5613_v51 = vld [vmem:[#allocation5 + $0xb4] ss:$8 sps:$4 sm:$0xff]   ;;  %v5616_v54 = vld [vmem:[#allocation5 + $0xb0] ss:$8 sps:$4 sm:$0xff]  }
 0x21f   :  { %4212 = vmatprep.subr.bf16.mxu0 %v624_v53  ;;  %v5644_v53 = vld [vmem:[#allocation8 + $0x18] sm:$0xff]  }
 0x220   :  { %4100 = vmatprep.subr.bf16.mxu1 %v640_v55  ;;  %4213 = vmatpush3.bf16.msra.mxu0 %v616_v4  ;;  %v5641_v4 = vld [vmem:[#allocation8] sm:$0xff]  }
 0x221   :  { %4101 = vmatpush3.bf16.msra.mxu1 %v632_v6  ;;  %v5550_v6 = vld [vmem:[#allocation5] ss:$8 sps:$4 sm:$0xff]   ;;  %v5617_v55 = vld [vmem:[#allocation2 + $0xc4] ss:$8 sps:$4 sm:$0xff]  }
 0x222   :  { %v592_v56 = vpop.f32.mrb[56].mxu0 }
 0x223   :  { %v594_v57 = vpop.f32.mrb[57].mxu0 }
 0x224   :  { %v596_v58 = vpop.f32.mrb[58].mxu0 }
 0x225   :  { %v625_v59 = vpack.c.bf16 %v596_v58, %v592_v56  ;;  %v598_v60 = vpop.f32.mrb[59].mxu0  ;;  %v5619_v56 = vld [vmem:[#allocation5 + $0xc4] ss:$8 sps:$4 sm:$0xff]   ;;  %v5621_v58 = vld [vmem:[#allocation2 + $0xc0] ss:$8 sps:$4 sm:$0xff]  }
 0x226   :  { %v641_v61 = vpack.c.bf16 %v598_v60, %v594_v57  ;;  %v5645_v57 = vld [vmem:[#allocation8 + $0x20] sm:$0xff]  }
 0x227   :  { %4214 = vmatprep.subr.bf16.mxu0 %v625_v59  ;;  %v5646_v59 = vld [vmem:[#allocation8 + $0x28] sm:$0xff]  }
 0x228   :  { %4102 = vmatprep.subr.bf16.mxu1 %v641_v61  ;;  %4215 = vmatpush3.bf16.msra.mxu0 %v617_v10  ;;  %v5643_v10 = vld [vmem:[#allocation8 + $0x10] sm:$0xff]   ;;  %v5622_v60 = vld [vmem:[#allocation5 + $0xc0] ss:$8 sps:$4 sm:$0xff]  }
 0x229   :  { %4103 = vmatpush3.bf16.msra.mxu1 %v633_v12  ;;  %v5556_v12 = vld [vmem:[#allocation5 + $0x10] ss:$8 sps:$4 sm:$0xff]   ;;  %v5623_v61 = vld [vmem:[#allocation2 + $0xd4] ss:$8 sps:$4 sm:$0xff]  }
 0x22a   :  { %v602_v62 = vpop.f32.mrb[60].mxu0 }
 0x22b   :  { %v604_v63 = vpop.f32.mrb[61].mxu0 }
 0x22c   :  { %v606_v0 = vpop.f32.mrb[62].mxu0 }
 0x22d   :  { %v626_v1 = vpack.c.bf16 %v606_v0, %v602_v62  ;;  %v608_v2 = vpop.f32.mrb[63].mxu0  ;;  %v5625_v62 = vld [vmem:[#allocation5 + $0xd4] ss:$8 sps:$4 sm:$0xff]   ;;  %v5627_v0 = vld [vmem:[#allocation2 + $0xd0] ss:$8 sps:$4 sm:$0xff]  }
 0x22e   :  { %v642_v3 = vpack.c.bf16 %v608_v2, %v604_v63  ;;  %v5647_v63 = vld [vmem:[#allocation8 + $0x30] sm:$0xff]  }
 0x22f   :  { %4216 = vmatprep.subr.bf16.mxu0 %v626_v1  ;;  %v5648_v1 = vld [vmem:[#allocation8 + $0x38] sm:$0xff]  }
 0x230   :  { %4104 = vmatprep.subr.bf16.mxu1 %v642_v3  ;;  %4217 = vmatpush3.bf16.msra.mxu0 %v618_v16  ;;  %v5562_v16 = vld [vmem:[#allocation5 + $0x20] ss:$8 sps:$4 sm:$0xff]   ;;  %v5628_v2 = vld [vmem:[#allocation5 + $0xd0] ss:$8 sps:$4 sm:$0xff]   ;;  %v5629_v3 = vld [vmem:[#allocation2 + $0xe4] ss:$8 sps:$4 sm:$0xff]  }
 0x231   :  { %4105 = vmatpush3.bf16.msra.mxu1 %v634_v18  ;;  %v5565_v18 = vld [vmem:[#allocation5 + $0x34] ss:$8 sps:$4 sm:$0xff]  }
 0x232   :  { %5010 = vmatprep.subr.bf16.mxu1 %v5641_v4 }
 0x233   :  { %1222 = vmatmul.mubr.bf16.vlgmr.msra.gmra.mrb[64].mxu0 %v5545_v5  ;;  %v5633_v5 = vld [vmem:[#allocation2 + $0xe0] ss:$8 sps:$4 sm:$0xff]  }
 0x234   :  { %901 = vmatmul.mubr.bf16.vlgmr.msra.gmra.mrb[0].mxu1 %v5550_v6  ;;  %1229 = vmatprep.mubr.bf16.mxu0 %v5551_v7  ;;  %v5634_v6 = vld [vmem:[#allocation5 + $0xe0] ss:$8 sps:$4 sm:$0xff]   ;;  %v5635_v7 = vld [vmem:[#allocation2 + $0xf4] ss:$8 sps:$4 sm:$0xff]  }
 0x235   :  { %908 = vmatprep.mubr.bf16.mxu1 %v5553_v8  ;;  %5011 = vmatpush3.bf16.msra.mxu1 %v5641_v4  ;;  %v5631_v4 = vld [vmem:[#allocation5 + $0xe4] ss:$8 sps:$4 sm:$0xff]   ;;  %v5637_v8 = vld [vmem:[#allocation5 + $0xf4] ss:$8 sps:$4 sm:$0xff]  }
 0x236   :  { %5012 = vmatprep.subr.bf16.mxu1 %v5642_v9 }
 0x239   :  { %5013 = vmatpush3.bf16.msra.mxu1 %v5642_v9  ;;  %v5639_v9 = vld [vmem:[#allocation2 + $0xf0] ss:$8 sps:$4 sm:$0xff]  }
 0x23a   :  { %5014 = vmatprep.subr.bf16.mxu1 %v5643_v10 }
 0x23b   :  { %1230 = vmatmul.mubr.bf16.gmra.mrb[68].mxu0 %v5555_v11  ;;  %v5649_v11 = vld [vmem:[#allocation10] sm:$0xff]  }
 0x23c   :  { %909 = vmatmul.mubr.bf16.gmra.mrb[4].mxu1 %v5556_v12  ;;  %1237 = vmatprep.mubr.bf16.mxu0 %v5557_v13 }
 0x23d   :  { %916 = vmatprep.mubr.bf16.mxu1 %v5559_v15  ;;  %5015 = vmatpush3.bf16.msra.mxu1 %v5643_v10  ;;  %v5640_v10 = vld [vmem:[#allocation5 + $0xf0] ss:$8 sps:$4 sm:$0xff]  }
 0x23e   :  { %5016 = vmatprep.subr.bf16.mxu1 %v5644_v53 }
 0x241   :  { %5017 = vmatpush3.bf16.msra.mxu1 %v5644_v53 }
 0x242   :  { %5018 = vmatprep.subr.bf16.mxu1 %v5645_v57 }
 0x243   :  { %1238 = vmatmul.mubr.bf16.gmra.mrb[72].mxu0 %v5561_v14 }
 0x244   :  { %917 = vmatmul.mubr.bf16.gmra.mrb[8].mxu1 %v5562_v16  ;;  %1245 = vmatprep.mubr.bf16.mxu0 %v5563_v17 }
 0x245   :  { %924 = vmatprep.mubr.bf16.mxu1 %v5565_v18  ;;  %5019 = vmatpush3.bf16.msra.mxu1 %v5645_v57 }
 0x246   :  { %5020 = vmatprep.subr.bf16.mxu1 %v5646_v59 }
 0x249   :  { %5021 = vmatpush3.bf16.msra.mxu1 %v5646_v59 }
 0x24a   :  { %5022 = vmatprep.subr.bf16.mxu1 %v5647_v63 }
 0x24b   :  { %1246 = vmatmul.mubr.bf16.gmra.mrb[76].mxu0 %v5567_v19 }
 0x24c   :  { %925 = vmatmul.mubr.bf16.gmra.mrb[12].mxu1 %v5568_v20  ;;  %1253 = vmatprep.mubr.bf16.mxu0 %v5569_v21 }
 0x24d   :  { %932 = vmatprep.mubr.bf16.mxu1 %v5571_v22  ;;  %5023 = vmatpush3.bf16.msra.mxu1 %v5647_v63 }
 0x24e   :  { %5024 = vmatprep.subr.bf16.mxu1 %v5648_v1 }
 0x251   :  { %5025 = vmatpush3.bf16.msra.mxu1 %v5648_v1 }
 0x252   :  { %5058 = vmatprep.subr.bf16.mxu1 %v5649_v11 }
 0x253   :  { %1254 = vmatmul.mubr.bf16.gmra.mrb[80].mxu0 %v5573_v23  ;;  %v6523_v23 = vld [vmem:[%s7283_s9] ss:$0 sm:$0xff]  ;;  %s3876_s9 = sshll.u32 %s6078_s1, 4  ;;  %s3877_s9 = int_to_ptr.vmem [resolvable:$true] %s3876_s9 }
 0x254   :  { %933 = vmatmul.mubr.bf16.gmra.mrb[16].mxu1 %v5574_v24  ;;  %1261 = vmatprep.mubr.bf16.mxu0 %v5575_v25  ;;  %p6031_p11 = scmp.lt.s32.totalorder %s3877_s9, %s3877_s9 }
 0x255   :  { %940 = vmatprep.mubr.bf16.mxu1 %v5577_v26 }
 0x25b   :  { %1262 = vmatmul.mubr.bf16.gmra.mrb[84].mxu0 %v5579_v27 }
 0x25c   :  { %941 = vmatmul.mubr.bf16.gmra.mrb[20].mxu1 %v5580_v28  ;;  %1269 = vmatprep.mubr.bf16.mxu0 %v5581_v29 }
 0x25d   :  { %948 = vmatprep.mubr.bf16.mxu1 %v5583_v30 }
 0x263   :  { %1270 = vmatmul.mubr.bf16.gmra.mrb[88].mxu0 %v5585_v31 }
 0x264   :  { %949 = vmatmul.mubr.bf16.gmra.mrb[24].mxu1 %v5586_v32  ;;  %1277 = vmatprep.mubr.bf16.mxu0 %v5587_v33 }
 0x265   :  { %956 = vmatprep.mubr.bf16.mxu1 %v5589_v35 }
 0x26b   :  { %1278 = vmatmul.mubr.bf16.gmra.mrb[92].mxu0 %v5591_v36 }
 0x26c   :  { %957 = vmatmul.mubr.bf16.gmra.mrb[28].mxu1 %v5592_v37  ;;  %1285 = vmatprep.mubr.bf16.mxu0 %v5593_v38 }
 0x26d   :  { %964 = vmatprep.mubr.bf16.mxu1 %v5595_v39 }
 0x273   :  { %1286 = vmatmul.mubr.bf16.gmra.mrb[96].mxu0 %v5597_v40 }
 0x274   :  { %965 = vmatmul.mubr.bf16.gmra.mrb[32].mxu1 %v5598_v41  ;;  %1293 = vmatprep.mubr.bf16.mxu0 %v5599_v42 }
 0x275   :  { %972 = vmatprep.mubr.bf16.mxu1 %v5601_v43 }
 0x27b   :  { %1294 = vmatmul.mubr.bf16.gmra.mrb[100].mxu0 %v5603_v44 }
 0x27c   :  { %973 = vmatmul.mubr.bf16.gmra.mrb[36].mxu1 %v5604_v45  ;;  %1301 = vmatprep.mubr.bf16.mxu0 %v5605_v46 }
 0x27d   :  { %980 = vmatprep.mubr.bf16.mxu1 %v5607_v47 }
 0x283   :  { %1302 = vmatmul.mubr.bf16.gmra.mrb[104].mxu0 %v5609_v48 }
 0x284   :  { %981 = vmatmul.mubr.bf16.gmra.mrb[40].mxu1 %v5610_v49  ;;  %1309 = vmatprep.mubr.bf16.mxu0 %v5611_v50 }
 0x285   :  { %988 = vmatprep.mubr.bf16.mxu1 %v5613_v51 }
 0x28b   :  { %1310 = vmatmul.mubr.bf16.gmra.mrb[108].mxu0 %v5615_v52 }
 0x28c   :  { %989 = vmatmul.mubr.bf16.gmra.mrb[44].mxu1 %v5616_v54  ;;  %1317 = vmatprep.mubr.bf16.mxu0 %v5617_v55 }
 0x28d   :  { %996 = vmatprep.mubr.bf16.mxu1 %v5619_v56 }
 0x293   :  { %1318 = vmatmul.mubr.bf16.gmra.mrb[112].mxu0 %v5621_v58 }
 0x294   :  { %997 = vmatmul.mubr.bf16.gmra.mrb[48].mxu1 %v5622_v60  ;;  %1325 = vmatprep.mubr.bf16.mxu0 %v5623_v61 }
 0x295   :  { %1004 = vmatprep.mubr.bf16.mxu1 %v5625_v62 }
 0x29b   :  { %1326 = vmatmul.mubr.bf16.gmra.mrb[116].mxu0 %v5627_v0  ;;  %v5650_v0 = vld [vmem:[#allocation10 + $0x8] sm:$0xff]  }
 0x29c   :  { %1005 = vmatmul.mubr.bf16.gmra.mrb[52].mxu1 %v5628_v2  ;;  %1333 = vmatprep.mubr.bf16.mxu0 %v5629_v3 }
 0x29d   :  { %1012 = vmatprep.mubr.bf16.mxu1 %v5631_v4 }
 0x2a3   :  { %1334 = vmatmul.mubr.bf16.gmra.mrb[120].mxu0 %v5633_v5 }
 0x2a4   :  { %1013 = vmatmul.mubr.bf16.gmra.mrb[56].mxu1 %v5634_v6  ;;  %1341 = vmatprep.mubr.bf16.mxu0 %v5635_v7  ;;  %v5651_v7 = vld [vmem:[#allocation10 + $0x10] sm:$0xff]  }
 0x2a5   :  { %1020 = vmatprep.mubr.bf16.mxu1 %v5637_v8 }
 0x2ab   :  { %1342 = vmatmul.mubr.bf16.gmra.mrb[124].mxu0 %v5639_v9 }
 0x2ac   :  { %1021 = vmatmul.mubr.bf16.gmra.mrb[60].mxu1 %v5640_v10  ;;  %1951 = vmatprep.mubr.bf16.mxu0 %v6420_v34 }
 0x306   :  { %v4218_v12 = vpop.f32.mrb[64].mxu0 }
 0x307   :  { %v4106_v13 = vpop.f32.mrb[0].mxu1  ;;  %v4219_v15 = vpop.f32.mrb[65].mxu0 }
 0x308   :  { %v4220_v14 = vadd.f32 %v4219_v15, %v4218_v12  ;;  %v4107_v16 = vpop.f32.mrb[1].mxu1  ;;  %v4221_v17 = vpop.f32.mrb[66].mxu0 }
 0x309   :  { %v4108_v18 = vadd.f32 %v4107_v16, %v4106_v13  ;;  %v4109_v19 = vpop.f32.mrb[2].mxu1  ;;  %v4222_v20 = vpop.f32.mrb[67].mxu0 }
 0x30a   :  { %v4223_v21 = vadd.f32 %v4222_v20, %v4221_v17  ;;  %v4110_v22 = vpop.f32.mrb[3].mxu1 }
 0x30b   :  { %v1224_v24 = vadd.f32 %v4220_v14, %v4108_v18  ;;  %v4111_v34 = vadd.f32 %v4110_v22, %v4109_v19 }
 0x30d   :  { %v1227_v25 = vadd.f32 %v4223_v21, %v4111_v34  ;;  %v1356_v26 = vadd.f32 %v6523_v23, %v1224_v24  ;;  %v5652_v21 = vld [vmem:[#allocation10 + $0x18] sm:$0xff]  }
 0x30e   :  { %v4224_v27 = vpop.f32.mrb[68].mxu0 }
 0x30f   :  { %v4112_v28 = vpop.f32.mrb[4].mxu1  ;;  %v4225_v29 = vpop.f32.mrb[69].mxu0  ;;  %v1357_v30 = vadd.f32 %v6523_v23, %v1227_v25  ;;  %v1388_v38 = vmax.f32 %v1356_v26, 0.0 }
 0x310   :  { %v4226_v31 = vadd.f32 %v4225_v29, %v4224_v27  ;;  %v4113_v32 = vpop.f32.mrb[5].mxu1  ;;  %v4227_v33 = vpop.f32.mrb[70].mxu0 }
 0x311   :  { %v4114_v35 = vadd.f32 %v4113_v32, %v4112_v28  ;;  %v4115_v36 = vpop.f32.mrb[6].mxu1  ;;  %v4228_v37 = vpop.f32.mrb[71].mxu0  ;;  %v1389_v39 = vmax.f32 %v1357_v30, 0.0  ;;  %v5653_v28 = vld [vmem:[#allocation10 + $0x20] sm:$0xff]  }
 0x312   :  { %v4229_v40 = vadd.f32 %v4228_v37, %v4227_v33  ;;  %v4116_v41 = vpop.f32.mrb[7].mxu1 }
 0x313   :  { %v1232_v42 = vadd.f32 %v4226_v31, %v4114_v35  ;;  %v4117_v43 = vadd.f32 %v4116_v41, %v4115_v36  ;;  %v6527_v44 = vpack.c.bf16 %v1389_v39, %v1388_v38 }
 0x315   :  { %v1358_v45 = vadd.f32 %v6523_v23, %v1232_v42  ;;  %v1235_v46 = vadd.f32 %v4229_v40, %v4117_v43  ;;  %5026 = vmatprep.mubr.bf16.mxu1 %v6527_v44  ;;  %v5654_v43 = vld [vmem:[#allocation10 + $0x28] sm:$0xff]  }
 0x316   :  { %v4230_v47 = vpop.f32.mrb[72].mxu0 }
 0x317   :  { %v1359_v48 = vadd.f32 %v6523_v23, %v1235_v46  ;;  %v4118_v49 = vpop.f32.mrb[8].mxu1  ;;  %v4231_v50 = vpop.f32.mrb[73].mxu0  ;;  %v1390_v54 = vmax.f32 %v1358_v45, 0.0 }
 0x318   :  { %v4232_v51 = vadd.f32 %v4231_v50, %v4230_v47  ;;  %v4119_v52 = vpop.f32.mrb[9].mxu1  ;;  %v4233_v53 = vpop.f32.mrb[74].mxu0 }
 0x319   :  { %v1391_v55 = vmax.f32 %v1359_v48, 0.0  ;;  %v4120_v56 = vadd.f32 %v4119_v52, %v4118_v49  ;;  %v4121_v57 = vpop.f32.mrb[10].mxu1  ;;  %v4234_v58 = vpop.f32.mrb[75].mxu0 }
 0x31a   :  { %v4235_v59 = vadd.f32 %v4234_v58, %v4233_v53  ;;  %v4122_v60 = vpop.f32.mrb[11].mxu1 }
 0x31b   :  { %v6532_v61 = vpack.c.bf16 %v1391_v55, %v1390_v54  ;;  %v1240_v62 = vadd.f32 %v4232_v51, %v4120_v56  ;;  %v4123_v63 = vadd.f32 %v4122_v60, %v4121_v57  ;;  %v5655_v51 = vld [vmem:[#allocation10 + $0x30] sm:$0xff]  }
 0x31d   :  { %v1243_v1 = vadd.f32 %v4235_v59, %v4123_v63  ;;  %5027 = vmatmul.mubr.bf16.vlgmr.msra.gmra.mrb[64].mxu1 %v6532_v61  ;;  %v1360_v2 = vadd.f32 %v6523_v23, %v1240_v62 }
 0x31e   :  { %v4236_v3 = vpop.f32.mrb[76].mxu0  ;;  %5059 = vmatpush3.bf16.msra.mxu1 %v5649_v11 }
 0x31f   :  { %v4124_v4 = vpop.f32.mrb[12].mxu1  ;;  %v4237_v5 = vpop.f32.mrb[77].mxu0  ;;  %v1361_v6 = vadd.f32 %v6523_v23, %v1243_v1  ;;  %5060 = vmatprep.subr.bf16.mxu1 %v5650_v0  ;;  %v1392_v14 = vmax.f32 %v1360_v2, 0.0  ;;  %v5656_v2 = vld [vmem:[#allocation10 + $0x38] sm:$0xff]  }
 0x320   :  { %v4238_v8 = vadd.f32 %v4237_v5, %v4236_v3  ;;  %v4125_v9 = vpop.f32.mrb[13].mxu1  ;;  %v4239_v10 = vpop.f32.mrb[78].mxu0 }
 0x321   :  { %v4126_v12 = vadd.f32 %v4125_v9, %v4124_v4  ;;  %v4127_v13 = vpop.f32.mrb[14].mxu1  ;;  %v4240_v15 = vpop.f32.mrb[79].mxu0  ;;  %v1393_v16 = vmax.f32 %v1361_v6, 0.0 }
 0x322   :  { %v4241_v17 = vadd.f32 %v4240_v15, %v4239_v10  ;;  %v4128_v18 = vpop.f32.mrb[15].mxu1  ;;  %5061 = vmatpush3.bf16.msra.mxu1 %v5650_v0 }
 0x323   :  { %v1248_v19 = vadd.f32 %v4238_v8, %v4126_v12  ;;  %v4129_v20 = vadd.f32 %v4128_v18, %v4127_v13  ;;  %v6537_v11 = vpack.c.bf16 %v1393_v16, %v1392_v14  ;;  %5062 = vmatprep.subr.bf16.mxu1 %v5651_v7 }
 0x325   :  { %v1251_v22 = vadd.f32 %v4241_v17, %v4129_v20  ;;  %5030 = vmatprep.mubr.bf16.mxu1 %v6537_v11  ;;  %v1362_v24 = vadd.f32 %v6523_v23, %v1248_v19 }
 0x326   :  { %v4242_v34 = vpop.f32.mrb[80].mxu0  ;;  %5063 = vmatpush3.bf16.msra.mxu1 %v5651_v7 }
 0x327   :  { %v4130_v25 = vpop.f32.mrb[16].mxu1  ;;  %v4243_v26 = vpop.f32.mrb[81].mxu0  ;;  %v1363_v27 = vadd.f32 %v6523_v23, %v1251_v22  ;;  %5064 = vmatprep.subr.bf16.mxu1 %v5652_v21  ;;  %v1394_v36 = vmax.f32 %v1362_v24, 0.0 }
 0x328   :  { %v4244_v29 = vadd.f32 %v4243_v26, %v4242_v34  ;;  %v4131_v30 = vpop.f32.mrb[17].mxu1  ;;  %v4245_v31 = vpop.f32.mrb[82].mxu0 }
 0x329   :  { %v4132_v32 = vadd.f32 %v4131_v30, %v4130_v25  ;;  %v4133_v33 = vpop.f32.mrb[18].mxu1  ;;  %v4246_v35 = vpop.f32.mrb[83].mxu0  ;;  %v1395_v37 = vmax.f32 %v1363_v27, 0.0 }
 0x32a   :  { %v4247_v38 = vadd.f32 %v4246_v35, %v4245_v31  ;;  %v4134_v39 = vpop.f32.mrb[19].mxu1  ;;  %5065 = vmatpush3.bf16.msra.mxu1 %v5652_v21 }
 0x32b   :  { %v1256_v40 = vadd.f32 %v4244_v29, %v4132_v32  ;;  %v4135_v41 = vadd.f32 %v4134_v39, %v4133_v33  ;;  %v6542_v42 = vpack.c.bf16 %v1395_v37, %v1394_v36  ;;  %5066 = vmatprep.subr.bf16.mxu1 %v5653_v28 }
 0x32d   :  { %v1259_v45 = vadd.f32 %v4247_v38, %v4135_v41  ;;  %5031 = vmatmul.mubr.bf16.gmra.mrb[68].mxu1 %v6542_v42  ;;  %v1364_v46 = vadd.f32 %v6523_v23, %v1256_v40 }
 0x32e   :  { %v4248_v47 = vpop.f32.mrb[84].mxu0  ;;  %5067 = vmatpush3.bf16.msra.mxu1 %v5653_v28 }
 0x32f   :  { %v4136_v48 = vpop.f32.mrb[20].mxu1  ;;  %v4249_v49 = vpop.f32.mrb[85].mxu0  ;;  %v1365_v50 = vadd.f32 %v6523_v23, %v1259_v45  ;;  %5068 = vmatprep.subr.bf16.mxu1 %v5654_v43  ;;  %v1396_v58 = vmax.f32 %v1364_v46, 0.0 }
 0x330   :  { %v4250_v52 = vadd.f32 %v4249_v49, %v4248_v47  ;;  %v4137_v53 = vpop.f32.mrb[21].mxu1  ;;  %v4251_v54 = vpop.f32.mrb[86].mxu0 }
 0x331   :  { %v4138_v55 = vadd.f32 %v4137_v53, %v4136_v48  ;;  %v4139_v56 = vpop.f32.mrb[22].mxu1  ;;  %v4252_v57 = vpop.f32.mrb[87].mxu0  ;;  %v1397_v59 = vmax.f32 %v1365_v50, 0.0 }
 0x332   :  { %v4253_v60 = vadd.f32 %v4252_v57, %v4251_v54  ;;  %v4140_v62 = vpop.f32.mrb[23].mxu1  ;;  %5069 = vmatpush3.bf16.msra.mxu1 %v5654_v43 }
 0x333   :  { %v1264_v63 = vadd.f32 %v4250_v52, %v4138_v55  ;;  %v4141_v0 = vadd.f32 %v4140_v62, %v4139_v56  ;;  %v6547_v1 = vpack.c.bf16 %v1397_v59, %v1396_v58  ;;  %5070 = vmatprep.subr.bf16.mxu1 %v5655_v51 }
 0x335   :  { %v1267_v3 = vadd.f32 %v4253_v60, %v4141_v0  ;;  %5034 = vmatprep.mubr.bf16.mxu1 %v6547_v1  ;;  %v1366_v4 = vadd.f32 %v6523_v23, %v1264_v63 }
 0x336   :  { %v4254_v5 = vpop.f32.mrb[88].mxu0  ;;  %5071 = vmatpush3.bf16.msra.mxu1 %v5655_v51 }
 0x337   :  { %v4142_v6 = vpop.f32.mrb[24].mxu1  ;;  %v4255_v7 = vpop.f32.mrb[89].mxu0  ;;  %v1367_v8 = vadd.f32 %v6523_v23, %v1267_v3  ;;  %5072 = vmatprep.subr.bf16.mxu1 %v5656_v2  ;;  %v1398_v16 = vmax.f32 %v1366_v4, 0.0 }
 0x338   :  { %v4256_v9 = vadd.f32 %v4255_v7, %v4254_v5  ;;  %v4143_v10 = vpop.f32.mrb[25].mxu1  ;;  %v4257_v12 = vpop.f32.mrb[90].mxu0 }
 0x339   :  { %v4144_v13 = vadd.f32 %v4143_v10, %v4142_v6  ;;  %v4145_v15 = vpop.f32.mrb[26].mxu1  ;;  %v4258_v14 = vpop.f32.mrb[91].mxu0  ;;  %v1399_v17 = vmax.f32 %v1367_v8, 0.0 }
 0x33a   :  { %v4259_v18 = vadd.f32 %v4258_v14, %v4257_v12  ;;  %v4146_v19 = vpop.f32.mrb[27].mxu1  ;;  %5073 = vmatpush3.bf16.msra.mxu1 %v5656_v2 }
 0x33b   :  { %v1272_v20 = vadd.f32 %v4256_v9, %v4144_v13  ;;  %v4147_v21 = vadd.f32 %v4146_v19, %v4145_v15  ;;  %v6552_v22 = vpack.c.bf16 %v1399_v17, %v1398_v16 }
 0x33d   :  { %v1275_v24 = vadd.f32 %v4259_v18, %v4147_v21  ;;  %5035 = vmatmul.mubr.bf16.gmra.mrb[72].mxu1 %v6552_v22  ;;  %v1368_v34 = vadd.f32 %v6523_v23, %v1272_v20 }
 0x33e   :  { %v4260_v25 = vpop.f32.mrb[92].mxu0 }
 0x33f   :  { %v4148_v26 = vpop.f32.mrb[28].mxu1  ;;  %v4261_v27 = vpop.f32.mrb[93].mxu0  ;;  %v1369_v28 = vadd.f32 %v6523_v23, %v1275_v24  ;;  %v1400_v36 = vmax.f32 %v1368_v34, 0.0 }
 0x340   :  { %v4262_v29 = vadd.f32 %v4261_v27, %v4260_v25  ;;  %v4149_v30 = vpop.f32.mrb[29].mxu1  ;;  %v4263_v31 = vpop.f32.mrb[94].mxu0 }
 0x341   :  { %v4150_v32 = vadd.f32 %v4149_v30, %v4148_v26  ;;  %v4151_v33 = vpop.f32.mrb[30].mxu1  ;;  %v4264_v35 = vpop.f32.mrb[95].mxu0  ;;  %v1401_v37 = vmax.f32 %v1369_v28, 0.0 }
 0x342   :  { %v4265_v38 = vadd.f32 %v4264_v35, %v4263_v31  ;;  %v4152_v39 = vpop.f32.mrb[31].mxu1 }
 0x343   :  { %v1280_v40 = vadd.f32 %v4262_v29, %v4150_v32  ;;  %v4153_v41 = vadd.f32 %v4152_v39, %v4151_v33  ;;  %v6557_v43 = vpack.c.bf16 %v1401_v37, %v1400_v36 }
 0x345   :  { %v1283_v45 = vadd.f32 %v4265_v38, %v4153_v41  ;;  %5038 = vmatprep.mubr.bf16.mxu1 %v6557_v43  ;;  %v1370_v46 = vadd.f32 %v6523_v23, %v1280_v40 }
 0x346   :  { %v4266_v47 = vpop.f32.mrb[96].mxu0 }
 0x347   :  { %v4154_v48 = vpop.f32.mrb[32].mxu1  ;;  %v4267_v49 = vpop.f32.mrb[97].mxu0  ;;  %v1371_v50 = vadd.f32 %v6523_v23, %v1283_v45  ;;  %v1402_v57 = vmax.f32 %v1370_v46, 0.0 }
 0x348   :  { %v4268_v51 = vadd.f32 %v4267_v49, %v4266_v47  ;;  %v4155_v52 = vpop.f32.mrb[33].mxu1  ;;  %v4269_v53 = vpop.f32.mrb[98].mxu0 }
 0x349   :  { %v4156_v54 = vadd.f32 %v4155_v52, %v4154_v48  ;;  %v4157_v55 = vpop.f32.mrb[34].mxu1  ;;  %v4270_v56 = vpop.f32.mrb[99].mxu0  ;;  %v1403_v58 = vmax.f32 %v1371_v50, 0.0 }
 0x34a   :  { %v4271_v59 = vadd.f32 %v4270_v56, %v4269_v53  ;;  %v4158_v60 = vpop.f32.mrb[35].mxu1 }
 0x34b   :  { %v1288_v62 = vadd.f32 %v4268_v51, %v4156_v54  ;;  %v4159_v63 = vadd.f32 %v4158_v60, %v4157_v55  ;;  %v6562_v0 = vpack.c.bf16 %v1403_v58, %v1402_v57 }
 0x34d   :  { %v1291_v2 = vadd.f32 %v4271_v59, %v4159_v63  ;;  %5039 = vmatmul.mubr.bf16.gmra.mrb[76].mxu1 %v6562_v0  ;;  %v1372_v3 = vadd.f32 %v6523_v23, %v1288_v62 }
 0x34e   :  { %v4272_v4 = vpop.f32.mrb[100].mxu0 }
 0x34f   :  { %v4160_v5 = vpop.f32.mrb[36].mxu1  ;;  %v4273_v6 = vpop.f32.mrb[101].mxu0  ;;  %v1373_v7 = vadd.f32 %v6523_v23, %v1291_v2  ;;  %v1404_v14 = vmax.f32 %v1372_v3, 0.0 }
 0x350   :  { %v4274_v8 = vadd.f32 %v4273_v6, %v4272_v4  ;;  %v4161_v9 = vpop.f32.mrb[37].mxu1  ;;  %v4275_v10 = vpop.f32.mrb[102].mxu0 }
 0x351   :  { %v4162_v12 = vadd.f32 %v4161_v9, %v4160_v5  ;;  %v4163_v13 = vpop.f32.mrb[38].mxu1  ;;  %v4276_v15 = vpop.f32.mrb[103].mxu0  ;;  %v1405_v16 = vmax.f32 %v1373_v7, 0.0 }
 0x352   :  { %v4277_v17 = vadd.f32 %v4276_v15, %v4275_v10  ;;  %v4164_v18 = vpop.f32.mrb[39].mxu1 }
 0x353   :  { %v1296_v19 = vadd.f32 %v4274_v8, %v4162_v12  ;;  %v4165_v20 = vadd.f32 %v4164_v18, %v4163_v13  ;;  %v6567_v21 = vpack.c.bf16 %v1405_v16, %v1404_v14 }
 0x355   :  { %v1299_v24 = vadd.f32 %v4277_v17, %v4165_v20  ;;  %5042 = vmatprep.mubr.bf16.mxu1 %v6567_v21  ;;  %v1374_v34 = vadd.f32 %v6523_v23, %v1296_v19 }
 0x356   :  { %v4278_v25 = vpop.f32.mrb[104].mxu0 }
 0x357   :  { %v4166_v26 = vpop.f32.mrb[40].mxu1  ;;  %v4279_v27 = vpop.f32.mrb[105].mxu0  ;;  %v1375_v28 = vadd.f32 %v6523_v23, %v1299_v24  ;;  %v1406_v36 = vmax.f32 %v1374_v34, 0.0 }
 0x358   :  { %v4280_v29 = vadd.f32 %v4279_v27, %v4278_v25  ;;  %v4167_v30 = vpop.f32.mrb[41].mxu1  ;;  %v4281_v31 = vpop.f32.mrb[106].mxu0 }
 0x359   :  { %v4168_v32 = vadd.f32 %v4167_v30, %v4166_v26  ;;  %v4169_v33 = vpop.f32.mrb[42].mxu1  ;;  %v4282_v35 = vpop.f32.mrb[107].mxu0  ;;  %v1407_v37 = vmax.f32 %v1375_v28, 0.0 }
 0x35a   :  { %v4283_v38 = vadd.f32 %v4282_v35, %v4281_v31  ;;  %v4170_v39 = vpop.f32.mrb[43].mxu1 }
 0x35b   :  { %v1304_v40 = vadd.f32 %v4280_v29, %v4168_v32  ;;  %v4171_v41 = vadd.f32 %v4170_v39, %v4169_v33  ;;  %v6572_v45 = vpack.c.bf16 %v1407_v37, %v1406_v36 }
 0x35d   :  { %v1307_v46 = vadd.f32 %v4283_v38, %v4171_v41  ;;  %5043 = vmatmul.mubr.bf16.gmra.mrb[80].mxu1 %v6572_v45  ;;  %v1376_v47 = vadd.f32 %v6523_v23, %v1304_v40 }
 0x35e   :  { %v4284_v48 = vpop.f32.mrb[108].mxu0 }
 0x35f   :  { %v4172_v49 = vpop.f32.mrb[44].mxu1  ;;  %v4285_v50 = vpop.f32.mrb[109].mxu0  ;;  %v1377_v51 = vadd.f32 %v6523_v23, %v1307_v46  ;;  %v1408_v58 = vmax.f32 %v1376_v47, 0.0 }
 0x360   :  { %v4286_v52 = vadd.f32 %v4285_v50, %v4284_v48  ;;  %v4173_v53 = vpop.f32.mrb[45].mxu1  ;;  %v4287_v54 = vpop.f32.mrb[110].mxu0 }
 0x361   :  { %v4174_v55 = vadd.f32 %v4173_v53, %v4172_v49  ;;  %v4175_v56 = vpop.f32.mrb[46].mxu1  ;;  %v4288_v57 = vpop.f32.mrb[111].mxu0  ;;  %v1409_v59 = vmax.f32 %v1377_v51, 0.0 }
 0x362   :  { %v4289_v60 = vadd.f32 %v4288_v57, %v4287_v54  ;;  %v4176_v62 = vpop.f32.mrb[47].mxu1 }
 0x363   :  { %v1312_v63 = vadd.f32 %v4286_v52, %v4174_v55  ;;  %v4177_v2 = vadd.f32 %v4176_v62, %v4175_v56  ;;  %v6577_v3 = vpack.c.bf16 %v1409_v59, %v1408_v58 }
 0x365   :  { %v1378_v4 = vadd.f32 %v6523_v23, %v1312_v63  ;;  %v1315_v5 = vadd.f32 %v4289_v60, %v4177_v2  ;;  %5046 = vmatprep.mubr.bf16.mxu1 %v6577_v3 }
 0x366   :  { %v4290_v6 = vpop.f32.mrb[112].mxu0 }
 0x367   :  { %v1379_v7 = vadd.f32 %v6523_v23, %v1315_v5  ;;  %v4178_v8 = vpop.f32.mrb[48].mxu1  ;;  %v4291_v9 = vpop.f32.mrb[113].mxu0  ;;  %v1410_v15 = vmax.f32 %v1378_v4, 0.0 }
 0x368   :  { %v4292_v10 = vadd.f32 %v4291_v9, %v4290_v6  ;;  %v4179_v12 = vpop.f32.mrb[49].mxu1  ;;  %v4293_v13 = vpop.f32.mrb[114].mxu0 }
 0x369   :  { %v1411_v14 = vmax.f32 %v1379_v7, 0.0  ;;  %v4180_v16 = vadd.f32 %v4179_v12, %v4178_v8  ;;  %v4181_v17 = vpop.f32.mrb[50].mxu1  ;;  %v4294_v18 = vpop.f32.mrb[115].mxu0 }
 0x36a   :  { %v4295_v19 = vadd.f32 %v4294_v18, %v4293_v13  ;;  %v4182_v20 = vpop.f32.mrb[51].mxu1 }
 0x36b   :  { %v1320_v24 = vadd.f32 %v4292_v10, %v4180_v16  ;;  %v4183_v34 = vadd.f32 %v4182_v20, %v4181_v17  ;;  %v6582_v25 = vpack.c.bf16 %v1411_v14, %v1410_v15 }
 0x36d   :  { %v1380_v26 = vadd.f32 %v6523_v23, %v1320_v24  ;;  %v1323_v27 = vadd.f32 %v4295_v19, %v4183_v34  ;;  %5047 = vmatmul.mubr.bf16.gmra.mrb[84].mxu1 %v6582_v25 }
 0x36e   :  { %v4296_v28 = vpop.f32.mrb[116].mxu0 }
 0x36f   :  { %v1381_v29 = vadd.f32 %v6523_v23, %v1323_v27  ;;  %v4184_v30 = vpop.f32.mrb[52].mxu1  ;;  %v4297_v31 = vpop.f32.mrb[117].mxu0  ;;  %v1412_v36 = vmax.f32 %v1380_v26, 0.0 }
 0x370   :  { %v4298_v32 = vadd.f32 %v4297_v31, %v4296_v28  ;;  %v4185_v33 = vpop.f32.mrb[53].mxu1  ;;  %v4299_v35 = vpop.f32.mrb[118].mxu0 }
 0x371   :  { %v1413_v37 = vmax.f32 %v1381_v29, 0.0  ;;  %v4186_v38 = vadd.f32 %v4185_v33, %v4184_v30  ;;  %v4187_v39 = vpop.f32.mrb[54].mxu1  ;;  %v4300_v40 = vpop.f32.mrb[119].mxu0 }
 0x372   :  { %v4301_v41 = vadd.f32 %v4300_v40, %v4299_v35  ;;  %v4188_v46 = vpop.f32.mrb[55].mxu1  ;;  %v5674_v40 = vld [vmem:[%s7306_s28 + $0x8] sm:$0xff]  }
 0x373   :  { %v1328_v47 = vadd.f32 %v4298_v32, %v4186_v38  ;;  %v4189_v48 = vadd.f32 %v4188_v46, %v4187_v39  ;;  %v6587_v49 = vpack.c.bf16 %v1413_v37, %v1412_v36  ;;  %v5673_v39 = vld [vmem:[%s7306_s28] sm:$0xff]  }
 0x374   :  { %v5677_v46 = vld [vmem:[%s7306_s28 + $0x20] sm:$0xff]  }
 0x375   :  { %v1382_v50 = vadd.f32 %v6523_v23, %v1328_v47  ;;  %v1331_v51 = vadd.f32 %v4301_v41, %v4189_v48  ;;  %5050 = vmatprep.mubr.bf16.mxu1 %v6587_v49  ;;  %v5676_v41 = vld [vmem:[%s7306_s28 + $0x18] sm:$0xff]   ;;  %v5678_v47 = vld [vmem:[%s7306_s28 + $0x28] sm:$0xff]   ;;  %v5679_v48 = vld [vmem:[%s7306_s28 + $0x30] sm:$0xff]  }
 0x376   :  { %v4302_v52 = vpop.f32.mrb[120].mxu0 }
 0x377   :  { %v1383_v53 = vadd.f32 %v6523_v23, %v1331_v51  ;;  %v4190_v54 = vpop.f32.mrb[56].mxu1  ;;  %v4303_v55 = vpop.f32.mrb[121].mxu0  ;;  %v1414_v59 = vmax.f32 %v1382_v50, 0.0  ;;  %v5680_v50 = vld [vmem:[%s7306_s28 + $0x38] sm:$0xff]   ;;  %v5681_v51 = vld [vmem:[%s7306_s28 + $0x40] sm:$0xff]  }
 0x378   :  { %v4304_v56 = vadd.f32 %v4303_v55, %v4302_v52  ;;  %v4191_v57 = vpop.f32.mrb[57].mxu1  ;;  %v4305_v58 = vpop.f32.mrb[122].mxu0  ;;  %v5682_v52 = vld [vmem:[%s7306_s28 + $0x48] sm:$0xff]   ;;  %v5685_v55 = vld [vmem:[%s7306_s28 + $0x60] sm:$0xff]  }
 0x379   :  { %v1415_v60 = vmax.f32 %v1383_v53, 0.0  ;;  %v4192_v62 = vadd.f32 %v4191_v57, %v4190_v54  ;;  %v4193_v63 = vpop.f32.mrb[58].mxu1  ;;  %v4306_v2 = vpop.f32.mrb[123].mxu0  ;;  %v5683_v53 = vld [vmem:[%s7306_s28 + $0x50] sm:$0xff]   ;;  %v5684_v54 = vld [vmem:[%s7306_s28 + $0x58] sm:$0xff]  }
 0x37a   :  { %v4307_v4 = vadd.f32 %v4306_v2, %v4305_v58  ;;  %v4194_v5 = vpop.f32.mrb[59].mxu1  ;;  %v5687_v57 = vld [vmem:[%s7306_s28 + $0x70] sm:$0xff]   ;;  %v5688_v58 = vld [vmem:[%s7306_s28 + $0x78] sm:$0xff]  }
 0x37b   :  { %v1336_v6 = vadd.f32 %v4304_v56, %v4192_v62  ;;  %v4195_v7 = vadd.f32 %v4194_v5, %v4193_v63  ;;  %v6592_v8 = vpack.c.bf16 %v1415_v60, %v1414_v59  ;;  %v5686_v56 = vld [vmem:[%s7306_s28 + $0x68] sm:$0xff]  }
 0x37c   :  { %v5689_v59 = vld [vmem:[#allocation2 + $0x4] ss:$8 sps:$4 sm:$0xff]  }
 0x37d   :  { %v1384_v9 = vadd.f32 %v6523_v23, %v1336_v6  ;;  %v1339_v10 = vadd.f32 %v4307_v4, %v4195_v7  ;;  %5051 = vmatmul.mubr.bf16.gmra.mrb[88].mxu1 %v6592_v8 }
 0x37e   :  { %v4308_v12 = vpop.f32.mrb[124].mxu0 }
 0x37f   :  { %v1385_v13 = vadd.f32 %v6523_v23, %v1339_v10  ;;  %v4196_v15 = vpop.f32.mrb[60].mxu1  ;;  %v4309_v14 = vpop.f32.mrb[125].mxu0  ;;  %v1416_v19 = vmax.f32 %v1384_v9, 0.0 }
 0x380   :  { %v4310_v16 = vadd.f32 %v4309_v14, %v4308_v12  ;;  %v4197_v17 = vpop.f32.mrb[61].mxu1  ;;  %v4311_v18 = vpop.f32.mrb[126].mxu0 }
 0x381   :  { %v1417_v20 = vmax.f32 %v1385_v13, 0.0  ;;  %v4198_v24 = vadd.f32 %v4197_v17, %v4196_v15  ;;  %v4199_v34 = vpop.f32.mrb[62].mxu1  ;;  %v4312_v26 = vpop.f32.mrb[127].mxu0 }
 0x382   :  { %v4313_v27 = vadd.f32 %v4312_v26, %v4311_v18  ;;  %v4200_v28 = vpop.f32.mrb[63].mxu1 }
 0x383   :  { %v1344_v29 = vadd.f32 %v4310_v16, %v4198_v24  ;;  %v4201_v30 = vadd.f32 %v4200_v28, %v4199_v34  ;;  %v6597_v31 = vpack.c.bf16 %v1417_v20, %v1416_v19 }
 0x385   :  { %v1386_v32 = vadd.f32 %v6523_v23, %v1344_v29  ;;  %v1347_v33 = vadd.f32 %v4313_v27, %v4201_v30  ;;  %5054 = vmatprep.mubr.bf16.mxu1 %v6597_v31 }
 0x387   :  { %v1387_v35 = vadd.f32 %v6523_v23, %v1347_v33  ;;  %v1418_v36 = vmax.f32 %v1386_v32, 0.0  ;;  %v5675_v23 = vld [vmem:[%s7306_s28 + $0x10] sm:$0xff]  }
 0x389   :  { %v1419_v37 = vmax.f32 %v1387_v35, 0.0 }
 0x38b   :  { %v6602_v38 = vpack.c.bf16 %v1419_v37, %v1418_v36 }
 0x38d   :  { %5055 = vmatmul.mubr.bf16.gmra.mrb[92].mxu1 %v6602_v38 }
 0x38e   :  { %5074 = vmatprep.mubr.bf16.mxu1 %v5673_v39 }
 0x395   :  { %5075 = vmatmul.mubr.bf16.vlgmr.msra.gmra.mrb[96].mxu1 %v5674_v40 }
 0x396   :  { %5078 = vmatprep.mubr.bf16.mxu1 %v5675_v23 }
 0x39d   :  { %5079 = vmatmul.mubr.bf16.gmra.mrb[100].mxu1 %v5676_v41 }
 0x39e   :  { %5082 = vmatprep.mubr.bf16.mxu1 %v5677_v46 }
 0x3a5   :  { %5083 = vmatmul.mubr.bf16.gmra.mrb[104].mxu1 %v5678_v47 }
 0x3a6   :  { %5086 = vmatprep.mubr.bf16.mxu1 %v5679_v48 }
 0x3ad   :  { %5087 = vmatmul.mubr.bf16.gmra.mrb[108].mxu1 %v5680_v50 }
 0x3ae   :  { %5090 = vmatprep.mubr.bf16.mxu1 %v5681_v51 }
 0x3b5   :  { %5091 = vmatmul.mubr.bf16.gmra.mrb[112].mxu1 %v5682_v52 }
 0x3b6   :  { %5094 = vmatprep.mubr.bf16.mxu1 %v5683_v53 }
 0x3bd   :  { %5095 = vmatmul.mubr.bf16.gmra.mrb[116].mxu1 %v5684_v54 }
 0x3be   :  { %5098 = vmatprep.mubr.bf16.mxu1 %v5685_v55 }
 0x3c5   :  { %5099 = vmatmul.mubr.bf16.gmra.mrb[120].mxu1 %v5686_v56 }
 0x3c6   :  { %5102 = vmatprep.mubr.bf16.mxu1 %v5687_v57 }
 0x3cd   :  { %5103 = vmatmul.mubr.bf16.gmra.mrb[124].mxu1 %v5688_v58 }
 0x3ce   :  { %2112 = vmatprep.mubr.bf16.mxu1 %v5689_v59 }
 0x3f0   :  { %v5028_v60 = vpop.f32.mrb[64].mxu1 }
 0x3f1   :  { %v1534_v62 = vpop.f32.mrb[65].mxu1 }
 0x3f2   :  { %v5029_v63 = vpop.f32.mrb[66].mxu1 }
 0x3f3   :  { %v1662_v2 = vpack.c.bf16 %v5029_v63, %v5028_v60  ;;  %v1537_v4 = vpop.f32.mrb[67].mxu1 }
 0x3f4   :  { %v1661_v5 = vpack.c.bf16 %v1537_v4, %v1534_v62 }
 0x400   :  { %v5032_v6 = vpop.f32.mrb[68].mxu1 }
 0x401   :  { %v1550_v7 = vpop.f32.mrb[69].mxu1 }
 0x402   :  { %v5033_v9 = vpop.f32.mrb[70].mxu1 }
 0x403   :  { %v1664_v10 = vpack.c.bf16 %v5033_v9, %v5032_v6  ;;  %v1553_v12 = vpop.f32.mrb[71].mxu1  ;;  %v5690_v6 = vld [vmem:[#allocation2] ss:$8 sps:$4 sm:$0xff]  }
 0x404   :  { %v1663_v13 = vpack.c.bf16 %v1553_v12, %v1550_v7  ;;  %v5691_v7 = vld [vmem:[#allocation2 + $0x14] ss:$8 sps:$4 sm:$0xff]  }
 0x410   :  { %v5036_v15 = vpop.f32.mrb[72].mxu1 }
 0x411   :  { %v1566_v14 = vpop.f32.mrb[73].mxu1 }
 0x412   :  { %v5037_v16 = vpop.f32.mrb[74].mxu1 }
 0x413   :  { %v1666_v17 = vpack.c.bf16 %v5037_v16, %v5036_v15  ;;  %v1569_v18 = vpop.f32.mrb[75].mxu1  ;;  %v5692_v16 = vld [vmem:[#allocation2 + $0x10] ss:$8 sps:$4 sm:$0xff]  }
 0x414   :  { %v1665_v19 = vpack.c.bf16 %v1569_v18, %v1566_v14 }
 0x420   :  { %v5040_v20 = vpop.f32.mrb[76].mxu1 }
 0x421   :  { %v1582_v24 = vpop.f32.mrb[77].mxu1 }
 0x422   :  { %v5041_v34 = vpop.f32.mrb[78].mxu1 }
 0x423   :  { %v1668_v26 = vpack.c.bf16 %v5041_v34, %v5040_v20  ;;  %v1585_v27 = vpop.f32.mrb[79].mxu1 }
 0x424   :  { %v1667_v28 = vpack.c.bf16 %v1585_v27, %v1582_v24  ;;  %v5694_v27 = vld [vmem:[#allocation2 + $0x20] ss:$8 sps:$4 sm:$0xff]  }
 0x430   :  { %v5044_v29 = vpop.f32.mrb[80].mxu1 }
 0x431   :  { %v1598_v30 = vpop.f32.mrb[81].mxu1 }
 0x432   :  { %v5045_v32 = vpop.f32.mrb[82].mxu1 }
 0x433   :  { %v1670_v33 = vpack.c.bf16 %v5045_v32, %v5044_v29  ;;  %v1601_v35 = vpop.f32.mrb[83].mxu1 }
 0x434   :  { %v1669_v36 = vpack.c.bf16 %v1601_v35, %v1598_v30 }
 0x436   :  { %4474 = vmatprep.subr.bf16.mxu1 %v1669_v36 }
 0x437   :  { %4475 = vmatpush3.bf16.msra.mxu1 %v1661_v5 }
 0x438   :  { %4476 = vmatprep.subr.bf16.mxu1 %v1670_v33 }
 0x43b   :  { %4477 = vmatpush3.bf16.msra.mxu1 %v1662_v2 }
 0x440   :  { %v5048_v37 = vpop.f32.mrb[84].mxu1 }
 0x441   :  { %v1614_v39 = vpop.f32.mrb[85].mxu1 }
 0x442   :  { %v5049_v40 = vpop.f32.mrb[86].mxu1 }
 0x443   :  { %v1672_v23 = vpack.c.bf16 %v5049_v40, %v5048_v37  ;;  %v1617_v41 = vpop.f32.mrb[87].mxu1  ;;  %v5696_v37 = vld [vmem:[#allocation2 + $0x30] ss:$8 sps:$4 sm:$0xff]  }
 0x444   :  { %v1671_v46 = vpack.c.bf16 %v1617_v41, %v1614_v39  ;;  %v5697_v39 = vld [vmem:[#allocation2 + $0x44] ss:$8 sps:$4 sm:$0xff]  }
 0x446   :  { %4478 = vmatprep.subr.bf16.mxu1 %v1671_v46 }
 0x447   :  { %4479 = vmatpush3.bf16.msra.mxu1 %v1663_v13 }
 0x448   :  { %4480 = vmatprep.subr.bf16.mxu1 %v1672_v23 }
 0x44b   :  { %4481 = vmatpush3.bf16.msra.mxu1 %v1664_v10 }
 0x450   :  { %v5052_v47 = vpop.f32.mrb[88].mxu1 }
 0x451   :  { %v1630_v48 = vpop.f32.mrb[89].mxu1 }
 0x452   :  { %v5053_v50 = vpop.f32.mrb[90].mxu1 }
 0x453   :  { %v1674_v51 = vpack.c.bf16 %v5053_v50, %v5052_v47  ;;  %v1633_v52 = vpop.f32.mrb[91].mxu1  ;;  %v5698_v50 = vld [vmem:[#allocation2 + $0x40] ss:$8 sps:$4 sm:$0xff]  }
 0x454   :  { %v1673_v53 = vpack.c.bf16 %v1633_v52, %v1630_v48 }
 0x456   :  { %4482 = vmatprep.subr.bf16.mxu1 %v1673_v53 }
 0x457   :  { %4483 = vmatpush3.bf16.msra.mxu1 %v1665_v19 }
 0x458   :  { %4484 = vmatprep.subr.bf16.mxu1 %v1674_v51  ;;  %v5699_v51 = vld [vmem:[#allocation2 + $0x54] ss:$8 sps:$4 sm:$0xff]  }
 0x45b   :  { %4485 = vmatpush3.bf16.msra.mxu1 %v1666_v17  ;;  %v5693_v17 = vld [vmem:[#allocation2 + $0x24] ss:$8 sps:$4 sm:$0xff]  }
 0x460   :  { %v5056_v54 = vpop.f32.mrb[92].mxu1 }
 0x461   :  { %v1646_v55 = vpop.f32.mrb[93].mxu1 }
 0x462   :  { %v5057_v56 = vpop.f32.mrb[94].mxu1 }
 0x463   :  { %v1676_v57 = vpack.c.bf16 %v5057_v56, %v5056_v54  ;;  %v1649_v58 = vpop.f32.mrb[95].mxu1 }
 0x464   :  { %v1675_v59 = vpack.c.bf16 %v1649_v58, %v1646_v55  ;;  %v5700_v58 = vld [vmem:[#allocation2 + $0x50] ss:$8 sps:$4 sm:$0xff]  }
 0x466   :  { %4486 = vmatprep.subr.bf16.mxu1 %v1675_v59  ;;  %v5701_v59 = vld [vmem:[#allocation2 + $0x64] ss:$8 sps:$4 sm:$0xff]  }
 0x467   :  { %4487 = vmatpush3.bf16.msra.mxu1 %v1667_v28  ;;  %v5695_v28 = vld [vmem:[#allocation2 + $0x34] ss:$8 sps:$4 sm:$0xff]  }
 0x468   :  { %v5076_v60 = vpop.f32.mrb[96].mxu1  ;;  %4488 = vmatprep.subr.bf16.mxu1 %v1676_v57 }
 0x469   :  { %v1775_v62 = vpop.f32.mrb[97].mxu1 }
 0x46a   :  { %v5077_v63 = vpop.f32.mrb[98].mxu1 }
 0x46b   :  { %v1903_v2 = vpack.c.bf16 %v5077_v63, %v5076_v60  ;;  %v1778_v4 = vpop.f32.mrb[99].mxu1  ;;  %4489 = vmatpush3.bf16.msra.mxu1 %v1668_v26 }
 0x46c   :  { %v1902_v5 = vpack.c.bf16 %v1778_v4, %v1775_v62 }
 0x46e   :  { %2113 = vmatmul.mubr.bf16.vlgmr.msra.gmra.mrb[128].mxu1 %v5690_v6 }
 0x46f   :  { %2120 = vmatprep.mubr.bf16.mxu1 %v5691_v7  ;;  %v5702_v7 = vld [vmem:[#allocation2 + $0x60] ss:$8 sps:$4 sm:$0xff]  }
 0x470   :  { %v5080_v9 = vpop.f32.mrb[100].mxu1 }
 0x471   :  { %v1791_v10 = vpop.f32.mrb[101].mxu1 }
 0x472   :  { %v5081_v12 = vpop.f32.mrb[102].mxu1 }
 0x473   :  { %v1905_v13 = vpack.c.bf16 %v5081_v12, %v5080_v9  ;;  %v1794_v15 = vpop.f32.mrb[103].mxu1 }
 0x474   :  { %v1904_v14 = vpack.c.bf16 %v1794_v15, %v1791_v10 }
 0x476   :  { %2121 = vmatmul.mubr.bf16.gmra.mrb[132].mxu1 %v5692_v16 }
 0x477   :  { %2128 = vmatprep.mubr.bf16.mxu1 %v5693_v17  ;;  %v5704_v17 = vld [vmem:[#allocation2 + $0x70] ss:$8 sps:$4 sm:$0xff]  }
 0x478   :  { %v6653_v18 = vpop.f32.mrb[104].mxu1 }
 0x479   :  { %v1807_v19 = vpop.f32.mrb[105].mxu1 }
 0x47a   :  { %v6655_v20 = vpop.f32.mrb[106].mxu1 }
 0x47b   :  { %v1907_v24 = vpack.c.bf16 %v6655_v20, %v6653_v18  ;;  %v1810_v34 = vpop.f32.mrb[107].mxu1  ;;  %v5657_v18 = vld [vmem:[#allocation11] sm:$0xff]  }
 0x47c   :  { %v1906_v26 = vpack.c.bf16 %v1810_v34, %v1807_v19  ;;  %v5658_v19 = vld [vmem:[#allocation11 + $0x8] sm:$0xff]  }
 0x47d   :  { %v5706_v20 = vld [vmem:[#allocation5] ss:$8 sps:$4 sm:$0xff]  }
 0x47e   :  { %2129 = vmatmul.mubr.bf16.gmra.mrb[136].mxu1 %v5694_v27  ;;  %v5707_v34 = vld [vmem:[#allocation2 + $0x80] ss:$8 sps:$4 sm:$0xff]   ;;  %v5709_v27 = vld [vmem:[#allocation2 + $0x94] ss:$8 sps:$4 sm:$0xff]  }
 0x47f   :  { %2136 = vmatprep.mubr.bf16.mxu1 %v5695_v28  ;;  %v5660_v28 = vld [vmem:[#allocation11 + $0x18] sm:$0xff]  }
 0x480   :  { %v6659_v29 = vpop.f32.mrb[108].mxu1 }
 0x481   :  { %v1823_v30 = vpop.f32.mrb[109].mxu1 }
 0x482   :  { %v6661_v32 = vpop.f32.mrb[110].mxu1 }
 0x483   :  { %v1909_v33 = vpack.c.bf16 %v6661_v32, %v6659_v29  ;;  %v1826_v35 = vpop.f32.mrb[111].mxu1  ;;  %v5710_v29 = vld [vmem:[#allocation5 + $0x10] ss:$8 sps:$4 sm:$0xff]   ;;  %v5712_v32 = vld [vmem:[#allocation5 + $0x24] ss:$8 sps:$4 sm:$0xff]  }
 0x484   :  { %v1908_v36 = vpack.c.bf16 %v1826_v35, %v1823_v30  ;;  %v5711_v30 = vld [vmem:[#allocation2 + $0x90] ss:$8 sps:$4 sm:$0xff]   ;;  %v5661_v35 = vld [vmem:[#allocation11 + $0x20] sm:$0xff]  }
 0x486   :  { %2137 = vmatmul.mubr.bf16.gmra.mrb[140].mxu1 %v5696_v37  ;;  %v5714_v37 = vld [vmem:[#allocation5 + $0x20] ss:$8 sps:$4 sm:$0xff]  }
 0x487   :  { %2144 = vmatprep.mubr.bf16.mxu1 %v5697_v39  ;;  %v6665_v39 = vld [vmem:[#allocation2 + $0xa0] ss:$8 sps:$4 sm:$0xff]  }
 0x488   :  { %v5092_v40 = vpop.f32.mrb[112].mxu1 }
 0x489   :  { %v1839_v23 = vpop.f32.mrb[113].mxu1 }
 0x48a   :  { %v5093_v41 = vpop.f32.mrb[114].mxu1 }
 0x48b   :  { %v1911_v46 = vpack.c.bf16 %v5093_v41, %v5092_v40  ;;  %v1842_v47 = vpop.f32.mrb[115].mxu1  ;;  %v5716_v40 = vld [vmem:[#allocation5 + $0x34] ss:$8 sps:$4 sm:$0xff]  }
 0x48c   :  { %v1910_v48 = vpack.c.bf16 %v1842_v47, %v1839_v23  ;;  %v6668_v23 = vld [vmem:[#allocation2 + $0xb4] ss:$8 sps:$4 sm:$0xff]   ;;  %v5718_v47 = vld [vmem:[#allocation5 + $0x30] ss:$8 sps:$4 sm:$0xff]  }
 0x48d   :  { %v5663_v41 = vld [vmem:[#allocation11 + $0x30] sm:$0xff]  }
 0x48e   :  { %4362 = vmatprep.subr.bf16.mxu0 %v1910_v48  ;;  %2145 = vmatmul.mubr.bf16.gmra.mrb[144].mxu1 %v5698_v50  ;;  %v6671_v48 = vld [vmem:[#allocation2 + $0xb0] ss:$8 sps:$4 sm:$0xff]   ;;  %v5720_v50 = vld [vmem:[#allocation5 + $0x44] ss:$8 sps:$4 sm:$0xff]  }
 0x48f   :  { %4363 = vmatpush3.bf16.msra.mxu0 %v1902_v5  ;;  %2152 = vmatprep.mubr.bf16.mxu1 %v5699_v51  ;;  %v6674_v51 = vld [vmem:[#allocation2 + $0xc4] ss:$8 sps:$4 sm:$0xff]  }
 0x490   :  { %v5096_v52 = vpop.f32.mrb[116].mxu1  ;;  %4364 = vmatprep.subr.bf16.mxu0 %v1911_v46  ;;  %v5664_v46 = vld [vmem:[#allocation11 + $0x38] sm:$0xff]  }
 0x491   :  { %v1855_v53 = vpop.f32.mrb[117].mxu1 }
 0x492   :  { %v5097_v54 = vpop.f32.mrb[118].mxu1 }
 0x493   :  { %v1913_v55 = vpack.c.bf16 %v5097_v54, %v5096_v52  ;;  %v1858_v56 = vpop.f32.mrb[119].mxu1  ;;  %4365 = vmatpush3.bf16.msra.mxu0 %v1903_v2  ;;  %v5703_v2 = vld [vmem:[#allocation2 + $0x74] ss:$8 sps:$4 sm:$0xff]   ;;  %v5722_v52 = vld [vmem:[#allocation5 + $0x40] ss:$8 sps:$4 sm:$0xff]  }
 0x494   :  { %v1912_v57 = vpack.c.bf16 %v1858_v56, %v1855_v53  ;;  %v6677_v53 = vld [vmem:[#allocation2 + $0xc0] ss:$8 sps:$4 sm:$0xff]   ;;  %v5724_v54 = vld [vmem:[#allocation5 + $0x54] ss:$8 sps:$4 sm:$0xff]   ;;  %v5726_v56 = vld [vmem:[#allocation5 + $0x50] ss:$8 sps:$4 sm:$0xff]  }
 0x496   :  { %4366 = vmatprep.subr.bf16.mxu0 %v1912_v57  ;;  %2153 = vmatmul.mubr.bf16.gmra.mrb[148].mxu1 %v5700_v58  ;;  %v6683_v57 = vld [vmem:[#allocation2 + $0xd0] ss:$8 sps:$4 sm:$0xff]   ;;  %v5728_v58 = vld [vmem:[#allocation5 + $0x64] ss:$8 sps:$4 sm:$0xff]  }
 0x497   :  { %4367 = vmatpush3.bf16.msra.mxu0 %v1904_v14  ;;  %2160 = vmatprep.mubr.bf16.mxu1 %v5701_v59  ;;  %v6686_v59 = vld [vmem:[#allocation2 + $0xe4] ss:$8 sps:$4 sm:$0xff]  }
 0x498   :  { %v5100_v60 = vpop.f32.mrb[120].mxu1  ;;  %4368 = vmatprep.subr.bf16.mxu0 %v1913_v55  ;;  %v6680_v55 = vld [vmem:[#allocation2 + $0xd4] ss:$8 sps:$4 sm:$0xff]  }
 0x499   :  { %v1871_v62 = vpop.f32.mrb[121].mxu1 }
 0x49a   :  { %v5101_v63 = vpop.f32.mrb[122].mxu1 }
 0x49b   :  { %v1915_v4 = vpack.c.bf16 %v5101_v63, %v5100_v60  ;;  %v1874_v5 = vpop.f32.mrb[123].mxu1  ;;  %4369 = vmatpush3.bf16.msra.mxu0 %v1905_v13  ;;  %v5705_v13 = vld [vmem:[#allocation2 + $0x84] ss:$8 sps:$4 sm:$0xff]   ;;  %v5730_v60 = vld [vmem:[#allocation5 + $0x60] ss:$8 sps:$4 sm:$0xff]  }
 0x49c   :  { %v1914_v6 = vpack.c.bf16 %v1874_v5, %v1871_v62  ;;  %v6689_v62 = vld [vmem:[#allocation2 + $0xe0] ss:$8 sps:$4 sm:$0xff]   ;;  %v5732_v63 = vld [vmem:[#allocation5 + $0x74] ss:$8 sps:$4 sm:$0xff]   ;;  %v5734_v5 = vld [vmem:[#allocation5 + $0x70] ss:$8 sps:$4 sm:$0xff]  }
 0x49e   :  { %4370 = vmatprep.subr.bf16.mxu0 %v1914_v6  ;;  %2161 = vmatmul.mubr.bf16.gmra.mrb[152].mxu1 %v5702_v7  ;;  %v5735_v6 = vld [vmem:[#allocation2 + $0xf0] ss:$8 sps:$4 sm:$0xff]   ;;  %v5665_v7 = vld [vmem:[#allocation13] sm:$0xff]  }
 0x49f   :  { %4371 = vmatpush3.bf16.msra.mxu0 %v1906_v26  ;;  %2168 = vmatprep.mubr.bf16.mxu1 %v5703_v2  ;;  %v5708_v26 = vld [vmem:[#allocation5 + $0x14] ss:$8 sps:$4 sm:$0xff]   ;;  %v5666_v2 = vld [vmem:[#allocation13 + $0x8] sm:$0xff]  }
 0x4a0   :  { %v5104_v9 = vpop.f32.mrb[124].mxu1  ;;  %4372 = vmatprep.subr.bf16.mxu0 %v1915_v4  ;;  %v6692_v4 = vld [vmem:[#allocation2 + $0xf4] ss:$8 sps:$4 sm:$0xff]   ;;  %5154 = vmatprep.subr.bf16.mxu1 %v5665_v7 }
 0x4a1   :  { %v1887_v10 = vpop.f32.mrb[125].mxu1  ;;  %5155 = vmatpush3.bf16.msra.mxu1 %v5665_v7 }
 0x4a2   :  { %v5105_v12 = vpop.f32.mrb[126].mxu1  ;;  %5156 = vmatprep.subr.bf16.mxu1 %v5666_v2 }
 0x4a3   :  { %v1917_v15 = vpack.c.bf16 %v5105_v12, %v5104_v9  ;;  %v1890_v14 = vpop.f32.mrb[127].mxu1  ;;  %4373 = vmatpush3.bf16.msra.mxu0 %v1907_v24  ;;  %v5659_v24 = vld [vmem:[#allocation11 + $0x10] sm:$0xff]   ;;  %v5736_v9 = vld [vmem:[#allocation5 + $0x84] ss:$8 sps:$4 sm:$0xff]   ;;  %v5737_v12 = vld [vmem:[#allocation5 + $0x80] ss:$8 sps:$4 sm:$0xff]  }
 0x4a4   :  { %v1916_v16 = vpack.c.bf16 %v1890_v14, %v1887_v10  ;;  %v5667_v10 = vld [vmem:[#allocation13 + $0x10] sm:$0xff]  }
 0x4a5   :  { %5157 = vmatpush3.bf16.msra.mxu1 %v5666_v2  ;;  %v5738_v14 = vld [vmem:[#allocation5 + $0x94] ss:$8 sps:$4 sm:$0xff]  }
 0x4a6   :  { %4374 = vmatprep.subr.bf16.mxu0 %v1916_v16  ;;  %2169 = vmatmul.mubr.bf16.gmra.mrb[156].mxu1 %v5704_v17  ;;  %v5739_v16 = vld [vmem:[#allocation5 + $0x90] ss:$8 sps:$4 sm:$0xff]   ;;  %v5740_v17 = vld [vmem:[#allocation5 + $0xa4] ss:$8 sps:$4 sm:$0xff]  }
 0x4a7   :  { %4375 = vmatpush3.bf16.msra.mxu0 %v1908_v36  ;;  %2176 = vmatprep.mubr.bf16.mxu1 %v5705_v13  ;;  %v5662_v36 = vld [vmem:[#allocation11 + $0x28] sm:$0xff]  }
 0x4a8   :  { %4376 = vmatprep.subr.bf16.mxu0 %v1917_v15  ;;  %5158 = vmatprep.subr.bf16.mxu1 %v5667_v10  ;;  %v5668_v15 = vld [vmem:[#allocation13 + $0x18] sm:$0xff]   ;;  %v5741_v13 = vld [vmem:[#allocation5 + $0xa0] ss:$8 sps:$4 sm:$0xff]  }
 0x4a9   :  { %5159 = vmatpush3.bf16.msra.mxu1 %v5667_v10 }
 0x4aa   :  { %5160 = vmatprep.subr.bf16.mxu1 %v5668_v15 }
 0x4ab   :  { %4377 = vmatpush3.bf16.msra.mxu0 %v1909_v33  ;;  %v5713_v33 = vld [vmem:[#allocation2 + $0xa4] ss:$8 sps:$4 sm:$0xff]  }
 0x4ac   :  { %5106 = vmatprep.subr.bf16.mxu0 %v5657_v18 }
 0x4ad   :  { %5161 = vmatpush3.bf16.msra.mxu1 %v5668_v15 }
 0x4ae   :  { %1952 = vmatmul.mubr.bf16.vlgmr.msra.gmra.mrb[128].mxu0 %v5706_v20  ;;  %2177 = vmatmul.mubr.bf16.gmra.mrb[160].mxu1 %v5707_v34  ;;  %v5743_v20 = vld [vmem:[#allocation5 + $0xb0] ss:$8 sps:$4 sm:$0xff]   ;;  %v5744_v34 = vld [vmem:[#allocation5 + $0xc4] ss:$8 sps:$4 sm:$0xff]  }
 0x4af   :  { %1959 = vmatprep.mubr.bf16.mxu0 %v5708_v26  ;;  %2184 = vmatprep.mubr.bf16.mxu1 %v5709_v27  ;;  %v5670_v26 = vld [vmem:[#allocation13 + $0x28] sm:$0xff]   ;;  %v5671_v27 = vld [vmem:[#allocation13 + $0x30] sm:$0xff]  }
 0x4b0   :  { %5107 = vmatpush3.bf16.msra.mxu0 %v5657_v18  ;;  %v5742_v18 = vld [vmem:[#allocation5 + $0xb4] ss:$8 sps:$4 sm:$0xff]  }
 0x4b1   :  { %5108 = vmatprep.subr.bf16.mxu0 %v5658_v19 }
 0x4b4   :  { %5109 = vmatpush3.bf16.msra.mxu0 %v5658_v19  ;;  %v5669_v19 = vld [vmem:[#allocation13 + $0x20] sm:$0xff]  }
 0x4b5   :  { %5110 = vmatprep.subr.bf16.mxu0 %v5659_v24  ;;  %5162 = vmatprep.subr.bf16.mxu1 %v5669_v19 }
 0x4b6   :  { %1960 = vmatmul.mubr.bf16.gmra.mrb[132].mxu0 %v5710_v29  ;;  %2185 = vmatmul.mubr.bf16.gmra.mrb[164].mxu1 %v5711_v30  ;;  %v5672_v29 = vld [vmem:[#allocation13 + $0x38] sm:$0xff]  }
 0x4b7   :  { %1967 = vmatprep.mubr.bf16.mxu0 %v5712_v32  ;;  %2192 = vmatprep.mubr.bf16.mxu1 %v5713_v33  ;;  %v5747_v30 = vld [vmem:[#allocation5 + $0xd0] ss:$8 sps:$4 sm:$0xff]   ;;  %v5748_v32 = vld [vmem:[#allocation5 + $0xe4] ss:$8 sps:$4 sm:$0xff]   ;;  %v5749_v33 = vld [vmem:[#allocation5 + $0xe0] ss:$8 sps:$4 sm:$0xff]  }
 0x4b8   :  { %5111 = vmatpush3.bf16.msra.mxu0 %v5659_v24  ;;  %5163 = vmatpush3.bf16.msra.mxu1 %v5669_v19  ;;  %v5745_v24 = vld [vmem:[#allocation5 + $0xc0] ss:$8 sps:$4 sm:$0xff]  }
 0x4b9   :  { %5112 = vmatprep.subr.bf16.mxu0 %v5660_v28  ;;  %5164 = vmatprep.subr.bf16.mxu1 %v5670_v26 }
 0x4bc   :  { %5113 = vmatpush3.bf16.msra.mxu0 %v5660_v28  ;;  %5165 = vmatpush3.bf16.msra.mxu1 %v5670_v26  ;;  %v5746_v28 = vld [vmem:[#allocation5 + $0xd4] ss:$8 sps:$4 sm:$0xff]  }
 0x4bd   :  { %5114 = vmatprep.subr.bf16.mxu0 %v5661_v35  ;;  %5166 = vmatprep.subr.bf16.mxu1 %v5671_v27 }
 0x4be   :  { %1968 = vmatmul.mubr.bf16.gmra.mrb[136].mxu0 %v5714_v37  ;;  %2193 = vmatmul.mubr.bf16.gmra.mrb[168].mxu1 %v6665_v39 }
 0x4bf   :  { %1975 = vmatprep.mubr.bf16.mxu0 %v5716_v40  ;;  %2200 = vmatprep.mubr.bf16.mxu1 %v6668_v23 }
 0x4c0   :  { %5115 = vmatpush3.bf16.msra.mxu0 %v5661_v35  ;;  %5167 = vmatpush3.bf16.msra.mxu1 %v5671_v27  ;;  %v5750_v35 = vld [vmem:[#allocation5 + $0xf4] ss:$8 sps:$4 sm:$0xff]  }
 0x4c1   :  { %5116 = vmatprep.subr.bf16.mxu0 %v5662_v36  ;;  %5168 = vmatprep.subr.bf16.mxu1 %v5672_v29 }
 0x4c4   :  { %5117 = vmatpush3.bf16.msra.mxu0 %v5662_v36  ;;  %5169 = vmatpush3.bf16.msra.mxu1 %v5672_v29  ;;  %v5751_v36 = vld [vmem:[#allocation5 + $0xf0] ss:$8 sps:$4 sm:$0xff]  }
 0x4c5   :  { %5118 = vmatprep.subr.bf16.mxu0 %v5663_v41 }
 0x4c6   :  { %1976 = vmatmul.mubr.bf16.gmra.mrb[140].mxu0 %v5718_v47  ;;  %2201 = vmatmul.mubr.bf16.gmra.mrb[172].mxu1 %v6671_v48 }
 0x4c7   :  { %1983 = vmatprep.mubr.bf16.mxu0 %v5720_v50  ;;  %2208 = vmatprep.mubr.bf16.mxu1 %v6674_v51 }
 0x4c8   :  { %5119 = vmatpush3.bf16.msra.mxu0 %v5663_v41 }
 0x4c9   :  { %5120 = vmatprep.subr.bf16.mxu0 %v5664_v46 }
 0x4cc   :  { %5121 = vmatpush3.bf16.msra.mxu0 %v5664_v46 }
 0x4ce   :  { %1984 = vmatmul.mubr.bf16.gmra.mrb[144].mxu0 %v5722_v52  ;;  %2209 = vmatmul.mubr.bf16.gmra.mrb[176].mxu1 %v6677_v53 }
 0x4cf   :  { %1991 = vmatprep.mubr.bf16.mxu0 %v5724_v54  ;;  %2216 = vmatprep.mubr.bf16.mxu1 %v6680_v55 }
 0x4d6   :  { %1992 = vmatmul.mubr.bf16.gmra.mrb[148].mxu0 %v5726_v56  ;;  %2217 = vmatmul.mubr.bf16.gmra.mrb[180].mxu1 %v6683_v57 }
 0x4d7   :  { %1999 = vmatprep.mubr.bf16.mxu0 %v5728_v58  ;;  %2224 = vmatprep.mubr.bf16.mxu1 %v6686_v59 }
 0x4de   :  { %2000 = vmatmul.mubr.bf16.gmra.mrb[152].mxu0 %v5730_v60  ;;  %2225 = vmatmul.mubr.bf16.gmra.mrb[184].mxu1 %v6689_v62 }
 0x4df   :  { %2007 = vmatprep.mubr.bf16.mxu0 %v5732_v63  ;;  %2232 = vmatprep.mubr.bf16.mxu1 %v6692_v4 }
 0x4e6   :  { %2008 = vmatmul.mubr.bf16.gmra.mrb[156].mxu0 %v5734_v5  ;;  %2233 = vmatmul.mubr.bf16.gmra.mrb[188].mxu1 %v5735_v6 }
 0x4e7   :  { %2015 = vmatprep.mubr.bf16.mxu0 %v5736_v9 }
 0x4ee   :  { %2016 = vmatmul.mubr.bf16.gmra.mrb[160].mxu0 %v5737_v12 }
 0x4ef   :  { %2023 = vmatprep.mubr.bf16.mxu0 %v5738_v14 }
 0x4f6   :  { %2024 = vmatmul.mubr.bf16.gmra.mrb[164].mxu0 %v5739_v16 }
 0x4f7   :  { %2031 = vmatprep.mubr.bf16.mxu0 %v5740_v17 }
 0x4fe   :  { %2032 = vmatmul.mubr.bf16.gmra.mrb[168].mxu0 %v5741_v13 }
 0x4ff   :  { %2039 = vmatprep.mubr.bf16.mxu0 %v5742_v18 }
 0x506   :  { %2040 = vmatmul.mubr.bf16.gmra.mrb[172].mxu0 %v5743_v20 }
 0x507   :  { %2047 = vmatprep.mubr.bf16.mxu0 %v5744_v34 }
 0x50e   :  { %2048 = vmatmul.mubr.bf16.gmra.mrb[176].mxu0 %v5745_v24 }
 0x50f   :  { %2055 = vmatprep.mubr.bf16.mxu0 %v5746_v28 }
 0x516   :  { %2056 = vmatmul.mubr.bf16.gmra.mrb[180].mxu0 %v5747_v30 }
 0x517   :  { %2063 = vmatprep.mubr.bf16.mxu0 %v5748_v32 }
 0x51e   :  { %2064 = vmatmul.mubr.bf16.gmra.mrb[184].mxu0 %v5749_v33 }
 0x51f   :  { %2071 = vmatprep.mubr.bf16.mxu0 %v5750_v35 }
 0x526   :  { %2072 = vmatmul.mubr.bf16.gmra.mrb[188].mxu0 %v5751_v36 }
 0x527   :  { %5122 = vmatprep.mubr.bf16.mxu0 %v6527_v44 }
 0x52e   :  { %5123 = vmatmul.mubr.bf16.vlgmr.msra.gmra.mrb[192].mxu0 %v6532_v61 }
 0x52f   :  { %5126 = vmatprep.mubr.bf16.mxu0 %v6537_v11 }
 0x536   :  { %5127 = vmatmul.mubr.bf16.gmra.mrb[196].mxu0 %v6542_v42 }
 0x537   :  { %5130 = vmatprep.mubr.bf16.mxu0 %v6547_v1 }
 0x53e   :  { %5131 = vmatmul.mubr.bf16.gmra.mrb[200].mxu0 %v6552_v22 }
 0x53f   :  { %5134 = vmatprep.mubr.bf16.mxu0 %v6557_v43 }
 0x541   :  { %v4490_v37 = vpop.f32.mrb[128].mxu1 }
 0x542   :  { %v4491_v40 = vpop.f32.mrb[129].mxu1 }
 0x543   :  { %v6702_v41 = vadd.f32 %v4491_v40, %v4490_v37  ;;  %v4493_v46 = vpop.f32.mrb[130].mxu1 }
 0x544   :  { %v4494_v47 = vpop.f32.mrb[131].mxu1 }
 0x545   :  { %v6704_v50 = vadd.f32 %v4494_v47, %v4493_v46  ;;  %v6748_v47 = vld [vmem:[%s7284_s10] ss:$0 sm:$0xff] }
 0x546   :  { %5135 = vmatmul.mubr.bf16.gmra.mrb[204].mxu0 %v6562_v0 }
 0x547   :  { %5138 = vmatprep.mubr.bf16.mxu0 %v6567_v21 }
 0x549   :  { %v4496_v44 = vpop.f32.mrb[132].mxu1 }
 0x54a   :  { %v4497_v61 = vpop.f32.mrb[133].mxu1 }
 0x54b   :  { %v6708_v11 = vadd.f32 %v4497_v61, %v4496_v44  ;;  %v4499_v42 = vpop.f32.mrb[134].mxu1 }
 0x54c   :  { %v4500_v1 = vpop.f32.mrb[135].mxu1 }
 0x54d   :  { %v6710_v22 = vadd.f32 %v4500_v1, %v4499_v42 }
 0x54e   :  { %5139 = vmatmul.mubr.bf16.gmra.mrb[208].mxu0 %v6572_v45 }
 0x54f   :  { %5142 = vmatprep.mubr.bf16.mxu0 %v6577_v3 }
 0x551   :  { %v4502_v43 = vpop.f32.mrb[136].mxu1 }
 0x552   :  { %v4503_v52 = vpop.f32.mrb[137].mxu1 }
 0x553   :  { %v6714_v54 = vadd.f32 %v4503_v52, %v4502_v43  ;;  %v4505_v56 = vpop.f32.mrb[138].mxu1 }
 0x554   :  { %v4506_v0 = vpop.f32.mrb[139].mxu1 }
 0x555   :  { %v6716_v58 = vadd.f32 %v4506_v0, %v4505_v56 }
 0x556   :  { %5143 = vmatmul.mubr.bf16.gmra.mrb[212].mxu0 %v6582_v25 }
 0x557   :  { %5146 = vmatprep.mubr.bf16.mxu0 %v6587_v49  ;;  %v5752_v49 = vld [vmem:[#allocation5 + $0x4] ss:$8 sps:$4 sm:$0xff]  }
 0x559   :  { %v4508_v21 = vpop.f32.mrb[140].mxu1 }
 0x55a   :  { %v4509_v60 = vpop.f32.mrb[141].mxu1 }
 0x55b   :  { %v6720_v63 = vadd.f32 %v4509_v60, %v4508_v21  ;;  %v4511_v5 = vpop.f32.mrb[142].mxu1 }
 0x55c   :  { %v4512_v45 = vpop.f32.mrb[143].mxu1 }
 0x55d   :  { %v6722_v6 = vadd.f32 %v4512_v45, %v4511_v5 }
 0x55e   :  { %5147 = vmatmul.mubr.bf16.gmra.mrb[216].mxu0 %v6592_v8 }
 0x55f   :  { %5150 = vmatprep.mubr.bf16.mxu0 %v6597_v31 }
 0x561   :  { %v4514_v3 = vpop.f32.mrb[144].mxu1 }
 0x562   :  { %v4515_v7 = vpop.f32.mrb[145].mxu1 }
 0x563   :  { %v6726_v2 = vadd.f32 %v4515_v7, %v4514_v3  ;;  %v4517_v9 = vpop.f32.mrb[146].mxu1 }
 0x564   :  { %v4518_v25 = vpop.f32.mrb[147].mxu1 }
 0x565   :  { %v6728_v10 = vadd.f32 %v4518_v25, %v4517_v9 }
 0x566   :  { %5151 = vmatmul.mubr.bf16.gmra.mrb[220].mxu0 %v6602_v38 }
 0x567   :  { %2842 = vmatprep.mubr.bf16.mxu0 %v5752_v49 }
 0x569   :  { %v4520_v12 = vpop.f32.mrb[148].mxu1 }
 0x56a   :  { %v4521_v15 = vpop.f32.mrb[149].mxu1 }
 0x56b   :  { %v6731_v14 = vadd.f32 %v4521_v15, %v4520_v12  ;;  %v4523_v16 = vpop.f32.mrb[150].mxu1 }
 0x56c   :  { %v4524_v8 = vpop.f32.mrb[151].mxu1 }
 0x56d   :  { %v6733_v17 = vadd.f32 %v4524_v8, %v4523_v16 }
 0x571   :  { %v4526_v31 = vpop.f32.mrb[152].mxu1 }
 0x572   :  { %v4527_v13 = vpop.f32.mrb[153].mxu1 }
 0x573   :  { %v6735_v18 = vadd.f32 %v4527_v13, %v4526_v31  ;;  %v4529_v19 = vpop.f32.mrb[154].mxu1 }
 0x574   :  { %v4530_v20 = vpop.f32.mrb[155].mxu1 }
 0x575   :  { %v6737_v34 = vadd.f32 %v4530_v20, %v4529_v19 }
 0x579   :  { %v4532_v26 = vpop.f32.mrb[156].mxu1 }
 0x57a   :  { %v4533_v38 = vpop.f32.mrb[157].mxu1 }
 0x57b   :  { %v6739_v27 = vadd.f32 %v4533_v38, %v4532_v26  ;;  %v4535_v24 = vpop.f32.mrb[158].mxu1 }
 0x57c   :  { %v4536_v28 = vpop.f32.mrb[159].mxu1 }
 0x57d   :  { %v6741_v29 = vadd.f32 %v4536_v28, %v4535_v24 }
 0x581   :  { %v4378_v30 = vpop.f32.mrb[128].mxu0  ;;  %v4538_v32 = vpop.f32.mrb[160].mxu1 }
 0x582   :  { %v4379_v33 = vpop.f32.mrb[129].mxu0  ;;  %v4539_v35 = vpop.f32.mrb[161].mxu1 }
 0x583   :  { %v4380_v36 = vadd.f32 %v4379_v33, %v4378_v30  ;;  %v4381_v37 = vpop.f32.mrb[130].mxu0  ;;  %v6743_v40 = vadd.f32 %v4539_v35, %v4538_v32  ;;  %v4541_v46 = vpop.f32.mrb[162].mxu1 }
 0x584   :  { %v4382_v44 = vpop.f32.mrb[131].mxu0  ;;  %v4542_v61 = vpop.f32.mrb[163].mxu1 }
 0x585   :  { %v2115_v42 = vadd.f32 %v6702_v41, %v4380_v36  ;;  %v4383_v1 = vadd.f32 %v4382_v44, %v4381_v37  ;;  %v6751_v43 = vadd.f32 %v4542_v61, %v4541_v46 }
 0x587   :  { %v2247_v52 = vadd.f32 %v6748_v47, %v2115_v42  ;;  %v2118_v56 = vadd.f32 %v6704_v50, %v4383_v1 }
 0x589   :  { %v2248_v0 = vadd.f32 %v6748_v47, %v2118_v56  ;;  %v4384_v21 = vpop.f32.mrb[132].mxu0  ;;  %v4544_v60 = vpop.f32.mrb[164].mxu1  ;;  %v2279_v3 = vmax.f32 %v2247_v52, 0.0 }
 0x58a   :  { %v4385_v5 = vpop.f32.mrb[133].mxu0  ;;  %v4545_v45 = vpop.f32.mrb[165].mxu1 }
 0x58b   :  { %v2280_v7 = vmax.f32 %v2248_v0, 0.0  ;;  %v4386_v9 = vadd.f32 %v4385_v5, %v4384_v21  ;;  %v4387_v25 = vpop.f32.mrb[134].mxu0  ;;  %v6756_v49 = vadd.f32 %v4545_v45, %v4544_v60  ;;  %v4547_v41 = vpop.f32.mrb[166].mxu1 }
 0x58c   :  { %v4388_v12 = vpop.f32.mrb[135].mxu0  ;;  %v4548_v15 = vpop.f32.mrb[167].mxu1 }
 0x58d   :  { %v2123_v16 = vadd.f32 %v6708_v11, %v4386_v9  ;;  %v4389_v8 = vadd.f32 %v4388_v12, %v4387_v25  ;;  %v2311_v31 = vpack.c.bf16 %v2280_v7, %v2279_v3  ;;  %v6759_v50 = vadd.f32 %v4548_v15, %v4547_v41 }
 0x58f   :  { %v2249_v13 = vadd.f32 %v6748_v47, %v2123_v16  ;;  %v2126_v19 = vadd.f32 %v6710_v22, %v4389_v8  ;;  %5170 = vmatprep.mubr.bf16.mxu1 %v2311_v31 }
 0x591   :  { %v2250_v20 = vadd.f32 %v6748_v47, %v2126_v19  ;;  %v4390_v26 = vpop.f32.mrb[136].mxu0  ;;  %v4550_v38 = vpop.f32.mrb[168].mxu1  ;;  %v2281_v30 = vmax.f32 %v2249_v13, 0.0 }
 0x592   :  { %v4391_v24 = vpop.f32.mrb[137].mxu0  ;;  %v4551_v28 = vpop.f32.mrb[169].mxu1 }
 0x593   :  { %v2282_v32 = vmax.f32 %v2250_v20, 0.0  ;;  %v4392_v33 = vadd.f32 %v4391_v24, %v4390_v26  ;;  %v4393_v35 = vpop.f32.mrb[138].mxu0  ;;  %v6764_v11 = vadd.f32 %v4551_v28, %v4550_v38  ;;  %v4553_v36 = vpop.f32.mrb[170].mxu1 }
 0x594   :  { %v4394_v37 = vpop.f32.mrb[139].mxu0  ;;  %v4554_v46 = vpop.f32.mrb[171].mxu1 }
 0x595   :  { %v2312_v44 = vpack.c.bf16 %v2282_v32, %v2281_v30  ;;  %v2131_v61 = vadd.f32 %v6714_v54, %v4392_v33  ;;  %v4395_v22 = vadd.f32 %v4394_v37, %v4393_v35  ;;  %v6767_v42 = vadd.f32 %v4554_v46, %v4553_v36 }
 0x597   :  { %v2251_v1 = vadd.f32 %v6748_v47, %v2131_v61  ;;  %v2134_v52 = vadd.f32 %v6716_v58, %v4395_v22  ;;  %5171 = vmatmul.mubr.bf16.vlgmr.msra.gmra.mrb[192].mxu1 %v2312_v44 }
 0x599   :  { %v2252_v56 = vadd.f32 %v6748_v47, %v2134_v52  ;;  %v4396_v0 = vpop.f32.mrb[140].mxu0  ;;  %v4556_v21 = vpop.f32.mrb[172].mxu1  ;;  %v2283_v45 = vmax.f32 %v2251_v1, 0.0 }
 0x59a   :  { %v4397_v60 = vpop.f32.mrb[141].mxu0  ;;  %v4557_v5 = vpop.f32.mrb[173].mxu1 }
 0x59b   :  { %v2284_v3 = vmax.f32 %v2252_v56, 0.0  ;;  %v4398_v7 = vadd.f32 %v4397_v60, %v4396_v0  ;;  %v4399_v9 = vpop.f32.mrb[142].mxu0  ;;  %v6772_v25 = vadd.f32 %v4557_v5, %v4556_v21  ;;  %v4559_v54 = vpop.f32.mrb[174].mxu1 }
 0x59c   :  { %v4400_v41 = vpop.f32.mrb[143].mxu0  ;;  %v4560_v12 = vpop.f32.mrb[175].mxu1 }
 0x59d   :  { %v2139_v15 = vadd.f32 %v6720_v63, %v4398_v7  ;;  %v4401_v16 = vadd.f32 %v4400_v41, %v4399_v9  ;;  %v2313_v58 = vpack.c.bf16 %v2284_v3, %v2283_v45  ;;  %v6775_v8 = vadd.f32 %v4560_v12, %v4559_v54 }
 0x59f   :  { %v2253_v31 = vadd.f32 %v6748_v47, %v2139_v15  ;;  %v2142_v13 = vadd.f32 %v6722_v6, %v4401_v16  ;;  %5174 = vmatprep.mubr.bf16.mxu1 %v2313_v58 }
 0x5a1   :  { %v2254_v19 = vadd.f32 %v6748_v47, %v2142_v13  ;;  %v4402_v20 = vpop.f32.mrb[144].mxu0  ;;  %v4562_v26 = vpop.f32.mrb[176].mxu1  ;;  %v2285_v28 = vmax.f32 %v2253_v31, 0.0 }
 0x5a2   :  { %v4403_v38 = vpop.f32.mrb[145].mxu0  ;;  %v4563_v24 = vpop.f32.mrb[177].mxu1 }
 0x5a3   :  { %v2286_v30 = vmax.f32 %v2254_v19, 0.0  ;;  %v4404_v32 = vadd.f32 %v4403_v38, %v4402_v20  ;;  %v4405_v33 = vpop.f32.mrb[146].mxu0  ;;  %v6780_v63 = vadd.f32 %v4563_v24, %v4562_v26  ;;  %v4565_v35 = vpop.f32.mrb[178].mxu1 }
 0x5a4   :  { %v4406_v36 = vpop.f32.mrb[147].mxu0  ;;  %v4566_v37 = vpop.f32.mrb[179].mxu1 }
 0x5a5   :  { %v2147_v46 = vadd.f32 %v6726_v2, %v4404_v32  ;;  %v4407_v44 = vadd.f32 %v4406_v36, %v4405_v33  ;;  %v2314_v6 = vpack.c.bf16 %v2286_v30, %v2285_v28  ;;  %v6783_v61 = vadd.f32 %v4566_v37, %v4565_v35 }
 0x5a7   :  { %v2255_v22 = vadd.f32 %v6748_v47, %v2147_v46  ;;  %v2150_v1 = vadd.f32 %v6728_v10, %v4407_v44  ;;  %5175 = vmatmul.mubr.bf16.gmra.mrb[196].mxu1 %v2314_v6 }
 0x5a9   :  { %v2256_v52 = vadd.f32 %v6748_v47, %v2150_v1  ;;  %v4408_v56 = vpop.f32.mrb[148].mxu0  ;;  %v4568_v0 = vpop.f32.mrb[180].mxu1  ;;  %v2287_v5 = vmax.f32 %v2255_v22, 0.0 }
 0x5aa   :  { %v4409_v21 = vpop.f32.mrb[149].mxu0  ;;  %v4569_v60 = vpop.f32.mrb[181].mxu1 }
 0x5ab   :  { %v2288_v45 = vmax.f32 %v2256_v52, 0.0  ;;  %v4410_v3 = vadd.f32 %v4409_v21, %v4408_v56  ;;  %v4411_v7 = vpop.f32.mrb[150].mxu0  ;;  %v6788_v2 = vadd.f32 %v4569_v60, %v4568_v0  ;;  %v4571_v9 = vpop.f32.mrb[182].mxu1 }
 0x5ac   :  { %v4412_v54 = vpop.f32.mrb[151].mxu0  ;;  %v4572_v41 = vpop.f32.mrb[183].mxu1 }
 0x5ad   :  { %v2155_v12 = vadd.f32 %v6731_v14, %v4410_v3  ;;  %v4413_v15 = vadd.f32 %v4412_v54, %v4411_v7  ;;  %v2315_v10 = vpack.c.bf16 %v2288_v45, %v2287_v5  ;;  %v6791_v16 = vadd.f32 %v4572_v41, %v4571_v9 }
 0x5af   :  { %v2257_v58 = vadd.f32 %v6748_v47, %v2155_v12  ;;  %v2158_v31 = vadd.f32 %v6733_v17, %v4413_v15  ;;  %5178 = vmatprep.mubr.bf16.mxu1 %v2315_v10 }
 0x5b1   :  { %v2258_v13 = vadd.f32 %v6748_v47, %v2158_v31  ;;  %v4414_v19 = vpop.f32.mrb[152].mxu0  ;;  %v4574_v20 = vpop.f32.mrb[184].mxu1  ;;  %v2289_v24 = vmax.f32 %v2257_v58, 0.0 }
 0x5b2   :  { %v4415_v26 = vpop.f32.mrb[153].mxu0  ;;  %v4575_v38 = vpop.f32.mrb[185].mxu1 }
 0x5b3   :  { %v2290_v28 = vmax.f32 %v2258_v13, 0.0  ;;  %v4416_v30 = vadd.f32 %v4415_v26, %v4414_v19  ;;  %v4417_v32 = vpop.f32.mrb[154].mxu0  ;;  %v6796_v14 = vadd.f32 %v4575_v38, %v4574_v20  ;;  %v4577_v33 = vpop.f32.mrb[186].mxu1 }
 0x5b4   :  { %v4418_v35 = vpop.f32.mrb[155].mxu0  ;;  %v4578_v36 = vpop.f32.mrb[187].mxu1 }
 0x5b5   :  { %v2163_v37 = vadd.f32 %v6735_v18, %v4416_v30  ;;  %v4419_v46 = vadd.f32 %v4418_v35, %v4417_v32  ;;  %v2316_v17 = vpack.c.bf16 %v2290_v28, %v2289_v24  ;;  %v6799_v44 = vadd.f32 %v4578_v36, %v4577_v33 }
 0x5b7   :  { %v2259_v6 = vadd.f32 %v6748_v47, %v2163_v37  ;;  %v2166_v22 = vadd.f32 %v6737_v34, %v4419_v46  ;;  %5179 = vmatmul.mubr.bf16.gmra.mrb[200].mxu1 %v2316_v17 }
 0x5b9   :  { %v2260_v1 = vadd.f32 %v6748_v47, %v2166_v22  ;;  %v4420_v52 = vpop.f32.mrb[156].mxu0  ;;  %v4580_v56 = vpop.f32.mrb[188].mxu1  ;;  %v2291_v60 = vmax.f32 %v2259_v6, 0.0 }
 0x5ba   :  { %v4421_v0 = vpop.f32.mrb[157].mxu0  ;;  %v4581_v21 = vpop.f32.mrb[189].mxu1 }
 0x5bb   :  { %v2292_v5 = vmax.f32 %v2260_v1, 0.0  ;;  %v4422_v45 = vadd.f32 %v4421_v0, %v4420_v52  ;;  %v4423_v3 = vpop.f32.mrb[158].mxu0  ;;  %v6804_v18 = vadd.f32 %v4581_v21, %v4580_v56  ;;  %v4583_v7 = vpop.f32.mrb[190].mxu1 }
 0x5bc   :  { %v4424_v9 = vpop.f32.mrb[159].mxu0  ;;  %v4584_v54 = vpop.f32.mrb[191].mxu1 }
 0x5bd   :  { %v2171_v41 = vadd.f32 %v6739_v27, %v4422_v45  ;;  %v4425_v12 = vadd.f32 %v4424_v9, %v4423_v3  ;;  %v2317_v34 = vpack.c.bf16 %v2292_v5, %v2291_v60  ;;  %v6807_v15 = vadd.f32 %v4584_v54, %v4583_v7 }
 0x5bf   :  { %v2261_v10 = vadd.f32 %v6748_v47, %v2171_v41  ;;  %v2174_v58 = vadd.f32 %v6741_v29, %v4425_v12  ;;  %5182 = vmatprep.mubr.bf16.mxu1 %v2317_v34 }
 0x5c1   :  { %v2262_v31 = vadd.f32 %v6748_v47, %v2174_v58  ;;  %v4426_v13 = vpop.f32.mrb[160].mxu0  ;;  %v2293_v20 = vmax.f32 %v2261_v10, 0.0 }
 0x5c2   :  { %v4427_v19 = vpop.f32.mrb[161].mxu0 }
 0x5c3   :  { %v2294_v26 = vmax.f32 %v2262_v31, 0.0  ;;  %v4428_v38 = vadd.f32 %v4427_v19, %v4426_v13  ;;  %v4429_v24 = vpop.f32.mrb[162].mxu0 }
 0x5c4   :  { %v4430_v28 = vpop.f32.mrb[163].mxu0 }
 0x5c5   :  { %v2179_v27 = vadd.f32 %v6743_v40, %v4428_v38  ;;  %v4431_v30 = vadd.f32 %v4430_v28, %v4429_v24  ;;  %v2318_v32 = vpack.c.bf16 %v2294_v26, %v2293_v20 }
 0x5c7   :  { %v2263_v33 = vadd.f32 %v6748_v47, %v2179_v27  ;;  %v2182_v35 = vadd.f32 %v6751_v43, %v4431_v30  ;;  %5183 = vmatmul.mubr.bf16.gmra.mrb[204].mxu1 %v2318_v32 }
 0x5c9   :  { %v2264_v29 = vadd.f32 %v6748_v47, %v2182_v35  ;;  %v4432_v36 = vpop.f32.mrb[164].mxu0  ;;  %v2295_v46 = vmax.f32 %v2263_v33, 0.0 }
 0x5ca   :  { %v4433_v37 = vpop.f32.mrb[165].mxu0 }
 0x5cb   :  { %v2296_v17 = vmax.f32 %v2264_v29, 0.0  ;;  %v4434_v6 = vadd.f32 %v4433_v37, %v4432_v36  ;;  %v4435_v22 = vpop.f32.mrb[166].mxu0 }
 0x5cc   :  { %v4436_v1 = vpop.f32.mrb[167].mxu0 }
 0x5cd   :  { %v2187_v52 = vadd.f32 %v6756_v49, %v4434_v6  ;;  %v4437_v56 = vadd.f32 %v4436_v1, %v4435_v22  ;;  %v2319_v40 = vpack.c.bf16 %v2296_v17, %v2295_v46 }
 0x5cf   :  { %v2265_v0 = vadd.f32 %v6748_v47, %v2187_v52  ;;  %v2190_v21 = vadd.f32 %v6759_v50, %v4437_v56  ;;  %5186 = vmatprep.mubr.bf16.mxu1 %v2319_v40 }
 0x5d1   :  { %v2266_v43 = vadd.f32 %v6748_v47, %v2190_v21  ;;  %v4438_v60 = vpop.f32.mrb[168].mxu0  ;;  %v2297_v45 = vmax.f32 %v2265_v0, 0.0 }
 0x5d2   :  { %v4439_v5 = vpop.f32.mrb[169].mxu0 }
 0x5d3   :  { %v2298_v3 = vmax.f32 %v2266_v43, 0.0  ;;  %v4440_v7 = vadd.f32 %v4439_v5, %v4438_v60  ;;  %v4441_v9 = vpop.f32.mrb[170].mxu0 }
 0x5d4   :  { %v4442_v54 = vpop.f32.mrb[171].mxu0 }
 0x5d5   :  { %v2195_v41 = vadd.f32 %v6764_v11, %v4440_v7  ;;  %v2320_v12 = vpack.c.bf16 %v2298_v3, %v2297_v45  ;;  %v4443_v49 = vadd.f32 %v4442_v54, %v4441_v9 }
 0x5d7   :  { %v2267_v34 = vadd.f32 %v6748_v47, %v2195_v41  ;;  %5187 = vmatmul.mubr.bf16.gmra.mrb[208].mxu1 %v2320_v12  ;;  %v2198_v10 = vadd.f32 %v6767_v42, %v4443_v49 }
 0x5d9   :  { %v2268_v50 = vadd.f32 %v6748_v47, %v2198_v10  ;;  %v4444_v58 = vpop.f32.mrb[172].mxu0  ;;  %v2299_v13 = vmax.f32 %v2267_v34, 0.0 }
 0x5da   :  { %v4445_v31 = vpop.f32.mrb[173].mxu0 }
 0x5db   :  { %v2300_v19 = vmax.f32 %v2268_v50, 0.0  ;;  %v4446_v20 = vadd.f32 %v4445_v31, %v4444_v58  ;;  %v4447_v26 = vpop.f32.mrb[174].mxu0 }
 0x5dc   :  { %v4448_v38 = vpop.f32.mrb[175].mxu0 }
 0x5dd   :  { %v2203_v24 = vadd.f32 %v6772_v25, %v4446_v20  ;;  %v4449_v28 = vadd.f32 %v4448_v38, %v4447_v26  ;;  %v2321_v11 = vpack.c.bf16 %v2300_v19, %v2299_v13 }
 0x5df   :  { %v2269_v27 = vadd.f32 %v6748_v47, %v2203_v24  ;;  %v2206_v30 = vadd.f32 %v6775_v8, %v4449_v28  ;;  %5190 = vmatprep.mubr.bf16.mxu1 %v2321_v11 }
 0x5e1   :  { %v2270_v42 = vadd.f32 %v6748_v47, %v2206_v30  ;;  %v4450_v32 = vpop.f32.mrb[176].mxu0  ;;  %v2301_v35 = vmax.f32 %v2269_v27, 0.0 }
 0x5e2   :  { %v4451_v33 = vpop.f32.mrb[177].mxu0 }
 0x5e3   :  { %v2302_v29 = vmax.f32 %v2270_v42, 0.0  ;;  %v4452_v36 = vadd.f32 %v4451_v33, %v4450_v32  ;;  %v4453_v37 = vpop.f32.mrb[178].mxu0 }
 0x5e4   :  { %v4454_v46 = vpop.f32.mrb[179].mxu0 }
 0x5e5   :  { %v2211_v17 = vadd.f32 %v6780_v63, %v4452_v36  ;;  %v2322_v6 = vpack.c.bf16 %v2302_v29, %v2301_v35  ;;  %v4455_v25 = vadd.f32 %v4454_v46, %v4453_v37 }
 0x5e7   :  { %v2271_v22 = vadd.f32 %v6748_v47, %v2211_v17  ;;  %5191 = vmatmul.mubr.bf16.gmra.mrb[212].mxu1 %v2322_v6  ;;  %v2214_v1 = vadd.f32 %v6783_v61, %v4455_v25 }
 0x5e9   :  { %v2272_v8 = vadd.f32 %v6748_v47, %v2214_v1  ;;  %v4456_v52 = vpop.f32.mrb[180].mxu0  ;;  %v2303_v40 = vmax.f32 %v2271_v22, 0.0 }
 0x5ea   :  { %v4457_v56 = vpop.f32.mrb[181].mxu0 }
 0x5eb   :  { %v2304_v0 = vmax.f32 %v2272_v8, 0.0  ;;  %v4458_v21 = vadd.f32 %v4457_v56, %v4456_v52  ;;  %v4459_v43 = vpop.f32.mrb[182].mxu0 }
 0x5ec   :  { %v4460_v60 = vpop.f32.mrb[183].mxu0 }
 0x5ed   :  { %v2219_v5 = vadd.f32 %v6788_v2, %v4458_v21  ;;  %v4461_v45 = vadd.f32 %v4460_v60, %v4459_v43  ;;  %v2323_v63 = vpack.c.bf16 %v2304_v0, %v2303_v40 }
 0x5ef   :  { %v2273_v3 = vadd.f32 %v6748_v47, %v2219_v5  ;;  %v2222_v7 = vadd.f32 %v6791_v16, %v4461_v45  ;;  %5194 = vmatprep.mubr.bf16.mxu1 %v2323_v63 }
 0x5f1   :  { %v2274_v61 = vadd.f32 %v6748_v47, %v2222_v7  ;;  %v4462_v9 = vpop.f32.mrb[184].mxu0  ;;  %v2305_v41 = vmax.f32 %v2273_v3, 0.0 }
 0x5f2   :  { %v4463_v54 = vpop.f32.mrb[185].mxu0 }
 0x5f3   :  { %v2306_v12 = vmax.f32 %v2274_v61, 0.0  ;;  %v4464_v49 = vadd.f32 %v4463_v54, %v4462_v9  ;;  %v4465_v34 = vpop.f32.mrb[186].mxu0 }
 0x5f4   :  { %v4466_v10 = vpop.f32.mrb[187].mxu0 }
 0x5f5   :  { %v2227_v50 = vadd.f32 %v6796_v14, %v4464_v49  ;;  %v2324_v58 = vpack.c.bf16 %v2306_v12, %v2305_v41  ;;  %v4467_v2 = vadd.f32 %v4466_v10, %v4465_v34 }
 0x5f7   :  { %v2275_v31 = vadd.f32 %v6748_v47, %v2227_v50  ;;  %5195 = vmatmul.mubr.bf16.gmra.mrb[216].mxu1 %v2324_v58  ;;  %v2230_v13 = vadd.f32 %v6799_v44, %v4467_v2 }
 0x5f9   :  { %v2276_v16 = vadd.f32 %v6748_v47, %v2230_v13  ;;  %v4468_v19 = vpop.f32.mrb[188].mxu0  ;;  %v2307_v26 = vmax.f32 %v2275_v31, 0.0 }
 0x5fa   :  { %v4469_v20 = vpop.f32.mrb[189].mxu0 }
 0x5fb   :  { %v2308_v38 = vmax.f32 %v2276_v16, 0.0  ;;  %v4470_v24 = vadd.f32 %v4469_v20, %v4468_v19  ;;  %v4471_v28 = vpop.f32.mrb[190].mxu0 }
 0x5fc   :  { %v4472_v11 = vpop.f32.mrb[191].mxu0 }
 0x5fd   :  { %v2235_v27 = vadd.f32 %v6804_v18, %v4470_v24  ;;  %v4473_v30 = vadd.f32 %v4472_v11, %v4471_v28  ;;  %v2325_v14 = vpack.c.bf16 %v2308_v38, %v2307_v26  ;;  %v5753_v18 = vld [vmem:[#allocation2 + $0x4] ss:$8 sps:$4 sm:$0xff]  }
 0x5ff   :  { %v2277_v42 = vadd.f32 %v6748_v47, %v2235_v27  ;;  %v2238_v32 = vadd.f32 %v6807_v15, %v4473_v30  ;;  %5198 = vmatprep.mubr.bf16.mxu1 %v2325_v14 }
 0x601   :  { %v2278_v44 = vadd.f32 %v6748_v47, %v2238_v32  ;;  %v5124_v33 = vpop.f32.mrb[192].mxu0  ;;  %v2309_v29 = vmax.f32 %v2277_v42, 0.0  ;;  %v5754_v32 = vld [vmem:[#allocation2] ss:$8 sps:$4 sm:$0xff]  }
 0x602   :  { %v2425_v35 = vpop.f32.mrb[193].mxu0 }
 0x603   :  { %v2310_v36 = vmax.f32 %v2278_v44, 0.0  ;;  %v5125_v37 = vpop.f32.mrb[194].mxu0  ;;  %v5755_v44 = vld [vmem:[#allocation2 + $0x14] ss:$8 sps:$4 sm:$0xff]  }
 0x604   :  { %v2553_v46 = vpack.c.bf16 %v5125_v37, %v5124_v33  ;;  %v2428_v17 = vpop.f32.mrb[195].mxu0  ;;  %v5756_v33 = vld [vmem:[#allocation2 + $0x10] ss:$8 sps:$4 sm:$0xff]  }
 0x605   :  { %v2552_v6 = vpack.c.bf16 %v2428_v17, %v2425_v35  ;;  %v2326_v25 = vpack.c.bf16 %v2310_v36, %v2309_v29  ;;  %v5757_v35 = vld [vmem:[#allocation2 + $0x24] ss:$8 sps:$4 sm:$0xff]   ;;  %v5758_v29 = vld [vmem:[#allocation2 + $0x20] ss:$8 sps:$4 sm:$0xff]   ;;  %v5759_v36 = vld [vmem:[#allocation2 + $0x34] ss:$8 sps:$4 sm:$0xff]  }
 0x606   :  { %v5760_v37 = vld [vmem:[#allocation2 + $0x30] ss:$8 sps:$4 sm:$0xff]   ;;  %v5762_v17 = vld [vmem:[#allocation2 + $0x40] ss:$8 sps:$4 sm:$0xff]  }
 0x607   :  { %5199 = vmatmul.mubr.bf16.gmra.mrb[220].mxu1 %v2326_v25 }
 0x608   :  { %3003 = vmatprep.mubr.bf16.mxu1 %v5753_v18 }
 0x609   :  { %v5128_v22 = vpop.f32.mrb[196].mxu0 }
 0x60a   :  { %v2441_v1 = vpop.f32.mrb[197].mxu0 }
 0x60b   :  { %v5129_v8 = vpop.f32.mrb[198].mxu0 }
 0x60c   :  { %v2555_v52 = vpack.c.bf16 %v5129_v8, %v5128_v22  ;;  %v2444_v15 = vpop.f32.mrb[199].mxu0 }
 0x60d   :  { %v2554_v56 = vpack.c.bf16 %v2444_v15, %v2441_v1  ;;  %v5764_v15 = vld [vmem:[#allocation2 + $0x50] ss:$8 sps:$4 sm:$0xff]  }
 0x611   :  { %v5132_v40 = vpop.f32.mrb[200].mxu0 }
 0x612   :  { %v2457_v47 = vpop.f32.mrb[201].mxu0 }
 0x613   :  { %v5133_v0 = vpop.f32.mrb[202].mxu0 }
 0x614   :  { %v2557_v21 = vpack.c.bf16 %v5133_v0, %v5132_v40  ;;  %v2460_v43 = vpop.f32.mrb[203].mxu0  ;;  %v5766_v40 = vld [vmem:[#allocation2 + $0x60] ss:$8 sps:$4 sm:$0xff]  }
 0x615   :  { %v2556_v60 = vpack.c.bf16 %v2460_v43, %v2457_v47  ;;  %v5767_v47 = vld [vmem:[#allocation2 + $0x74] ss:$8 sps:$4 sm:$0xff]  }
 0x619   :  { %v5136_v5 = vpop.f32.mrb[204].mxu0 }
 0x61a   :  { %v2473_v45 = vpop.f32.mrb[205].mxu0 }
 0x61b   :  { %v5137_v63 = vpop.f32.mrb[206].mxu0 }
 0x61c   :  { %v2559_v3 = vpack.c.bf16 %v5137_v63, %v5136_v5  ;;  %v2476_v7 = vpop.f32.mrb[207].mxu0  ;;  %v5768_v63 = vld [vmem:[#allocation2 + $0x70] ss:$8 sps:$4 sm:$0xff]  }
 0x61d   :  { %v2558_v61 = vpack.c.bf16 %v2476_v7, %v2473_v45  ;;  %v5770_v7 = vld [vmem:[#allocation2 + $0x80] ss:$8 sps:$4 sm:$0xff]  }
 0x621   :  { %v5140_v9 = vpop.f32.mrb[208].mxu0 }
 0x622   :  { %v2489_v54 = vpop.f32.mrb[209].mxu0 }
 0x623   :  { %v5141_v41 = vpop.f32.mrb[210].mxu0 }
 0x624   :  { %v2561_v12 = vpack.c.bf16 %v5141_v41, %v5140_v9  ;;  %v2492_v49 = vpop.f32.mrb[211].mxu0 }
 0x625   :  { %v2560_v34 = vpack.c.bf16 %v2492_v49, %v2489_v54 }
 0x627   :  { %4746 = vmatprep.subr.bf16.mxu1 %v2560_v34 }
 0x628   :  { %4747 = vmatpush3.bf16.msra.mxu1 %v2552_v6  ;;  %v5763_v6 = vld [vmem:[#allocation2 + $0x54] ss:$8 sps:$4 sm:$0xff]  }
 0x629   :  { %v5144_v10 = vpop.f32.mrb[212].mxu0  ;;  %4748 = vmatprep.subr.bf16.mxu1 %v2561_v12 }
 0x62a   :  { %v2505_v50 = vpop.f32.mrb[213].mxu0 }
 0x62b   :  { %v5145_v58 = vpop.f32.mrb[214].mxu0 }
 0x62c   :  { %v2563_v2 = vpack.c.bf16 %v5145_v58, %v5144_v10  ;;  %v2508_v31 = vpop.f32.mrb[215].mxu0  ;;  %4749 = vmatpush3.bf16.msra.mxu1 %v2553_v46  ;;  %v5761_v46 = vld [vmem:[#allocation2 + $0x44] ss:$8 sps:$4 sm:$0xff]   ;;  %v5772_v10 = vld [vmem:[#allocation2 + $0x90] ss:$8 sps:$4 sm:$0xff]  }
 0x62d   :  { %v2562_v13 = vpack.c.bf16 %v2508_v31, %v2505_v50  ;;  %v5773_v50 = vld [vmem:[#allocation2 + $0xa4] ss:$8 sps:$4 sm:$0xff]  }
 0x62f   :  { %4750 = vmatprep.subr.bf16.mxu1 %v2562_v13 }
 0x630   :  { %4751 = vmatpush3.bf16.msra.mxu1 %v2554_v56  ;;  %v5765_v56 = vld [vmem:[#allocation2 + $0x64] ss:$8 sps:$4 sm:$0xff]  }
 0x631   :  { %v5148_v16 = vpop.f32.mrb[216].mxu0  ;;  %4752 = vmatprep.subr.bf16.mxu1 %v2563_v2 }
 0x632   :  { %v2521_v19 = vpop.f32.mrb[217].mxu0 }
 0x633   :  { %v5149_v20 = vpop.f32.mrb[218].mxu0 }
 0x634   :  { %v2565_v26 = vpack.c.bf16 %v5149_v20, %v5148_v16  ;;  %v2524_v38 = vpop.f32.mrb[219].mxu0  ;;  %4753 = vmatpush3.bf16.msra.mxu1 %v2555_v52 }
 0x635   :  { %v2564_v24 = vpack.c.bf16 %v2524_v38, %v2521_v19 }
 0x637   :  { %4754 = vmatprep.subr.bf16.mxu1 %v2564_v24 }
 0x638   :  { %4755 = vmatpush3.bf16.msra.mxu1 %v2556_v60 }
 0x639   :  { %v5152_v28 = vpop.f32.mrb[220].mxu0  ;;  %4756 = vmatprep.subr.bf16.mxu1 %v2565_v26 }
 0x63a   :  { %v2537_v11 = vpop.f32.mrb[221].mxu0 }
 0x63b   :  { %v5153_v27 = vpop.f32.mrb[222].mxu0 }
 0x63c   :  { %v2567_v30 = vpack.c.bf16 %v5153_v27, %v5152_v28  ;;  %v2540_v14 = vpop.f32.mrb[223].mxu0  ;;  %4757 = vmatpush3.bf16.msra.mxu1 %v2557_v21  ;;  %v5774_v27 = vld [vmem:[#allocation2 + $0xf0] ss:$8 sps:$4 sm:$0xff]  }
 0x63d   :  { %v2566_v42 = vpack.c.bf16 %v2540_v14, %v2537_v11 }
 0x63f   :  { %4758 = vmatprep.subr.bf16.mxu1 %v2566_v42 }
 0x640   :  { %4759 = vmatpush3.bf16.msra.mxu1 %v2558_v61  ;;  %v5771_v61 = vld [vmem:[#allocation2 + $0x94] ss:$8 sps:$4 sm:$0xff]  }
 0x641   :  { %4760 = vmatprep.subr.bf16.mxu1 %v2567_v30 }
 0x644   :  { %4761 = vmatpush3.bf16.msra.mxu1 %v2559_v3  ;;  %v5769_v3 = vld [vmem:[#allocation2 + $0x84] ss:$8 sps:$4 sm:$0xff]  }
 0x647   :  { %3004 = vmatmul.mubr.bf16.vlgmr.msra.gmra.mrb[224].mxu1 %v5754_v32 }
 0x648   :  { %3011 = vmatprep.mubr.bf16.mxu1 %v5755_v44 }
 0x64f   :  { %3012 = vmatmul.mubr.bf16.gmra.mrb[228].mxu1 %v5756_v33 }
 0x650   :  { %3019 = vmatprep.mubr.bf16.mxu1 %v5757_v35 }
 0x657   :  { %3020 = vmatmul.mubr.bf16.gmra.mrb[232].mxu1 %v5758_v29 }
 0x658   :  { %3027 = vmatprep.mubr.bf16.mxu1 %v5759_v36  ;;  %v3173_v36 = vld [vmem:[%s7277_s3] sm:$0xff] }
 0x659   :  { %3190 = vperm.xlu0 %5503, %v3173_v36  }
 0x65f   :  { %3028 = vmatmul.mubr.bf16.gmra.mrb[236].mxu1 %v5760_v37  ;;  %v5775_v37 = vld [vmem:[#allocation5] ss:$8 sps:$4 sm:$0xff]  }
 0x660   :  { %3035 = vmatprep.mubr.bf16.mxu1 %v5761_v46  ;;  %v5776_v46 = vld [vmem:[#allocation5 + $0x14] ss:$8 sps:$4 sm:$0xff]  }
 0x667   :  { %3036 = vmatmul.mubr.bf16.gmra.mrb[240].mxu1 %v5762_v17  ;;  %v5777_v17 = vld [vmem:[#allocation5 + $0x10] ss:$8 sps:$4 sm:$0xff]  }
 0x668   :  { %3043 = vmatprep.mubr.bf16.mxu1 %v5763_v6  ;;  %v5778_v6 = vld [vmem:[#allocation5 + $0x24] ss:$8 sps:$4 sm:$0xff]  }
 0x66a   :  { %v5172_v25 = vpop.f32.mrb[192].mxu1 }
 0x66b   :  { %v2666_v18 = vpop.f32.mrb[193].mxu1 }
 0x66c   :  { %v5173_v22 = vpop.f32.mrb[194].mxu1 }
 0x66d   :  { %v2794_v1 = vpack.c.bf16 %v5173_v22, %v5172_v25  ;;  %v2669_v8 = vpop.f32.mrb[195].mxu1  ;;  %v5779_v25 = vld [vmem:[#allocation5 + $0x20] ss:$8 sps:$4 sm:$0xff]   ;;  %v5781_v22 = vld [vmem:[#allocation5 + $0x30] ss:$8 sps:$4 sm:$0xff]  }
 0x66e   :  { %v2793_v52 = vpack.c.bf16 %v2669_v8, %v2666_v18  ;;  %v5780_v18 = vld [vmem:[#allocation5 + $0x34] ss:$8 sps:$4 sm:$0xff]   ;;  %v5783_v8 = vld [vmem:[#allocation5 + $0x40] ss:$8 sps:$4 sm:$0xff]  }
 0x66f   :  { %3044 = vmatmul.mubr.bf16.gmra.mrb[244].mxu1 %v5764_v15  ;;  %v5785_v15 = vld [vmem:[#allocation5 + $0x50] ss:$8 sps:$4 sm:$0xff]  }
 0x670   :  { %3051 = vmatprep.mubr.bf16.mxu1 %v5765_v56  ;;  %v5786_v56 = vld [vmem:[#allocation5 + $0x64] ss:$8 sps:$4 sm:$0xff]  }
 0x677   :  { %3052 = vmatmul.mubr.bf16.gmra.mrb[248].mxu1 %v5766_v40  ;;  %v5787_v40 = vld [vmem:[#allocation5 + $0x60] ss:$8 sps:$4 sm:$0xff]  }
 0x678   :  { %3059 = vmatprep.mubr.bf16.mxu1 %v5767_v47  ;;  %v5788_v47 = vld [vmem:[#allocation5 + $0x74] ss:$8 sps:$4 sm:$0xff]  }
 0x67a   :  { %v5176_v0 = vpop.f32.mrb[196].mxu1 }
 0x67b   :  { %v2682_v21 = vpop.f32.mrb[197].mxu1 }
 0x67c   :  { %v5177_v43 = vpop.f32.mrb[198].mxu1 }
 0x67d   :  { %v2796_v60 = vpack.c.bf16 %v5177_v43, %v5176_v0  ;;  %v2685_v5 = vpop.f32.mrb[199].mxu1  ;;  %v5789_v0 = vld [vmem:[#allocation5 + $0x70] ss:$8 sps:$4 sm:$0xff]   ;;  %v5791_v43 = vld [vmem:[#allocation5 + $0x80] ss:$8 sps:$4 sm:$0xff]  }
 0x67e   :  { %v2795_v45 = vpack.c.bf16 %v2685_v5, %v2682_v21  ;;  %v5790_v21 = vld [vmem:[#allocation5 + $0x84] ss:$8 sps:$4 sm:$0xff]   ;;  %v5792_v5 = vld [vmem:[#allocation5 + $0x94] ss:$8 sps:$4 sm:$0xff]  }
 0x67f   :  { %3060 = vmatmul.mubr.bf16.gmra.mrb[252].mxu1 %v5768_v63  ;;  %v3177_v63 = vld [vmem:[%s7277_s3 + $0x20] sm:$0xff] }
 0x680   :  { %3067 = vmatprep.mubr.bf16.mxu1 %v5769_v3  ;;  %v5793_v3 = vld [vmem:[#allocation5 + $0x90] ss:$8 sps:$4 sm:$0xff]  }
 0x687   :  { %3068 = vmatmul.mubr.bf16.gmra.mrb[0].mxu1 %v5770_v7  ;;  %v3176_v7 = vld [vmem:[%s7277_s3 + $0x18] sm:$0xff] }
 0x688   :  { %3075 = vmatprep.mubr.bf16.mxu1 %v5771_v61  ;;  %v3179_v61 = vld [vmem:[%s7277_s3 + $0x30] sm:$0xff] }
 0x68a   :  { %v5180_v9 = vpop.f32.mrb[200].mxu1 }
 0x68b   :  { %v2698_v54 = vpop.f32.mrb[201].mxu1 }
 0x68c   :  { %v5181_v41 = vpop.f32.mrb[202].mxu1 }
 0x68d   :  { %v2798_v12 = vpack.c.bf16 %v5181_v41, %v5180_v9  ;;  %v2701_v49 = vpop.f32.mrb[203].mxu1  ;;  %v5794_v9 = vld [vmem:[#allocation5 + $0xa4] ss:$8 sps:$4 sm:$0xff]  }
 0x68e   :  { %v2797_v34 = vpack.c.bf16 %v2701_v49, %v2698_v54  ;;  %v3178_v54 = vld [vmem:[%s7277_s3 + $0x28] sm:$0xff]  ;;  %v3181_v41 = vld [vmem:[%s7277_s3 + $0x40] sm:$0xff] }
 0x68f   :  { %3076 = vmatmul.mubr.bf16.gmra.mrb[4].mxu1 %v5772_v10  ;;  %v3183_v10 = vld [vmem:[%s7277_s3 + $0x50] sm:$0xff] }
 0x690   :  { %3083 = vmatprep.mubr.bf16.mxu1 %v5773_v50  ;;  %v5796_v50 = vld [vmem:[#allocation5 + $0xb4] ss:$8 sps:$4 sm:$0xff]  }
 0x697   :  { %3084 = vmatmul.mubr.bf16.gmra.mrb[8].mxu1 %v6665_v39 }
 0x698   :  { %3091 = vmatprep.mubr.bf16.mxu1 %v6668_v23 }
 0x69a   :  { %v5184_v58 = vpop.f32.mrb[204].mxu1 }
 0x69b   :  { %v2714_v2 = vpop.f32.mrb[205].mxu1 }
 0x69c   :  { %v5185_v31 = vpop.f32.mrb[206].mxu1 }
 0x69d   :  { %v2800_v13 = vpack.c.bf16 %v5185_v31, %v5184_v58  ;;  %v2717_v16 = vpop.f32.mrb[207].mxu1 }
 0x69e   :  { %v2799_v19 = vpack.c.bf16 %v2717_v16, %v2714_v2 }
 0x69f   :  { %3092 = vmatmul.mubr.bf16.gmra.mrb[12].mxu1 %v6671_v48 }
 0x6a0   :  { %3099 = vmatprep.mubr.bf16.mxu1 %v6674_v51 }
 0x6a7   :  { %3100 = vmatmul.mubr.bf16.gmra.mrb[16].mxu1 %v6677_v53 }
 0x6a8   :  { %3107 = vmatprep.mubr.bf16.mxu1 %v6680_v55 }
 0x6aa   :  { %v5188_v20 = vpop.f32.mrb[208].mxu1 }
 0x6ab   :  { %v2730_v26 = vpop.f32.mrb[209].mxu1 }
 0x6ac   :  { %v5189_v38 = vpop.f32.mrb[210].mxu1 }
 0x6ad   :  { %v2802_v39 = vpack.c.bf16 %v5189_v38, %v5188_v20  ;;  %v2733_v24 = vpop.f32.mrb[211].mxu1  ;;  %v3185_v20 = vld [vmem:[%s7277_s3 + $0x60] sm:$0xff] }
 0x6ae   :  { %v2801_v23 = vpack.c.bf16 %v2733_v24, %v2730_v26  ;;  %v5797_v26 = vld [vmem:[#allocation5 + $0xb0] ss:$8 sps:$4 sm:$0xff]  }
 0x6af   :  { %3108 = vmatmul.mubr.bf16.gmra.mrb[20].mxu1 %v6683_v57  ;;  %v3187_v24 = vld [vmem:[%s7277_s3 + $0x70] sm:$0xff] }
 0x6b0   :  { %4634 = vmatprep.subr.bf16.mxu0 %v2801_v23  ;;  %3115 = vmatprep.mubr.bf16.mxu1 %v6686_v59  ;;  %v5798_v23 = vld [vmem:[#allocation5 + $0xc4] ss:$8 sps:$4 sm:$0xff]  }
 0x6b1   :  { %4635 = vmatpush3.bf16.msra.mxu0 %v2793_v52  ;;  %v5784_v52 = vld [vmem:[#allocation5 + $0x54] ss:$8 sps:$4 sm:$0xff]  }
 0x6b2   :  { %4636 = vmatprep.subr.bf16.mxu0 %v2802_v39  ;;  %v3184_v39 = vld [vmem:[%s7277_s3 + $0x58] sm:$0xff] }
 0x6b5   :  { %4637 = vmatpush3.bf16.msra.mxu0 %v2794_v1  ;;  %v5782_v1 = vld [vmem:[#allocation5 + $0x44] ss:$8 sps:$4 sm:$0xff]  }
 0x6b7   :  { %3116 = vmatmul.mubr.bf16.gmra.mrb[24].mxu1 %v6689_v62 }
 0x6b8   :  { %3123 = vmatprep.mubr.bf16.mxu1 %v6692_v4 }
 0x6ba   :  { %v5192_v48 = vpop.f32.mrb[212].mxu1 }
 0x6bb   :  { %v2746_v51 = vpop.f32.mrb[213].mxu1 }
 0x6bc   :  { %v5193_v53 = vpop.f32.mrb[214].mxu1 }
 0x6bd   :  { %v2804_v55 = vpack.c.bf16 %v5193_v53, %v5192_v48  ;;  %v2749_v28 = vpop.f32.mrb[215].mxu1 }
 0x6be   :  { %v2803_v11 = vpack.c.bf16 %v2749_v28, %v2746_v51 }
 0x6bf   :  { %3124 = vmatmul.mubr.bf16.gmra.mrb[28].mxu1 %v5774_v27  ;;  %v5799_v27 = vld [vmem:[#allocation5 + $0xc0] ss:$8 sps:$4 sm:$0xff]  }
 0x6c0   :  { %4638 = vmatprep.subr.bf16.mxu0 %v2803_v11  ;;  %v3186_v11 = vld [vmem:[%s7277_s3 + $0x68] sm:$0xff] }
 0x6c1   :  { %4639 = vmatpush3.bf16.msra.mxu0 %v2795_v45  ;;  %v3175_v45 = vld [vmem:[%s7277_s3 + $0x10] sm:$0xff] }
 0x6c2   :  { %4640 = vmatprep.subr.bf16.mxu0 %v2804_v55  ;;  %3196 = vperm.xlu1 %5504, %v3175_v45  }
 0x6c5   :  { %4641 = vmatpush3.bf16.msra.mxu0 %v2796_v60  ;;  %v3174_v60 = vld [vmem:[%s7277_s3 + $0x8] sm:$0xff] }
 0x6c6   :  { %3193 = vperm.xlu0 %5503, %v3174_v60   ;;  %3199 = vperm.xlu1 %5504, %v3176_v7  }
 0x6ca   :  { %v5196_v57 = vpop.f32.mrb[216].mxu1  ;;  %3202 = vperm.xlu0 %5503, %v3177_v63   ;;  %3205 = vperm.xlu1 %5504, %v3178_v54  }
 0x6cb   :  { %v2762_v59 = vpop.f32.mrb[217].mxu1 }
 0x6cc   :  { %v5197_v30 = vpop.f32.mrb[218].mxu1 }
 0x6cd   :  { %v2806_v14 = vpack.c.bf16 %v5197_v30, %v5196_v57  ;;  %v2765_v42 = vpop.f32.mrb[219].mxu1  ;;  %v5800_v30 = vld [vmem:[#allocation5 + $0xd4] ss:$8 sps:$4 sm:$0xff]  }
 0x6ce   :  { %v2805_v62 = vpack.c.bf16 %v2765_v42, %v2762_v59  ;;  %3208 = vperm.xlu0 %5503, %v3179_v61   ;;  %v3188_v59 = vld [vmem:[%s7277_s3 + $0x78] sm:$0xff] }
 0x6d0   :  { %4642 = vmatprep.subr.bf16.mxu0 %v2805_v62 }
 0x6d1   :  { %4643 = vmatpush3.bf16.msra.mxu0 %v2797_v34  ;;  %v3180_v34 = vld [vmem:[%s7277_s3 + $0x38] sm:$0xff] }
 0x6d2   :  { %4644 = vmatprep.subr.bf16.mxu0 %v2806_v14  ;;  %3214 = vperm.xlu0 %5503, %v3181_v41  }
 0x6d3   :  { %3211 = vperm.xlu1 %5504, %v3180_v34  }
 0x6d5   :  { %4645 = vmatpush3.bf16.msra.mxu0 %v2798_v12  ;;  %v5795_v12 = vld [vmem:[#allocation5 + $0xa0] ss:$8 sps:$4 sm:$0xff]  }
 0x6d6   :  { %3220 = vperm.xlu0 %5503, %v3183_v10  }
 0x6da   :  { %v5200_v4 = vpop.f32.mrb[220].mxu1  ;;  %3226 = vperm.xlu0 %5503, %v3185_v20  }
 0x6db   :  { %v2778_v32 = vpop.f32.mrb[221].mxu1 }
 0x6dc   :  { %v5201_v44 = vpop.f32.mrb[222].mxu1 }
 0x6dd   :  { %v2808_v33 = vpack.c.bf16 %v5201_v44, %v5200_v4  ;;  %v2781_v35 = vpop.f32.mrb[223].mxu1  ;;  %v5801_v44 = vld [vmem:[#allocation5 + $0xd0] ss:$8 sps:$4 sm:$0xff]  }
 0x6de   :  { %v2807_v29 = vpack.c.bf16 %v2781_v35, %v2778_v32  ;;  %3232 = vperm.xlu0 %5503, %v3187_v24   ;;  %v5802_v35 = vld [vmem:[#allocation5 + $0xe4] ss:$8 sps:$4 sm:$0xff]  }
 0x6e0   :  { %4646 = vmatprep.subr.bf16.mxu0 %v2807_v29 }
 0x6e1   :  { %4647 = vmatpush3.bf16.msra.mxu0 %v2799_v19  ;;  %v3182_v19 = vld [vmem:[%s7277_s3 + $0x48] sm:$0xff] }
 0x6e2   :  { %4648 = vmatprep.subr.bf16.mxu0 %v2808_v33  ;;  %3217 = vperm.xlu1 %5504, %v3182_v19  }
 0x6e5   :  { %4649 = vmatpush3.bf16.msra.mxu0 %v2800_v13 }
 0x6e6   :  { %3223 = vperm.xlu1 %5504, %v3184_v39  }
 0x6e8   :  { %2843 = vmatmul.mubr.bf16.vlgmr.msra.gmra.mrb[224].mxu0 %v5775_v37 }
 0x6e9   :  { %2850 = vmatprep.mubr.bf16.mxu0 %v5776_v46 }
 0x6ea   :  { %3229 = vperm.xlu1 %5504, %v3186_v11  }
 0x6ee   :  { %3235 = vperm.xlu1 %5504, %v3188_v59  }
 0x6f0   :  { %2851 = vmatmul.mubr.bf16.gmra.mrb[228].mxu0 %v5777_v17 }
 0x6f1   :  { %2858 = vmatprep.mubr.bf16.mxu0 %v5778_v6  ;;  %v5803_v6 = vld [vmem:[#allocation5 + $0xe0] ss:$8 sps:$4 sm:$0xff]  }
 0x6f8   :  { %2859 = vmatmul.mubr.bf16.gmra.mrb[232].mxu0 %v5779_v25 }
 0x6f9   :  { %2866 = vmatprep.mubr.bf16.mxu0 %v5780_v18  ;;  %v5804_v18 = vld [vmem:[#allocation5 + $0xf4] ss:$8 sps:$4 sm:$0xff]  }
 0x700   :  { %2867 = vmatmul.mubr.bf16.gmra.mrb[236].mxu0 %v5781_v22 }
 0x701   :  { %2874 = vmatprep.mubr.bf16.mxu0 %v5782_v1 }
 0x708   :  { %2875 = vmatmul.mubr.bf16.gmra.mrb[240].mxu0 %v5783_v8 }
 0x709   :  { %2882 = vmatprep.mubr.bf16.mxu0 %v5784_v52 }
 0x710   :  { %2883 = vmatmul.mubr.bf16.gmra.mrb[244].mxu0 %v5785_v15 }
 0x711   :  { %2890 = vmatprep.mubr.bf16.mxu0 %v5786_v56  ;;  %v5805_v56 = vld [vmem:[#allocation5 + $0xf0] ss:$8 sps:$4 sm:$0xff]  }
 0x718   :  { %2891 = vmatmul.mubr.bf16.gmra.mrb[248].mxu0 %v5787_v40 }
 0x719   :  { %2898 = vmatprep.mubr.bf16.mxu0 %v5788_v47 }
 0x71a   :  { %v4762_v49 = vpop.f32.mrb[224].mxu1 }
 0x71b   :  { %v4763_v58 = vpop.f32.mrb[225].mxu1 }
 0x71c   :  { %v4765_v2 = vpop.f32.mrb[226].mxu1  ;;  %v6884_v13 = vadd.f32 %v4763_v58, %v4762_v49 }
 0x71d   :  { %v4766_v31 = vpop.f32.mrb[227].mxu1 }
 0x71e   :  { %v6886_v16 = vadd.f32 %v4766_v31, %v4765_v2 }
 0x720   :  { %2899 = vmatmul.mubr.bf16.gmra.mrb[252].mxu0 %v5789_v0 }
 0x721   :  { %2906 = vmatprep.mubr.bf16.mxu0 %v5790_v21 }
 0x722   :  { %v4768_v38 = vpop.f32.mrb[228].mxu1 }
 0x723   :  { %v4769_v48 = vpop.f32.mrb[229].mxu1 }
 0x724   :  { %v4771_v51 = vpop.f32.mrb[230].mxu1  ;;  %v6900_v55 = vadd.f32 %v4769_v48, %v4768_v38 }
 0x725   :  { %v4772_v53 = vpop.f32.mrb[231].mxu1 }
 0x726   :  { %v6902_v28 = vadd.f32 %v4772_v53, %v4771_v51 }
 0x728   :  { %2907 = vmatmul.mubr.bf16.gmra.mrb[0].mxu0 %v5791_v43 }
 0x729   :  { %2914 = vmatprep.mubr.bf16.mxu0 %v5792_v5 }
 0x72a   :  { %v4774_v57 = vpop.f32.mrb[232].mxu1 }
 0x72b   :  { %v4775_v14 = vpop.f32.mrb[233].mxu1 }
 0x72c   :  { %v4777_v42 = vpop.f32.mrb[234].mxu1  ;;  %v6910_v4 = vadd.f32 %v4775_v14, %v4774_v57 }
 0x72d   :  { %v4778_v62 = vpop.f32.mrb[235].mxu1 }
 0x72e   :  { %v6912_v32 = vadd.f32 %v4778_v62, %v4777_v42 }
 0x730   :  { %2915 = vmatmul.mubr.bf16.gmra.mrb[4].mxu0 %v5793_v3 }
 0x731   :  { %2922 = vmatprep.mubr.bf16.mxu0 %v5794_v9 }
 0x732   :  { %v4780_v33 = vpop.f32.mrb[236].mxu1 }
 0x733   :  { %v4781_v29 = vpop.f32.mrb[237].mxu1 }
 0x734   :  { %v4783_v36 = vpop.f32.mrb[238].mxu1  ;;  %v6914_v46 = vadd.f32 %v4781_v29, %v4780_v33 }
 0x735   :  { %v4784_v37 = vpop.f32.mrb[239].mxu1 }
 0x736   :  { %v6916_v17 = vadd.f32 %v4784_v37, %v4783_v36 }
 0x738   :  { %2923 = vmatmul.mubr.bf16.gmra.mrb[8].mxu0 %v5795_v12 }
 0x739   :  { %2930 = vmatprep.mubr.bf16.mxu0 %v5796_v50 }
 0x73a   :  { %v4786_v25 = vpop.f32.mrb[240].mxu1 }
 0x73b   :  { %v4787_v22 = vpop.f32.mrb[241].mxu1 }
 0x73c   :  { %v4789_v1 = vpop.f32.mrb[242].mxu1  ;;  %v6918_v52 = vadd.f32 %v4787_v22, %v4786_v25 }
 0x73d   :  { %v4790_v8 = vpop.f32.mrb[243].mxu1 }
 0x73e   :  { %v6920_v15 = vadd.f32 %v4790_v8, %v4789_v1 }
 0x740   :  { %2931 = vmatmul.mubr.bf16.gmra.mrb[12].mxu0 %v5797_v26 }
 0x741   :  { %2938 = vmatprep.mubr.bf16.mxu0 %v5798_v23 }
 0x742   :  { %v4792_v40 = vpop.f32.mrb[244].mxu1 }
 0x743   :  { %v4793_v47 = vpop.f32.mrb[245].mxu1 }
 0x744   :  { %v4795_v0 = vpop.f32.mrb[246].mxu1  ;;  %v6922_v43 = vadd.f32 %v4793_v47, %v4792_v40 }
 0x745   :  { %v4796_v21 = vpop.f32.mrb[247].mxu1 }
 0x746   :  { %v6924_v60 = vadd.f32 %v4796_v21, %v4795_v0 }
 0x748   :  { %2939 = vmatmul.mubr.bf16.gmra.mrb[16].mxu0 %v5799_v27 }
 0x749   :  { %2946 = vmatprep.mubr.bf16.mxu0 %v5800_v30 }
 0x74a   :  { %v4798_v5 = vpop.f32.mrb[248].mxu1 }
 0x74b   :  { %v4799_v45 = vpop.f32.mrb[249].mxu1 }
 0x74c   :  { %v4801_v63 = vpop.f32.mrb[250].mxu1  ;;  %v6926_v7 = vadd.f32 %v4799_v45, %v4798_v5 }
 0x74d   :  { %v4802_v3 = vpop.f32.mrb[251].mxu1 }
 0x74e   :  { %v6928_v61 = vadd.f32 %v4802_v3, %v4801_v63 }
 0x750   :  { %2947 = vmatmul.mubr.bf16.gmra.mrb[20].mxu0 %v5801_v44 }
 0x751   :  { %2954 = vmatprep.mubr.bf16.mxu0 %v5802_v35 }
 0x752   :  { %v4804_v9 = vpop.f32.mrb[252].mxu1 }
 0x753   :  { %v4805_v54 = vpop.f32.mrb[253].mxu1 }
 0x754   :  { %v4807_v41 = vpop.f32.mrb[254].mxu1  ;;  %v6930_v49 = vadd.f32 %v4805_v54, %v4804_v9 }
 0x755   :  { %v4808_v12 = vpop.f32.mrb[255].mxu1 }
 0x756   :  { %v6932_v34 = vadd.f32 %v4808_v12, %v4807_v41 }
 0x758   :  { %2955 = vmatmul.mubr.bf16.gmra.mrb[24].mxu0 %v5803_v6 }
 0x759   :  { %2962 = vmatprep.mubr.bf16.mxu0 %v5804_v18 }
 0x75a   :  { %v4810_v10 = vpop.f32.mrb[0].mxu1 }
 0x75b   :  { %v4811_v50 = vpop.f32.mrb[1].mxu1 }
 0x75c   :  { %v4813_v58 = vpop.f32.mrb[2].mxu1  ;;  %v6934_v31 = vadd.f32 %v4811_v50, %v4810_v10  ;;  %v3170_v50 = vlaneseq }
 0x75d   :  { %v4814_v2 = vpop.f32.mrb[3].mxu1 }
 0x75e   :  { %v6936_v19 = vadd.f32 %v4814_v2, %v4813_v58 }
 0x760   :  { %2963 = vmatmul.mubr.bf16.gmra.mrb[28].mxu0 %v5805_v56 }
 0x762   :  { %v4816_v20 = vpop.f32.mrb[4].mxu1 }
 0x763   :  { %v4817_v26 = vpop.f32.mrb[5].mxu1 }
 0x764   :  { %v4819_v38 = vpop.f32.mrb[6].mxu1  ;;  %v6938_v24 = vadd.f32 %v4817_v26, %v4816_v20  ;;  %v6966_v26 = vand.u32 127, %v3170_v50 }
 0x765   :  { %v4820_v39 = vpop.f32.mrb[7].mxu1 }
 0x766   :  { %v6940_v23 = vadd.f32 %v4820_v39, %v4819_v38 }
 0x76a   :  { %v4822_v48 = vpop.f32.mrb[8].mxu1 }
 0x76b   :  { %v4823_v51 = vpop.f32.mrb[9].mxu1 }
 0x76c   :  { %v4825_v53 = vpop.f32.mrb[10].mxu1  ;;  %v6942_v27 = vadd.f32 %v4823_v51, %v4822_v48  ;;  %v6970_v51 = vadd.s32 128, %v6966_v26 }
 0x76d   :  { %v4826_v11 = vpop.f32.mrb[11].mxu1 }
 0x76e   :  { %v6944_v57 = vadd.f32 %v4826_v11, %v4825_v53  ;;  %v6972_v53 = vpop.permute.xlu0 %3190  ;;  %v6977_v11 = vld [vmem:[%s7285_s11] ss:$0 sm:$0xff] }
 0x76f   :  { %vm3237_vm0 = vcmp.eq.s32.totalorder %v6966_v26, %v6972_v53  ;;  %vm3238_vm1 = vcmp.eq.s32.totalorder %v6970_v51, %v6972_v53 }
 0x772   :  { %v4828_v59 = vpop.f32.mrb[12].mxu1 }
 0x773   :  { %v4829_v30 = vpop.f32.mrb[13].mxu1 }
 0x774   :  { %v4831_v14 = vpop.f32.mrb[14].mxu1  ;;  %v6946_v62 = vadd.f32 %v4829_v30, %v4828_v59 }
 0x775   :  { %v4832_v42 = vpop.f32.mrb[15].mxu1 }
 0x776   :  { %v6948_v44 = vadd.f32 %v4832_v42, %v4831_v14 }
 0x77a   :  { %v4834_v33 = vpop.f32.mrb[16].mxu1 }
 0x77b   :  { %v4835_v35 = vpop.f32.mrb[17].mxu1 }
 0x77c   :  { %v4837_v29 = vpop.f32.mrb[18].mxu1  ;;  %v6950_v37 = vadd.f32 %v4835_v35, %v4834_v33 }
 0x77d   :  { %v4838_v36 = vpop.f32.mrb[19].mxu1 }
 0x77e   :  { %v6952_v6 = vadd.f32 %v4838_v36, %v4837_v29 }
 0x782   :  { %v4840_v25 = vpop.f32.mrb[20].mxu1 }
 0x783   :  { %v4841_v18 = vpop.f32.mrb[21].mxu1 }
 0x784   :  { %v4843_v22 = vpop.f32.mrb[22].mxu1  ;;  %v6954_v8 = vadd.f32 %v4841_v18, %v4840_v25 }
 0x785   :  { %v4844_v1 = vpop.f32.mrb[23].mxu1 }
 0x786   :  { %v6956_v56 = vadd.f32 %v4844_v1, %v4843_v22 }
 0x78a   :  { %v4846_v40 = vpop.f32.mrb[24].mxu1 }
 0x78b   :  { %v4847_v47 = vpop.f32.mrb[25].mxu1 }
 0x78c   :  { %v4849_v0 = vpop.f32.mrb[26].mxu1  ;;  %v6958_v5 = vadd.f32 %v4847_v47, %v4846_v40 }
 0x78d   :  { %v4850_v21 = vpop.f32.mrb[27].mxu1 }
 0x78e   :  { %v6960_v45 = vadd.f32 %v4850_v21, %v4849_v0 }
 0x792   :  { %v4852_v63 = vpop.f32.mrb[28].mxu1 }
 0x793   :  { %v4853_v3 = vpop.f32.mrb[29].mxu1 }
 0x794   :  { %v4855_v9 = vpop.f32.mrb[30].mxu1  ;;  %v6962_v41 = vadd.f32 %v4853_v3, %v4852_v63 }
 0x795   :  { %v4856_v54 = vpop.f32.mrb[31].mxu1 }
 0x796   :  { %v6964_v12 = vadd.f32 %v4856_v54, %v4855_v9 }
 0x7bb   :  { %v4650_v10 = vpop.f32.mrb[224].mxu0 }
 0x7bc   :  { %v4651_v58 = vpop.f32.mrb[225].mxu0 }
 0x7bd   :  { %v4652_v2 = vadd.f32 %v4651_v58, %v4650_v10  ;;  %v4653_v20 = vpop.f32.mrb[226].mxu0 }
 0x7be   :  { %v4654_v38 = vpop.f32.mrb[227].mxu0 }
 0x7bf   :  { %v3006_v39 = vadd.f32 %v6884_v13, %v4652_v2  ;;  %v4655_v48 = vadd.f32 %v4654_v38, %v4653_v20  ;;  %v6077_v13 = vmov 1.0  }
 0x7c0   :  { %4056 = vmatprep.mubr.msk.f32.mxu0 %vm3238_vm1, %v6077_v13 }
 0x7c1   :  { %v3009_v59 = vadd.f32 %v6886_v16, %v4655_v48  ;;  %v6986_v30 = vadd.f32 %v6977_v11, %v3006_v39 }
 0x7c3   :  { %v6989_v14 = vadd.f32 %v6977_v11, %v3009_v59  ;;  %v4656_v42 = vpop.f32.mrb[228].mxu0 }
 0x7c4   :  { %v4657_v33 = vpop.f32.mrb[229].mxu0 }
 0x7c5   :  { %v5336_v35 = vpack.c.bf16 %v6989_v14, %v6986_v30  ;;  %v4658_v29 = vadd.f32 %v4657_v33, %v4656_v42  ;;  %v4659_v36 = vpop.f32.mrb[230].mxu0 }
 0x7c6   :  { %v4660_v16 = vpop.f32.mrb[231].mxu0 }
 0x7c7   :  { %v3014_v25 = vadd.f32 %v6900_v55, %v4658_v29  ;;  %v4661_v18 = vadd.f32 %v4660_v16, %v4659_v36 }
 0x7c9   :  { %v3017_v22 = vadd.f32 %v6902_v28, %v4661_v18  ;;  %v6996_v1 = vadd.f32 %v6977_v11, %v3014_v25 }
 0x7cb   :  { %v6999_v40 = vadd.f32 %v6977_v11, %v3017_v22  ;;  %v4662_v47 = vpop.f32.mrb[232].mxu0 }
 0x7cc   :  { %v4663_v0 = vpop.f32.mrb[233].mxu0 }
 0x7cd   :  { %v5340_v21 = vpack.c.bf16 %v6999_v40, %v6996_v1  ;;  %v4664_v63 = vadd.f32 %v4663_v0, %v4662_v47  ;;  %v4665_v3 = vpop.f32.mrb[234].mxu0 }
 0x7ce   :  { %v4666_v9 = vpop.f32.mrb[235].mxu0 }
 0x7cf   :  { %v3022_v54 = vadd.f32 %v6910_v4, %v4664_v63  ;;  %v4667_v55 = vadd.f32 %v4666_v9, %v4665_v3 }
 0x7d1   :  { %v3025_v10 = vadd.f32 %v6912_v32, %v4667_v55  ;;  %v7006_v28 = vadd.f32 %v6977_v11, %v3022_v54 }
 0x7d3   :  { %v7009_v50 = vadd.f32 %v6977_v11, %v3025_v10  ;;  %v4668_v58 = vpop.f32.mrb[236].mxu0 }
 0x7d4   :  { %v4669_v2 = vpop.f32.mrb[237].mxu0 }
 0x7d5   :  { %v5344_v20 = vpack.c.bf16 %v7009_v50, %v7006_v28  ;;  %v4670_v38 = vadd.f32 %v4669_v2, %v4668_v58  ;;  %v4671_v39 = vpop.f32.mrb[238].mxu0 }
 0x7d6   :  { %v4672_v48 = vpop.f32.mrb[239].mxu0 }
 0x7d7   :  { %v3030_v59 = vadd.f32 %v6914_v46, %v4670_v38  ;;  %v4673_v4 = vadd.f32 %v4672_v48, %v4671_v39 }
 0x7d9   :  { %v3033_v42 = vadd.f32 %v6916_v17, %v4673_v4  ;;  %v7016_v32 = vadd.f32 %v6977_v11, %v3030_v59 }
 0x7db   :  { %v7019_v33 = vadd.f32 %v6977_v11, %v3033_v42  ;;  %v4674_v29 = vpop.f32.mrb[240].mxu0 }
 0x7dc   :  { %v4675_v36 = vpop.f32.mrb[241].mxu0 }
 0x7dd   :  { %v5348_v16 = vpack.c.bf16 %v7019_v33, %v7016_v32  ;;  %v4676_v25 = vadd.f32 %v4675_v36, %v4674_v29  ;;  %v4677_v18 = vpop.f32.mrb[242].mxu0 }
 0x7de   :  { %v4678_v22 = vpop.f32.mrb[243].mxu0 }
 0x7df   :  { %v3038_v47 = vadd.f32 %v6918_v52, %v4676_v25  ;;  %v4679_v46 = vadd.f32 %v4678_v22, %v4677_v18 }
 0x7e1   :  { %v3041_v0 = vadd.f32 %v6920_v15, %v4679_v46  ;;  %v7026_v17 = vadd.f32 %v6977_v11, %v3038_v47 }
 0x7e3   :  { %v7029_v63 = vadd.f32 %v6977_v11, %v3041_v0  ;;  %v4680_v3 = vpop.f32.mrb[244].mxu0 }
 0x7e4   :  { %v4681_v9 = vpop.f32.mrb[245].mxu0 }
 0x7e5   :  { %v5352_v54 = vpack.c.bf16 %v7029_v63, %v7026_v17  ;;  %v4682_v55 = vadd.f32 %v4681_v9, %v4680_v3  ;;  %v4683_v10 = vpop.f32.mrb[246].mxu0 }
 0x7e6   :  { %v4684_v58 = vpop.f32.mrb[247].mxu0 }
 0x7e7   :  { %v3046_v2 = vadd.f32 %v6922_v43, %v4682_v55  ;;  %v4685_v52 = vadd.f32 %v4684_v58, %v4683_v10 }
 0x7e9   :  { %v3049_v38 = vadd.f32 %v6924_v60, %v4685_v52  ;;  %v7036_v15 = vadd.f32 %v6977_v11, %v3046_v2 }
 0x7eb   :  { %v7039_v39 = vadd.f32 %v6977_v11, %v3049_v38  ;;  %v4686_v48 = vpop.f32.mrb[248].mxu0 }
 0x7ec   :  { %v4687_v59 = vpop.f32.mrb[249].mxu0 }
 0x7ed   :  { %v5356_v4 = vpack.c.bf16 %v7039_v39, %v7036_v15  ;;  %v4688_v42 = vadd.f32 %v4687_v59, %v4686_v48  ;;  %v4689_v29 = vpop.f32.mrb[250].mxu0 }
 0x7ee   :  { %v4690_v36 = vpop.f32.mrb[251].mxu0 }
 0x7ef   :  { %v3054_v25 = vadd.f32 %v6926_v7, %v4688_v42  ;;  %v4691_v43 = vadd.f32 %v4690_v36, %v4689_v29 }
 0x7f1   :  { %v3057_v18 = vadd.f32 %v6928_v61, %v4691_v43  ;;  %v7046_v60 = vadd.f32 %v6977_v11, %v3054_v25  ;;  %v3494_v25 = vld [vmem:[#allocation16] sm:$0xff]  ;;  %v3495_v43 = vld [vmem:[#allocation16 + $0x8] sm:$0xff] }
 0x7f3   :  { %v7049_v22 = vadd.f32 %v6977_v11, %v3057_v18  ;;  %v4692_v47 = vpop.f32.mrb[252].mxu0  ;;  %v5366_v18 = vpack.c.bf16 %v3495_v43, %v3494_v25 }
 0x7f4   :  { %v4693_v46 = vpop.f32.mrb[253].mxu0 }
 0x7f5   :  { %v5360_v0 = vpack.c.bf16 %v7049_v22, %v7046_v60  ;;  %v4694_v3 = vadd.f32 %v4693_v46, %v4692_v47  ;;  %v4695_v9 = vpop.f32.mrb[254].mxu0  ;;  %v3497_v47 = vld [vmem:[#allocation16 + $0x18] sm:$0xff]  ;;  %5367 = vmatprep.subr.bf16.mxu1 %v5366_v18 }
 0x7f6   :  { %v4696_v55 = vpop.f32.mrb[255].mxu0  ;;  %5369 = vmatpush3.bf16.msra.mxu1 %v5366_v18 }
 0x7f7   :  { %v3062_v10 = vadd.f32 %v6930_v49, %v4694_v3  ;;  %v4697_v7 = vadd.f32 %v4696_v55, %v4695_v9  ;;  %v3498_v9 = vld [vmem:[#allocation16 + $0x20] sm:$0xff]  ;;  %v3499_v55 = vld [vmem:[#allocation16 + $0x28] sm:$0xff] }
 0x7f9   :  { %v3065_v58 = vadd.f32 %v6932_v34, %v4697_v7  ;;  %v7056_v61 = vadd.f32 %v6977_v11, %v3062_v10  ;;  %v3496_v34 = vld [vmem:[#allocation16 + $0x10] sm:$0xff] }
 0x7fa   :  { %v5370_v3 = vpack.c.bf16 %v3497_v47, %v3496_v34 }
 0x7fb   :  { %v7059_v2 = vadd.f32 %v6977_v11, %v3065_v58  ;;  %v4698_v52 = vpop.f32.mrb[0].mxu0 }
 0x7fc   :  { %v4699_v38 = vpop.f32.mrb[1].mxu0  ;;  %5371 = vmatprep.subr.bf16.mxu1 %v5370_v3 }
 0x7fd   :  { %v5364_v48 = vpack.c.bf16 %v7059_v2, %v7056_v61  ;;  %v4700_v59 = vadd.f32 %v4699_v38, %v4698_v52  ;;  %v4701_v42 = vpop.f32.mrb[2].mxu0  ;;  %5373 = vmatpush3.bf16.msra.mxu1 %v5370_v3 }
 0x7fe   :  { %v4702_v29 = vpop.f32.mrb[3].mxu0 }
 0x7ff   :  { %v3070_v36 = vadd.f32 %v6934_v31, %v4700_v59  ;;  %v4703_v49 = vadd.f32 %v4702_v29, %v4701_v42  ;;  %v5374_v31 = vpack.c.bf16 %v3499_v55, %v3498_v9 }
 0x801   :  { %v3073_v46 = vadd.f32 %v6936_v19, %v4703_v49  ;;  %v3154_v10 = vadd.f32 %v6977_v11, %v3070_v36  ;;  %5375 = vmatprep.subr.bf16.mxu1 %v5374_v31 }
 0x802   :  { %5377 = vmatpush3.bf16.msra.mxu1 %v5374_v31 }
 0x803   :  { %v3155_v7 = vadd.f32 %v6977_v11, %v3073_v46  ;;  %v4704_v58 = vpop.f32.mrb[4].mxu0 }
 0x804   :  { %v4705_v52 = vpop.f32.mrb[5].mxu0 }
 0x805   :  { %v4706_v38 = vadd.f32 %v4705_v52, %v4704_v58  ;;  %v4707_v59 = vpop.f32.mrb[6].mxu0  ;;  %v5334_v42 = vpack.c.bf16 %v3155_v7, %v3154_v10 }
 0x806   :  { %v4708_v29 = vpop.f32.mrb[7].mxu0 }
 0x807   :  { %v3078_v25 = vadd.f32 %v6938_v24, %v4706_v38  ;;  %v4709_v19 = vadd.f32 %v4708_v29, %v4707_v59  ;;  %5335 = vmatprep.subr.bf16.mxu0 %v5334_v42 }
 0x808   :  { %5337 = vmatpush3.bf16.msra.mxu0 %v5336_v35 }
 0x809   :  { %v3081_v36 = vadd.f32 %v6940_v23, %v4709_v19  ;;  %v3156_v49 = vadd.f32 %v6977_v11, %v3078_v25 }
 0x80b   :  { %v3157_v43 = vadd.f32 %v6977_v11, %v3081_v36  ;;  %v4710_v34 = vpop.f32.mrb[8].mxu0 }
 0x80c   :  { %v4711_v18 = vpop.f32.mrb[9].mxu0 }
 0x80d   :  { %v4712_v47 = vadd.f32 %v4711_v18, %v4710_v34  ;;  %v4713_v46 = vpop.f32.mrb[10].mxu0  ;;  %v5338_v24 = vpack.c.bf16 %v3157_v43, %v3156_v49 }
 0x80e   :  { %v4714_v9 = vpop.f32.mrb[11].mxu0 }
 0x80f   :  { %v3086_v3 = vadd.f32 %v6942_v27, %v4712_v47  ;;  %v4715_v55 = vadd.f32 %v4714_v9, %v4713_v46  ;;  %5339 = vmatprep.subr.bf16.mxu0 %v5338_v24 }
 0x810   :  { %5341 = vmatpush3.bf16.msra.mxu0 %v5340_v21 }
 0x811   :  { %v3089_v23 = vadd.f32 %v6944_v57, %v4715_v55  ;;  %v3158_v30 = vadd.f32 %v6977_v11, %v3086_v3 }
 0x813   :  { %v3159_v14 = vadd.f32 %v6977_v11, %v3089_v23  ;;  %v4716_v35 = vpop.f32.mrb[12].mxu0 }
 0x814   :  { %v4717_v10 = vpop.f32.mrb[13].mxu0 }
 0x815   :  { %v4718_v7 = vadd.f32 %v4717_v10, %v4716_v35  ;;  %v4719_v58 = vpop.f32.mrb[14].mxu0  ;;  %v5342_v52 = vpack.c.bf16 %v3159_v14, %v3158_v30 }
 0x816   :  { %v4720_v31 = vpop.f32.mrb[15].mxu0 }
 0x817   :  { %v3094_v27 = vadd.f32 %v6946_v62, %v4718_v7  ;;  %v4721_v38 = vadd.f32 %v4720_v31, %v4719_v58  ;;  %5343 = vmatprep.subr.bf16.mxu0 %v5342_v52  ;;  %v3194_v31 = vpop.permute.xlu0 %3193 }
 0x818   :  { %5345 = vmatpush3.bf16.msra.mxu0 %v5344_v20  ;;  %vm3240_vm2 = vcmp.eq.s32.totalorder %v6970_v51, %v3194_v31  ;;  %vm3239_vm4 = vcmp.eq.s32.totalorder %v6966_v26, %v3194_v31 }
 0x819   :  { %v3097_v57 = vadd.f32 %v6948_v44, %v4721_v38  ;;  %v3160_v1 = vadd.f32 %v6977_v11, %v3094_v27 }
 0x81b   :  { %v3161_v40 = vadd.f32 %v6977_v11, %v3097_v57  ;;  %v4722_v21 = vpop.f32.mrb[16].mxu0  ;;  %v3203_v53 = vpop.permute.xlu0 %3202 }
 0x81c   :  { %v4723_v59 = vpop.f32.mrb[17].mxu0  ;;  %vm3246_vm8 = vcmp.eq.s32.totalorder %v6970_v51, %v3203_v53  ;;  %vm3245_vm9 = vcmp.eq.s32.totalorder %v6966_v26, %v3203_v53 }
 0x81d   :  { %v4724_v42 = vadd.f32 %v4723_v59, %v4722_v21  ;;  %v4725_v29 = vpop.f32.mrb[18].mxu0  ;;  %v5346_v25 = vpack.c.bf16 %v3161_v40, %v3160_v1  ;;  %v3500_v40 = vld [vmem:[#allocation16 + $0x30] sm:$0xff]  ;;  %v3501_v21 = vld [vmem:[#allocation16 + $0x38] sm:$0xff] }
 0x81e   :  { %v4726_v19 = vpop.f32.mrb[19].mxu0  ;;  %v5378_v59 = vpack.c.bf16 %v3501_v21, %v3500_v40 }
 0x81f   :  { %v3102_v62 = vadd.f32 %v6950_v37, %v4724_v42  ;;  %v4727_v36 = vadd.f32 %v4726_v19, %v4725_v29  ;;  %5347 = vmatprep.subr.bf16.mxu0 %v5346_v25  ;;  %v3209_v60 = vpop.permute.xlu0 %3208  ;;  %v3502_v42 = vld [vmem:[#allocation16 + $0x40] sm:$0xff]  ;;  %v3503_v29 = vld [vmem:[#allocation16 + $0x48] sm:$0xff]  ;;  %v3504_v19 = vld [vmem:[#allocation16 + $0x50] sm:$0xff] }
 0x820   :  { %5349 = vmatpush3.bf16.msra.mxu0 %v5348_v16  ;;  %vm3250_vm12 = vcmp.eq.s32.totalorder %v6970_v51, %v3209_v60  ;;  %vm3249_vm13 = vcmp.eq.s32.totalorder %v6966_v26, %v3209_v60  ;;  %5379 = vmatprep.subr.bf16.mxu1 %v5378_v59  ;;  %v5382_v25 = vpack.c.bf16 %v3503_v29, %v3502_v42  ;;  %v3481_v42 = vld [vmem:[#allocation14 + $0x18] sm:$0xff] }
 0x821   :  { %v3105_v44 = vadd.f32 %v6952_v6, %v4727_v36  ;;  %v3162_v28 = vadd.f32 %v6977_v11, %v3102_v62  ;;  %5381 = vmatpush3.bf16.msra.mxu1 %v5378_v59  ;;  %v3505_v62 = vld [vmem:[#allocation16 + $0x58] sm:$0xff]  ;;  %v3480_v59 = vld [vmem:[#allocation14 + $0x10] sm:$0xff] }
 0x822   :  { %5383 = vmatprep.subr.bf16.mxu1 %v5382_v25  ;;  %v5386_v36 = vpack.c.bf16 %v3505_v62, %v3504_v19  ;;  %v5402_v62 = vpack.c.bf16 %v3481_v42, %v3480_v59 }
 0x823   :  { %v3163_v50 = vadd.f32 %v6977_v11, %v3105_v44  ;;  %v4728_v20 = vpop.f32.mrb[20].mxu0  ;;  %v3507_v44 = vld [vmem:[#allocation16 + $0x68] sm:$0xff] }
 0x824   :  { %v4729_v49 = vpop.f32.mrb[21].mxu0 }
 0x825   :  { %v4730_v43 = vadd.f32 %v4729_v49, %v4728_v20  ;;  %v4731_v34 = vpop.f32.mrb[22].mxu0  ;;  %v5350_v18 = vpack.c.bf16 %v3163_v50, %v3162_v28  ;;  %5385 = vmatpush3.bf16.msra.mxu1 %v5382_v25  ;;  %v3509_v28 = vld [vmem:[#allocation16 + $0x78] sm:$0xff]  ;;  %v3478_v20 = vld [vmem:[#allocation14] sm:$0xff]  ;;  %v3479_v49 = vld [vmem:[#allocation14 + $0x8] sm:$0xff] }
 0x826   :  { %v4732_v47 = vpop.f32.mrb[23].mxu0  ;;  %5387 = vmatprep.subr.bf16.mxu1 %v5386_v36 }
 0x827   :  { %v3110_v37 = vadd.f32 %v6954_v8, %v4730_v43  ;;  %v4733_v46 = vadd.f32 %v4732_v47, %v4731_v34  ;;  %5351 = vmatprep.subr.bf16.mxu0 %v5350_v18  ;;  %v7183_v43 = vpack.c.bf16 %v3479_v49, %v3478_v20  ;;  %v3735_v34 = vld [vmem:[#allocation17] sm:$0xff]  ;;  %v3736_v18 = vld [vmem:[#allocation17 + $0x8] sm:$0xff]  ;;  %v3737_v47 = vld [vmem:[#allocation17 + $0x10] sm:$0xff] }
 0x828   :  { %5353 = vmatpush3.bf16.msra.mxu0 %v5352_v54  ;;  %v3485_v20 = vld [vmem:[#allocation14 + $0x38] sm:$0xff] }
 0x829   :  { %v3113_v6 = vadd.f32 %v6956_v56, %v4733_v46  ;;  %v3164_v32 = vadd.f32 %v6977_v11, %v3110_v37  ;;  %5389 = vmatpush3.bf16.msra.mxu1 %v5386_v36  ;;  %v7186_v37 = vpack.c.bf16 %v3736_v18, %v3735_v34  ;;  %v3738_v46 = vld [vmem:[#allocation17 + $0x18] sm:$0xff]  ;;  %v3482_v36 = vld [vmem:[#allocation14 + $0x20] sm:$0xff] }
 0x82b   :  { %v3165_v33 = vadd.f32 %v6977_v11, %v3113_v6  ;;  %v4734_v16 = vpop.f32.mrb[24].mxu0  ;;  %v7188_v6 = vpack.c.bf16 %v3738_v46, %v3737_v47  ;;  %v3486_v46 = vld [vmem:[#allocation14 + $0x40] sm:$0xff] }
 0x82c   :  { %v4735_v24 = vpop.f32.mrb[25].mxu0 }
 0x82d   :  { %v4736_v9 = vadd.f32 %v4735_v24, %v4734_v16  ;;  %v4737_v3 = vpop.f32.mrb[26].mxu0  ;;  %v5354_v55 = vpack.c.bf16 %v3165_v33, %v3164_v32  ;;  %v3739_v32 = vld [vmem:[#allocation17 + $0x20] sm:$0xff]  ;;  %v3740_v33 = vld [vmem:[#allocation17 + $0x28] sm:$0xff]  ;;  %v3741_v24 = vld [vmem:[#allocation17 + $0x30] sm:$0xff] }
 0x82e   :  { %v4738_v23 = vpop.f32.mrb[27].mxu0  ;;  %v7193_v16 = vpack.c.bf16 %v3740_v33, %v3739_v32  ;;  %v3487_v32 = vld [vmem:[#allocation14 + $0x48] sm:$0xff] }
 0x82f   :  { %v3118_v8 = vadd.f32 %v6958_v5, %v4736_v9  ;;  %v4739_v30 = vadd.f32 %v4738_v23, %v4737_v3  ;;  %5355 = vmatprep.subr.bf16.mxu0 %v5354_v55  ;;  %v3742_v9 = vld [vmem:[#allocation17 + $0x38] sm:$0xff]  ;;  %v3743_v55 = vld [vmem:[#allocation17 + $0x40] sm:$0xff]  ;;  %v3744_v23 = vld [vmem:[#allocation17 + $0x48] sm:$0xff] }
 0x830   :  { %5357 = vmatpush3.bf16.msra.mxu0 %v5356_v4  ;;  %v7197_v3 = vpack.c.bf16 %v3742_v9, %v3741_v24 }
 0x831   :  { %v3121_v56 = vadd.f32 %v6960_v45, %v4739_v30  ;;  %v3166_v17 = vadd.f32 %v6977_v11, %v3118_v8  ;;  %v7201_v8 = vpack.c.bf16 %v3744_v23, %v3743_v55  ;;  %v3745_v30 = vld [vmem:[#allocation17 + $0x50] sm:$0xff]  ;;  %v3489_v23 = vld [vmem:[#allocation14 + $0x58] sm:$0xff] }
 0x832   :  { %v3488_v55 = vld [vmem:[#allocation14 + $0x50] sm:$0xff] }
 0x833   :  { %v3167_v63 = vadd.f32 %v6977_v11, %v3121_v56  ;;  %v4740_v54 = vpop.f32.mrb[28].mxu0  ;;  %v3746_v56 = vld [vmem:[#allocation17 + $0x58] sm:$0xff] }
 0x834   :  { %v4741_v14 = vpop.f32.mrb[29].mxu0 }
 0x835   :  { %v4742_v35 = vadd.f32 %v4741_v14, %v4740_v54  ;;  %v4743_v10 = vpop.f32.mrb[30].mxu0  ;;  %v5358_v7 = vpack.c.bf16 %v3167_v63, %v3166_v17  ;;  %v7205_v17 = vpack.c.bf16 %v3746_v56, %v3745_v30  ;;  %v3747_v63 = vld [vmem:[#allocation17 + $0x60] sm:$0xff]  ;;  %v3748_v54 = vld [vmem:[#allocation17 + $0x68] sm:$0xff] }
 0x836   :  { %v4744_v58 = vpop.f32.mrb[31].mxu0  ;;  %v7209_v14 = vpack.c.bf16 %v3748_v54, %v3747_v63  ;;  %v5418_v63 = vpack.c.bf16 %v3489_v23, %v3488_v55 }
 0x837   :  { %v3126_v5 = vadd.f32 %v6962_v41, %v4742_v35  ;;  %v4745_v52 = vadd.f32 %v4744_v58, %v4743_v10  ;;  %5359 = vmatprep.subr.bf16.mxu0 %v5358_v7  ;;  %v3197_v41 = vpop.permute.xlu1 %3196 }
 0x838   :  { %5361 = vmatpush3.bf16.msra.mxu0 %v5360_v0  ;;  %vm3242_vm3 = vcmp.eq.s32.totalorder %v6970_v51, %v3197_v41  ;;  %vm3241_vm5 = vcmp.eq.s32.totalorder %v6966_v26, %v3197_v41  ;;  %v3215_v0 = vpop.permute.xlu0 %3214 }
 0x839   :  { %v3129_v45 = vadd.f32 %v6964_v12, %v4745_v52  ;;  %v3168_v15 = vadd.f32 %v6977_v11, %v3126_v5  ;;  %vm3253_vm1 = vcmp.eq.s32.totalorder %v6966_v26, %v3215_v0 }
 0x83b   :  { %v3169_v39 = vadd.f32 %v6977_v11, %v3129_v45  ;;  %v3200_v12 = vpop.permute.xlu1 %3199 }
 0x83c   :  { %vm3244_vm6 = vcmp.eq.s32.totalorder %v6970_v51, %v3200_v12  ;;  %vm3243_vm7 = vcmp.eq.s32.totalorder %v6966_v26, %v3200_v12  ;;  %v3221_v2 = vpop.permute.xlu0 %3220 }
 0x83d   :  { %v5362_v4 = vpack.c.bf16 %v3169_v39, %v3168_v15 }
 0x83f   :  { %5363 = vmatprep.subr.bf16.mxu0 %v5362_v4  ;;  %v3206_v11 = vpop.permute.xlu1 %3205 }
 0x840   :  { %5365 = vmatpush3.bf16.msra.mxu0 %v5364_v48  ;;  %vm3248_vm10 = vcmp.eq.s32.totalorder %v6970_v51, %v3206_v11  ;;  %vm3247_vm11 = vcmp.eq.s32.totalorder %v6966_v26, %v3206_v11  ;;  %v3227_v27 = vpop.permute.xlu0 %3226 }
 0x841   :  { %5431 = vmatprep.subr.bf16.mxu0 %v7186_v37 }
 0x843   :  { %4057 = vmatmul.mubr.msk.f32.vlgmr.msra.gmra.mrb[32].mxu0 %vm3237_vm0, %v6077_v13  ;;  %v3212_v22 = vpop.permute.xlu1 %3211  ;;  %vm3254_vm0 = vcmp.eq.s32.totalorder %v6970_v51, %v3215_v0 }
 0x844   :  { %4058 = vmatprep.mubr.msk.f32.mxu0 %vm3240_vm2, %v6077_v13  ;;  %vm3252_vm14 = vcmp.eq.s32.totalorder %v6970_v51, %v3212_v22  ;;  %vm3251_vm15 = vcmp.eq.s32.totalorder %v6966_v26, %v3212_v22  ;;  %v3233_v57 = vpop.permute.xlu0 %3232  ;;  %5433 = vmatpush3.bf16.msra.mxu0 %v7186_v37 }
 0x845   :  { %5435 = vmatprep.subr.bf16.mxu0 %v7188_v6 }
 0x847   :  { %4059 = vmatmul.mubr.msk.f32.gmra.mrb[34].mxu0 %vm3239_vm4, %v6077_v13  ;;  %v3218_v61 = vpop.permute.xlu1 %3217  ;;  %vm3258_vm4 = vcmp.eq.s32.totalorder %v6970_v51, %v3221_v2 }
 0x848   :  { %4060 = vmatprep.mubr.msk.f32.mxu0 %vm3242_vm3, %v6077_v13  ;;  %vm3256_vm2 = vcmp.eq.s32.totalorder %v6970_v51, %v3218_v61  ;;  %vm3255_vm3 = vcmp.eq.s32.totalorder %v6966_v26, %v3218_v61  ;;  %5437 = vmatpush3.bf16.msra.mxu0 %v7188_v6 }
 0x849   :  { %5439 = vmatprep.subr.bf16.mxu0 %v7193_v16 }
 0x84b   :  { %4061 = vmatmul.mubr.msk.f32.gmra.mrb[36].mxu0 %vm3241_vm5, %v6077_v13  ;;  %vm3257_vm5 = vcmp.eq.s32.totalorder %v6966_v26, %v3221_v2  ;;  %v3224_v48 = vpop.permute.xlu1 %3223 }
 0x84c   :  { %4062 = vmatprep.mubr.msk.f32.mxu0 %vm3244_vm6, %v6077_v13  ;;  %vm3260_vm6 = vcmp.eq.s32.totalorder %v6970_v51, %v3224_v48  ;;  %5441 = vmatpush3.bf16.msra.mxu0 %v7193_v16 }
 0x84d   :  { %5443 = vmatprep.subr.bf16.mxu0 %v7197_v3 }
 0x84f   :  { %4063 = vmatmul.mubr.msk.f32.gmra.mrb[38].mxu0 %vm3243_vm7, %v6077_v13  ;;  %vm3259_vm7 = vcmp.eq.s32.totalorder %v6966_v26, %v3224_v48  ;;  %v3230_v38 = vpop.permute.xlu1 %3229 }
 0x850   :  { %4064 = vmatprep.mubr.msk.f32.mxu0 %vm3246_vm8, %v6077_v13  ;;  %vm3262_vm8 = vcmp.eq.s32.totalorder %v6970_v51, %v3227_v27  ;;  %5445 = vmatpush3.bf16.msra.mxu0 %v7197_v3 }
 0x851   :  { %5447 = vmatprep.subr.bf16.mxu0 %v7201_v8 }
 0x853   :  { %4065 = vmatmul.mubr.msk.f32.gmra.mrb[40].mxu0 %vm3245_vm9, %v6077_v13  ;;  %vm3261_vm9 = vcmp.eq.s32.totalorder %v6966_v26, %v3227_v27  ;;  %v3236_v1 = vpop.permute.xlu1 %3235 }
 0x854   :  { %4066 = vmatprep.mubr.msk.f32.mxu0 %vm3248_vm10, %v6077_v13  ;;  %vm3264_vm10 = vcmp.eq.s32.totalorder %v6970_v51, %v3230_v38  ;;  %5449 = vmatpush3.bf16.msra.mxu0 %v7201_v8 }
 0x855   :  { %5451 = vmatprep.subr.bf16.mxu0 %v7205_v17 }
 0x857   :  { %4067 = vmatmul.mubr.msk.f32.gmra.mrb[42].mxu0 %vm3247_vm11, %v6077_v13  ;;  %vm3263_vm11 = vcmp.eq.s32.totalorder %v6966_v26, %v3230_v38 }
 0x858   :  { %4068 = vmatprep.mubr.msk.f32.mxu0 %vm3250_vm12, %v6077_v13  ;;  %vm3266_vm12 = vcmp.eq.s32.totalorder %v6970_v51, %v3233_v57  ;;  %5453 = vmatpush3.bf16.msra.mxu0 %v7205_v17 }
 0x859   :  { %5455 = vmatprep.subr.bf16.mxu0 %v7209_v14 }
 0x85b   :  { %4069 = vmatmul.mubr.msk.f32.gmra.mrb[44].mxu0 %vm3249_vm13, %v6077_v13  ;;  %vm3265_vm13 = vcmp.eq.s32.totalorder %v6966_v26, %v3233_v57 }
 0x85c   :  { %4070 = vmatprep.mubr.msk.f32.mxu0 %vm3252_vm14, %v6077_v13  ;;  %vm3268_vm14 = vcmp.eq.s32.totalorder %v6970_v51, %v3236_v1  ;;  %v3506_v51 = vld [vmem:[#allocation16 + $0x60] sm:$0xff]  ;;  %5457 = vmatpush3.bf16.msra.mxu0 %v7209_v14 }
 0x85f   :  { %4071 = vmatmul.mubr.msk.f32.gmra.mrb[46].mxu0 %vm3251_vm15, %v6077_v13  ;;  %vm3267_vm15 = vcmp.eq.s32.totalorder %v6966_v26, %v3236_v1  ;;  %v5390_v26 = vpack.c.bf16 %v3507_v44, %v3506_v51  ;;  %v3483_v51 = vld [vmem:[#allocation14 + $0x28] sm:$0xff] }
 0x860   :  { %4072 = vmatprep.mubr.msk.f32.mxu0 %vm3254_vm0, %v6077_v13 }
 0x861   :  { %5391 = vmatprep.subr.bf16.mxu1 %v5390_v26 }
 0x862   :  { %5393 = vmatpush3.bf16.msra.mxu1 %v5390_v26 }
 0x863   :  { %4073 = vmatmul.mubr.msk.f32.gmra.mrb[48].mxu0 %vm3253_vm1, %v6077_v13 }
 0x864   :  { %4074 = vmatprep.mubr.msk.f32.mxu0 %vm3256_vm2, %v6077_v13 }
 0x867   :  { %4075 = vmatmul.mubr.msk.f32.gmra.mrb[50].mxu0 %vm3255_vm3, %v6077_v13 }
 0x868   :  { %4076 = vmatprep.mubr.msk.f32.mxu0 %vm3258_vm4, %v6077_v13 }
 0x86b   :  { %4077 = vmatmul.mubr.msk.f32.gmra.mrb[52].mxu0 %vm3257_vm5, %v6077_v13 }
 0x86c   :  { %4078 = vmatprep.mubr.msk.f32.mxu0 %vm3260_vm6, %v6077_v13 }
 0x86f   :  { %4079 = vmatmul.mubr.msk.f32.gmra.mrb[54].mxu0 %vm3259_vm7, %v6077_v13 }
 0x870   :  { %4080 = vmatprep.mubr.msk.f32.mxu0 %vm3262_vm8, %v6077_v13 }
 0x873   :  { %4081 = vmatmul.mubr.msk.f32.gmra.mrb[56].mxu0 %vm3261_vm9, %v6077_v13 }
 0x874   :  { %4082 = vmatprep.mubr.msk.f32.mxu0 %vm3264_vm10, %v6077_v13 }
 0x877   :  { %4083 = vmatmul.mubr.msk.f32.gmra.mrb[58].mxu0 %vm3263_vm11, %v6077_v13 }
 0x878   :  { %4084 = vmatprep.mubr.msk.f32.mxu0 %vm3266_vm12, %v6077_v13 }
 0x87b   :  { %4085 = vmatmul.mubr.msk.f32.gmra.mrb[60].mxu0 %vm3265_vm13, %v6077_v13 }
 0x87c   :  { %4086 = vmatprep.mubr.msk.f32.mxu0 %vm3268_vm14, %v6077_v13 }
 0x87f   :  { %4087 = vmatmul.mubr.msk.f32.gmra.mrb[62].mxu0 %vm3267_vm15, %v6077_v13  ;;  %v3508_v13 = vld [vmem:[#allocation16 + $0x70] sm:$0xff] }
 0x880   :  { %v5394_v50 = vpack.c.bf16 %v3509_v28, %v3508_v13  ;;  %v5406_v13 = vpack.c.bf16 %v3483_v51, %v3482_v36 }
 0x882   :  { %5395 = vmatprep.subr.bf16.mxu1 %v5394_v50 }
 0x883   :  { %5397 = vmatpush3.bf16.msra.mxu1 %v5394_v50  ;;  %v3484_v50 = vld [vmem:[#allocation14 + $0x30] sm:$0xff] }
 0x884   :  { %5399 = vmatprep.subr.bf16.mxu1 %v7183_v43  ;;  %v5410_v18 = vpack.c.bf16 %v3485_v20, %v3484_v50 }
 0x916   :  { %v4890_v35 = vpop.f32.mrb[32].mxu0 }
 0x917   :  { %v4891_v10 = vpop.f32.mrb[33].mxu0 }
 0x918   :  { %v7214_v7 = vadd.f32 %v4891_v10, %v4890_v35  ;;  %v3490_v35 = vld [vmem:[#allocation14 + $0x60] sm:$0xff]  ;;  %v3491_v10 = vld [vmem:[#allocation14 + $0x68] sm:$0xff] }
 0x91a   :  { %v4893_v58 = vpop.f32.mrb[34].mxu0 }
 0x91b   :  { %v4894_v5 = vpop.f32.mrb[35].mxu0 }
 0x91c   :  { %v7216_v52 = vadd.f32 %v4894_v5, %v4893_v58 }
 0x91e   :  { %v4896_v45 = vpop.f32.mrb[36].mxu0 }
 0x91f   :  { %v4897_v15 = vpop.f32.mrb[37].mxu0 }
 0x920   :  { %v7218_v39 = vadd.f32 %v4897_v15, %v4896_v45  ;;  %v5422_v15 = vpack.c.bf16 %v3491_v10, %v3490_v35 }
 0x922   :  { %v4899_v4 = vpop.f32.mrb[38].mxu0 }
 0x923   :  { %v4900_v31 = vpop.f32.mrb[39].mxu0 }
 0x924   :  { %v7220_v41 = vadd.f32 %v4900_v31, %v4899_v4  ;;  %v3492_v4 = vld [vmem:[#allocation14 + $0x70] sm:$0xff]  ;;  %v3493_v31 = vld [vmem:[#allocation14 + $0x78] sm:$0xff] }
 0x926   :  { %v4902_v12 = vpop.f32.mrb[40].mxu0 }
 0x927   :  { %v4903_v53 = vpop.f32.mrb[41].mxu0 }
 0x928   :  { %v7222_v11 = vadd.f32 %v4903_v53, %v4902_v12 }
 0x92a   :  { %v4905_v60 = vpop.f32.mrb[42].mxu0 }
 0x92b   :  { %v4906_v22 = vpop.f32.mrb[43].mxu0 }
 0x92c   :  { %v7224_v0 = vadd.f32 %v4906_v22, %v4905_v60  ;;  %v5426_v22 = vpack.c.bf16 %v3493_v31, %v3492_v4 }
 0x92e   :  { %v4908_v61 = vpop.f32.mrb[44].mxu0 }
 0x92f   :  { %v4909_v2 = vpop.f32.mrb[45].mxu0 }
 0x930   :  { %v7226_v48 = vadd.f32 %v4909_v2, %v4908_v61 }
 0x932   :  { %v4911_v27 = vpop.f32.mrb[46].mxu0 }
 0x933   :  { %v4912_v38 = vpop.f32.mrb[47].mxu0 }
 0x934   :  { %v7228_v57 = vadd.f32 %v4912_v38, %v4911_v27 }
 0x936   :  { %v4914_v1 = vpop.f32.mrb[48].mxu0 }
 0x937   :  { %v4915_v40 = vpop.f32.mrb[49].mxu0 }
 0x938   :  { %v4916_v21 = vadd.f32 %v4915_v40, %v4914_v1  ;;  %v4089_v40 = vld [vmem:[%s7290_s16] ss:$0 sm:$0xff]  ;;  %s6026_s16 = scalar_lea.vmem %s3877_s9, 1024 }
 0x939   :  { %p6027_p10 = scmp.ne.s32.totalorder %s3877_s9, %s6026_s16  ;;  %p6032_p12 = scmp.lt.s32.totalorder %s6026_s16, %s6026_s16 }
 0x93a   :  { %v4917_v29 = vpop.f32.mrb[50].mxu0  ;;  %5234 = vmatprep.mubr.f32.mxu1 %v4916_v21 }
 0x93b   :  { %v4918_v25 = vpop.f32.mrb[51].mxu0  ;;  %p6033_p13 = por %p6032_p12, %p6031_p11 }
 0x93c   :  { %v4919_v19 = vadd.f32 %v4918_v25, %v4917_v29 }
 0x93d   :  { %p6034_p0 = pnand %p6033_p13, %p6027_p10 }
 0x93e   :  { %5235 = vmatmul.mubr.f32.vlgmr.msra.gmra.mrb[32].mxu1 %v4919_v19  ;;  %v4920_v44 = vpop.f32.mrb[52].mxu0 }
 0x93f   :  { %5401 = vmatpush3.bf16.msra.mxu1 %v7183_v43  ;;  %v4921_v26 = vpop.f32.mrb[53].mxu0  ;;  %v5414_v43 = vpack.c.bf16 %v3487_v32, %v3486_v46 }
 0x940   :  { %5403 = vmatprep.subr.bf16.mxu1 %v5402_v62  ;;  %v4922_v28 = vadd.f32 %v4921_v26, %v4920_v44 }
 0x942   :  { %v4923_v49 = vpop.f32.mrb[54].mxu0  ;;  %5237 = vmatprep.mubr.f32.mxu1 %v4922_v28 }
 0x943   :  { %5405 = vmatpush3.bf16.msra.mxu1 %v5402_v62  ;;  %v4924_v34 = vpop.f32.mrb[55].mxu0 }
 0x944   :  { %5407 = vmatprep.subr.bf16.mxu1 %v5406_v13  ;;  %v4925_v47 = vadd.f32 %v4924_v34, %v4923_v49 }
 0x946   :  { %v4926_v33 = vpop.f32.mrb[56].mxu0  ;;  %5238 = vmatmul.mubr.f32.gmra.mrb[34].mxu1 %v4925_v47 }
 0x947   :  { %5409 = vmatpush3.bf16.msra.mxu1 %v5406_v13  ;;  %v4927_v24 = vpop.f32.mrb[57].mxu0 }
 0x948   :  { %5411 = vmatprep.subr.bf16.mxu1 %v5410_v18  ;;  %v4928_v9 = vadd.f32 %v4927_v24, %v4926_v33 }
 0x94a   :  { %v4929_v30 = vpop.f32.mrb[58].mxu0  ;;  %5240 = vmatprep.mubr.f32.mxu1 %v4928_v9 }
 0x94b   :  { %5413 = vmatpush3.bf16.msra.mxu1 %v5410_v18  ;;  %v4930_v56 = vpop.f32.mrb[59].mxu0 }
 0x94c   :  { %5415 = vmatprep.subr.bf16.mxu1 %v5414_v43  ;;  %v4931_v54 = vadd.f32 %v4930_v56, %v4929_v30 }
 0x94e   :  { %v4932_v58 = vpop.f32.mrb[60].mxu0  ;;  %5241 = vmatmul.mubr.f32.gmra.mrb[36].mxu1 %v4931_v54 }
 0x94f   :  { %5417 = vmatpush3.bf16.msra.mxu1 %v5414_v43  ;;  %v4933_v5 = vpop.f32.mrb[61].mxu0 }
 0x950   :  { %5419 = vmatprep.subr.bf16.mxu1 %v5418_v63  ;;  %v4934_v45 = vadd.f32 %v4933_v5, %v4932_v58 }
 0x952   :  { %v4935_v12 = vpop.f32.mrb[62].mxu0  ;;  %5243 = vmatprep.mubr.f32.mxu1 %v4934_v45 }
 0x953   :  { %5421 = vmatpush3.bf16.msra.mxu1 %v5418_v63  ;;  %v4936_v53 = vpop.f32.mrb[63].mxu0 }
 0x954   :  { %5423 = vmatprep.subr.bf16.mxu1 %v5422_v15  ;;  %v4937_v60 = vadd.f32 %v4936_v53, %v4935_v12 }
 0x956   :  { %5244 = vmatmul.mubr.f32.gmra.mrb[38].mxu1 %v4937_v60 }
 0x957   :  { %5425 = vmatpush3.bf16.msra.mxu1 %v5422_v15  ;;  %5278 = vmatprep.mubr.f32.mxu1 %v7214_v7 }
 0x958   :  { %5427 = vmatprep.subr.bf16.mxu1 %v5426_v22 }
 0x95b   :  { %5429 = vmatpush3.bf16.msra.mxu1 %v5426_v22 }
 0x95c   :  { %5462 = vmatprep.subr.bf16.mxu1 %v7186_v37 }
 0x95e   :  { %5279 = vmatmul.mubr.f32.vlgmr.msra.gmra.mrb[32].mxu1 %v7216_v52 }
 0x95f   :  { %5281 = vmatprep.mubr.f32.mxu1 %v7218_v39  ;;  %5470 = vmatpush3.bf16.msra.mxu1 %v7186_v37  ;;  %v3749_v37 = vld [vmem:[#allocation17 + $0x70] sm:$0xff] }
 0x960   :  { %5463 = vmatprep.subr.bf16.mxu1 %v7188_v6 }
 0x962   :  { %5282 = vmatmul.mubr.f32.gmra.mrb[34].mxu1 %v7220_v41 }
 0x963   :  { %5284 = vmatprep.mubr.f32.mxu1 %v7222_v11  ;;  %5471 = vmatpush3.bf16.msra.mxu1 %v7188_v6  ;;  %v3750_v6 = vld [vmem:[#allocation17 + $0x78] sm:$0xff] }
 0x964   :  { %5464 = vmatprep.subr.bf16.mxu1 %v7193_v16 }
 0x966   :  { %5285 = vmatmul.mubr.f32.gmra.mrb[36].mxu1 %v7224_v0 }
 0x967   :  { %5287 = vmatprep.mubr.f32.mxu1 %v7226_v48  ;;  %5472 = vmatpush3.bf16.msra.mxu1 %v7193_v16  ;;  %v5458_v16 = vpack.c.bf16 %v3750_v6, %v3749_v37 }
 0x968   :  { %5465 = vmatprep.subr.bf16.mxu1 %v7197_v3 }
 0x969   :  { %5459 = vmatprep.subr.bf16.mxu0 %v5458_v16 }
 0x96a   :  { %5288 = vmatmul.mubr.f32.gmra.mrb[38].mxu1 %v7228_v57  ;;  %5461 = vmatpush3.bf16.msra.mxu0 %v5458_v16 }
 0x96b   :  { %5473 = vmatpush3.bf16.msra.mxu1 %v7197_v3  ;;  %v4088_v3 = vld [vmem:[%s7288_s14] ss:$0 sm:$0xff] }
 0x96c   :  { %5466 = vmatprep.subr.bf16.mxu1 %v7201_v8 }
 0x96f   :  { %5474 = vmatpush3.bf16.msra.mxu1 %v7201_v8 }
 0x970   :  { %5467 = vmatprep.subr.bf16.mxu1 %v7205_v17 }
 0x973   :  { %5475 = vmatpush3.bf16.msra.mxu1 %v7205_v17 }
 0x974   :  { %5468 = vmatprep.subr.bf16.mxu1 %v7209_v14 }
 0x977   :  { %5476 = vmatpush3.bf16.msra.mxu1 %v7209_v14 }
 0x978   :  { %5469 = vmatprep.subr.bf16.mxu1 %v5458_v16 }
 0x97b   :  { %5477 = vmatpush3.bf16.msra.mxu1 %v5458_v16 }
 0xa31   :  { %v5280_v8 = vpop.f32.mrb[32].mxu1 }
 0xa32   :  { %v3681_v7 = vpop.f32.mrb[33].mxu1  ;;  %v3728_v39 = vadd.f32 %v5280_v8, %v4088_v3 }
 0xa33   :  { %v3727_v52 = vadd.f32 %v4088_v3, %v3681_v7 }
 0xa35   :  { %v5283_v17 = vpop.f32.mrb[34].mxu1  ;;  %5322 = vmatprep.mubr.f32.mxu0 %v3727_v52 }
 0xa36   :  { %v3691_v41 = vpop.f32.mrb[35].mxu1  ;;  %5323 = vmatmul.mubr.f32.vlgmr.msra.gmra.mrb[64].mxu0 %v3728_v39  ;;  %v3730_v11 = vadd.f32 %v5283_v17, %v4088_v3 }
 0xa37   :  { %v3729_v14 = vadd.f32 %v4088_v3, %v3691_v41 }
 0xa39   :  { %v5286_v0 = vpop.f32.mrb[36].mxu1  ;;  %5325 = vmatprep.mubr.f32.mxu0 %v3729_v14 }
 0xa3a   :  { %v3701_v61 = vpop.f32.mrb[37].mxu1  ;;  %5326 = vmatmul.mubr.f32.gmra.mrb[66].mxu0 %v3730_v11  ;;  %v3732_v48 = vadd.f32 %v5286_v0, %v4088_v3 }
 0xa3b   :  { %v3731_v2 = vadd.f32 %v4088_v3, %v3701_v61 }
 0xa3d   :  { %v5289_v27 = vpop.f32.mrb[38].mxu1  ;;  %5328 = vmatprep.mubr.f32.mxu1 %v3731_v2 }
 0xa3e   :  { %v3711_v38 = vpop.f32.mrb[39].mxu1  ;;  %5329 = vmatmul.mubr.f32.vlgmr.msra.gmra.mrb[40].mxu1 %v3732_v48  ;;  %v3734_v1 = vadd.f32 %v5289_v27, %v4088_v3 }
 0xa3f   :  { %v3733_v57 = vadd.f32 %v4088_v3, %v3711_v38 }
 0xa41   :  { %5331 = vmatprep.mubr.f32.mxu1 %v3733_v57 }
 0xa42   :  { %5332 = vmatmul.mubr.f32.gmra.mrb[42].mxu1 %v3734_v1 }
 0xb09   :  { %v5324_v21 = vpop.f32.mrb[64].mxu0 }
 0xb0a   :  { %v3830_v59 = vadd.f32 %v5324_v21, %v4089_v40  ;;  %v3824_v42 = vpop.f32.mrb[65].mxu0 }
 0xb0b   :  { %v3825_v29 = vadd.f32 %v4089_v40, %v3824_v42 }
 0xb0c   :  { %3864 = vst [vmem:[#allocation19 + $0x8] sm:$0xff] %v3830_v59 }
 0xb0d   :  { %3863 = vst [vmem:[#allocation19] sm:$0xff] %v3825_v29  ;;  %v5327_v25 = vpop.f32.mrb[66].mxu0 }
 0xb0e   :  { %v3840_v19 = vadd.f32 %v5327_v25, %v4089_v40  ;;  %v3834_v62 = vpop.f32.mrb[67].mxu0 }
 0xb0f   :  { %v3835_v36 = vadd.f32 %v4089_v40, %v3834_v62 }
 0xb10   :  { %3866 = vst [vmem:[#allocation19 + $0x18] sm:$0xff] %v3840_v19 }
 0xb11   :  { %v5330_v51 = vpop.f32.mrb[40].mxu1  ;;  %3865 = vst [vmem:[#allocation19 + $0x10] sm:$0xff] %v3835_v36 }
 0xb12   :  { %v3850_v44 = vadd.f32 %v5330_v51, %v4089_v40  ;;  %v3844_v26 = vpop.f32.mrb[41].mxu1 }
 0xb13   :  { %v3845_v13 = vadd.f32 %v4089_v40, %v3844_v26 }
 0xb14   :  { %3868 = vst [vmem:[#allocation19 + $0x28] sm:$0xff] %v3850_v44 }
 0xb15   :  { %3867 = vst [vmem:[#allocation19 + $0x20] sm:$0xff] %v3845_v13  ;;  %v5333_v28 = vpop.f32.mrb[42].mxu1 }
 0xb16   :  { %v3860_v50 = vadd.f32 %v5333_v28, %v4089_v40  ;;  %v3854_v20 = vpop.f32.mrb[43].mxu1 }
 0xb17   :  { %v3855_v49 = vadd.f32 %v4089_v40, %v3854_v20 }
 0xb18   :  { %3870 = vst [vmem:[#allocation19 + $0x38] sm:$0xff] %v3860_v50 }
 0xb19   :  { %3869 = vst [vmem:[#allocation19 + $0x30] sm:$0xff] %v3855_v49 }
 0xb1a   :  { %6037 = shalt.err (!%p6034_p0)
}
 0xb1b   :  { %s6038_s6 = scalar_lea.hbm %s7291_s17, 1024 }
 0xb1c   :  { %p6039_p1 = scmp.ne.s32.totalorder %s7291_s17, %s6038_s6  ;;  %p6042_p2 = scmp.lt.u32.totalorder %s6038_s6, %s7291_s17 }
 0xb1e   :  { %p6044_p3 = pnand %p6042_p2, %p6039_p1 }
 0xb20   :  { %6047 = shalt.err (!%p6044_p3)
}
 0xb21   :  { %3882 = dma.vmem_to_hbm [thread:$0]  %s3877_s9, 1024, %s7291_s17, [#allocation4], %s7303_s26, %s7303_s26, %s7302_s7  }
 0xb22   :  { %6060 = dma.done.wait [#allocation4], 1024  }
 0xb23   :  { %6061 = vsyncadd [#allocation4], 4294966272 }
 0xb24   :  { %3886 = vsyncpa [#allocation3], 1 }
 0xb25   :  { %3887 = vsyncpa [#allocation6], 1 }
 0xb26   :  { %3888 = vsyncpa [#allocation9], 1 }
 0xb27   :  { %3889 = vsyncpa [#allocation12], 1 }
 0xb28   :  { %3890 = vsyncpa [#allocation15], 1 }
 0xb29   :  { %3891 = vsyncpa [#allocation18], 1 }
 0xb2a   :  { %3892 = vsyncpa [#allocation4], 1 }

</bundles_post_ra>
